<compile_context>
chip_gen: v7x
topology: tpu7x:2x2x1
jax: 0.10.0
libtpu: 0.0.40
codegen_flags: <defaults>
</compile_context>

<pallas_src>
import jax
import jax.numpy as jnp
import numpy as np
from jax import lax
from jax.experimental import pallas as pl
from jax.experimental.pallas import tpu as pltpu

K = 3
K2 = K * K
BN_EPS = 1e-5

# Column layout of the per-channel weight slab wA (lane axis):
_CW_W1 = 0                    # [0:9]    grouped 1x1 weights, avg-pool 1/9 folded in
_CW_MAX = K2                  # [9]      max_k of the above (softmax stabiliser)
_CW_MIN = K2 + 1              # [10]     min_k
_CW_W2 = K2 + 2               # [11:92]  depthwise 3x3 * BN scale, col = k*9 + t
_CW_SH2 = _CW_W2 + K2 * K2    # [92:101] BN shift per output tap
_LANE_A = 128


def _round_up(x, m):
    return (x + m - 1) // m * m


def _make_kernel(*, Cp, W, TP, SUB, HALO):
    n_sub = TP // SUB
    CK = K2 * Cp

    def kernel(x_ref, m_ref, wA_ref, wB_ref, out_ref, wd_scr):
        # Grid-invariant weight columns: hoist loads out of the sub-tile loop.
        w3 = wB_ref[:, 0:CK]                        # (O, 9*Cp) final conv, BN folded
        sh3 = wB_ref[:, CK:CK + 1]                  # (O, 1)
        wmax = wA_ref[:, _CW_MAX:_CW_MAX + 1]       # (Cp, 1)
        wmin = wA_ref[:, _CW_MIN:_CW_MIN + 1]       # (Cp, 1)

        for sub in range(n_sub):                    # in-kernel sub-tiling (vregs)
            off = sub * SUB
            ml = m_ref[0:1, off:off + SUB]          # (1, SUB)  col > 0
            mr = m_ref[1:2, off:off + SUB]          # (1, SUB)  col < W-1

            # ---- build the 9 taps from the halo'd slab: static lane slices.
            # Out-of-image rows read the zero halo; only column wrap is masked.
            taps = []
            for dy in range(K):
                for dx in range(K):
                    a = HALO + off + (dy - 1) * W + (dx - 1)
                    v = x_ref[:, a:a + SUB]         # (Cp, SUB)
                    if dx == 0:
                        v = v * ml
                    elif dx == K - 1:
                        v = v * mr
                    taps.append(v)

            # ---- get_weight: AvgPool(3,pad=1) + grouped 1x1 + softmax over taps.
            pooled = taps[0]
            for v in taps[1:]:
                pooled = pooled + v                 # 1/9 is folded into the w1 cols
            # Exact stabiliser: logits_k = pooled * w1_k (bias-free grouped 1x1),
            # so max_k logits = max(pooled*max_k w1, pooled*min_k w1).  This trick
            # relies on get_weight having NO bias (true for the reference module).
            mstab = jnp.maximum(pooled * wmax, pooled * wmin)
            es, den = [], None
            for k in range(K2):
                e = jnp.exp(pooled * wA_ref[:, _CW_W1 + k:_CW_W1 + k + 1] - mstab)
                es.append(e)
                den = e if den is None else den + e
            r = pl.reciprocal(den, approx=True)     # EUP slot
            r = r * (2.0 - den * r)                 # one Newton step -> near-exact

            # ---- generate_feature (depthwise 3x3 + folded BN + ReLU), weighted
            # data written tap-major into scratch so the final conv is ONE matmul.
            for k in range(K2):
                f = taps[0] * wA_ref[:, _CW_W2 + k * K2:_CW_W2 + k * K2 + 1]
                for t in range(1, K2):
                    c0 = _CW_W2 + k * K2 + t
                    f = f + taps[t] * wA_ref[:, c0:c0 + 1]
                f = f + wA_ref[:, _CW_SH2 + k:_CW_SH2 + k + 1]
                f = jnp.maximum(f, 0.0)
                wd_scr[k * Cp:(k + 1) * Cp, :] = f * (es[k] * r)

            # ---- final 3x3/stride-3 conv on rearranged data == per-pixel matmul.
            o = jnp.dot(w3, wd_scr[...], preferred_element_type=jnp.float32) + sh3
            out_ref[:, off:off + SUB] = jnp.maximum(o, 0.0).astype(out_ref.dtype)

    return kernel


def rfaconv_pallas(x_nchw, params):
    (w1_t, w2_t, g2, b2, m2, v2, w3_t, b3, g3, bt3, m3, v3) = params
    B, C, H, W = x_nchw.shape
    O = w3_t.shape[0]
    P = H * W
    f32 = jnp.float32

    Cp = _round_up(C, 8)                       # sublane-align channels
    Pp = _round_up(P, 128)                     # lane-align pixels (no TP = P fallback)
    HALO = _round_up(max(W + 1, 128), 128)

    # Pixel tile: biggest 128-multiple dividing Pp, but keep >= 2 grid steps for
    # v7x megacore when possible.
    cands = [tp for tp in (1024, 512, 256, 128) if Pp % tp == 0]
    TP = cands[0]
    if B * (Pp // TP) < 2:
        for tp in cands:
            if B * (Pp // tp) >= 2:
                TP = tp
                break
    SUB = min(TP, 256)                         # in-kernel sub-tile size
    n_pt = Pp // TP
    TPH = TP + 2 * HALO

    # ------------- input: flat pixels-on-lanes, per-tile halo'd slabs -------------
    # Replaces the 9x im2col blob with a <= (1 + 2*HALO/TP)x duplicated stream.
    xf = x_nchw.astype(f32).reshape(B, C, P)
    xf = jnp.pad(xf, ((0, 0), (0, Cp - C), (0, 0)))
    xh = jnp.pad(xf, ((0, 0), (0, 0), (HALO, HALO + Pp - P)))
    x_tiles = jnp.stack([xh[:, :, t * TP:t * TP + TPH] for t in range(n_pt)], axis=1)

    # Column-boundary masks (row boundaries are covered by the zero halo).
    col = jnp.arange(Pp, dtype=jnp.int32) % W
    masks = jnp.stack([col > 0, col < W - 1], axis=0).astype(f32)        # (2, Pp)

    # ------------- fold parameters (inference BN) into two small slabs -------------
    sc2 = g2 / jnp.sqrt(v2 + BN_EPS)
    s3 = g3 / jnp.sqrt(v3 + BN_EPS)

    w1s = (w1_t.reshape(C, K2) / float(K2)).astype(f32)                  # 1/9 folded
    w2c = (w2_t.reshape(C, K2, K2) * sc2.reshape(C, K2, 1)).astype(f32)  # (c, k, t)
    sh2 = (b2 - m2 * sc2).reshape(C, K2).astype(f32)

    wA = jnp.zeros((Cp, _LANE_A), f32)
    wA = wA.at[:C, _CW_W1:_CW_W1 + K2].set(w1s)
    wA = wA.at[:C, _CW_MAX].set(w1s.max(axis=1))
    wA = wA.at[:C, _CW_MIN].set(w1s.min(axis=1))
    wA = wA.at[:C, _CW_W2:_CW_W2 + K2 * K2].set(w2c.reshape(C, K2 * K2))
    wA = wA.at[:C, _CW_SH2:_CW_SH2 + K2].set(sh2)

    CK = K2 * Cp
    LB = _round_up(CK + 1, 128)
    w3r = (w3_t.reshape(O, C, K2) * s3.reshape(O, 1, 1)).astype(f32)
    w3p = jnp.zeros((O, K2, Cp), f32).at[:, :, :C].set(jnp.transpose(w3r, (0, 2, 1)))
    wB = jnp.zeros((O, LB), f32)
    wB = wB.at[:, :CK].set(w3p.reshape(O, CK))                           # k-major, c-minor
    wB = wB.at[:, CK].set(bt3 + (b3 - m3) * s3)                          # conv bias + BN

    # ------------- explicit VMEM guard (v7x: 64 MiB physical) -------------
    est_words = (2 * (Cp * TPH + O * TP) + Cp * _LANE_A + O * LB + 2 * TP
                 + K2 * Cp * SUB + 48 * Cp * SUB)
    vmem_limit = int(min(max(8 * est_words, 32 * 1024 * 1024), 64 * 1024 * 1024))

    kernel = _make_kernel(Cp=Cp, W=W, TP=TP, SUB=SUB, HALO=HALO)
    out = pl.pallas_call(
        kernel,
        out_shape=jax.ShapeDtypeStruct((B, O, Pp), f32),
        grid=(B, n_pt),
        in_specs=[
            pl.BlockSpec((None, None, Cp, TPH), lambda b, t: (b, t, 0, 0)),  # x slab
            pl.BlockSpec((2, TP), lambda b, t: (0, t)),                      # col masks
            pl.BlockSpec((Cp, _LANE_A), lambda b, t: (0, 0)),                # wA slab
            pl.BlockSpec((O, LB), lambda b, t: (0, 0)),                      # wB slab
        ],
        out_specs=pl.BlockSpec((None, O, TP), lambda b, t: (b, 0, t)),
        scratch_shapes=[pltpu.VMEM((CK, SUB), f32)],
        compiler_params=pltpu.CompilerParams(
            dimension_semantics=("parallel", "parallel"),
            vmem_limit_bytes=vmem_limit),
    )(x_tiles, masks, wA, wB)

    return out[:, :, :P].reshape(B, O, H, W)     # NCHW via free reshape (no transpose)


# --------------------------- pure-JAX reference (NCHW) ---------------------------
def rfaconv_ref(x, params):
    (w1_t, w2_t, g2, b2, m2, v2, w3_t, b3, g3, bt3, m3, v3) = params
    B, C, H, W = x.shape
    dn = ('NCHW', 'OIHW', 'NCHW')
    # get_weight: AvgPool2d(3, pad=1, stride=1, count_include_pad=True) + grouped 1x1
    pooled = lax.reduce_window(x, 0.0, lax.add, (1, 1, K, K), (1, 1, 1, 1),
                               [(0, 0), (0, 0), (1, 1), (1, 1)]) / (K * K)
    weight = lax.conv_general_dilated(pooled, w1_t, (1, 1), 'VALID',
                                      feature_group_count=C, dimension_numbers=dn)
    h, w = weight.shape[2:]
    weighted = jax.nn.softmax(weight.reshape(B, C, K2, h, w), axis=2)
    # generate_feature: depthwise 3x3 conv + BN(eval) + ReLU
    feat = lax.conv_general_dilated(x, w2_t, (1, 1), [(1, 1), (1, 1)],
                                    feature_group_count=C, dimension_numbers=dn)
    feat = (feat - m2[None, :, None, None]) / jnp.sqrt(v2 + BN_EPS)[None, :, None, None] \
        * g2[None, :, None, None] + b2[None, :, None, None]
    feat = jnp.maximum(feat, 0.0).reshape(B, C, K2, h, w)
    wd = feat * weighted
    # rearrange 'b c (n1 n2) h w -> b c (h n1) (w n2)'
    conv_data = wd.reshape(B, C, K, K, h, w).transpose(0, 1, 4, 2, 5, 3).reshape(B, C, h * K, w * K)
    out = lax.conv_general_dilated(conv_data, w3_t, (K, K), 'VALID', dimension_numbers=dn)
    out = out + b3[None, :, None, None]
    out = (out - m3[None, :, None, None]) / jnp.sqrt(v3 + BN_EPS)[None, :, None, None] \
        * g3[None, :, None, None] + bt3[None, :, None, None]
    return jnp.maximum(out, 0.0)


def init_params(key, C, O):
    ks = jax.random.split(key, 12)
    w1_t = 0.5 * jax.random.normal(ks[0], (C * K2, 1, 1, 1), jnp.float32)
    w2_t = 0.3 * jax.random.normal(ks[1], (C * K2, 1, K, K), jnp.float32)
    g2 = 1.0 + 0.2 * jax.random.normal(ks[2], (C * K2,), jnp.float32)
    b2 = 0.1 * jax.random.normal(ks[3], (C * K2,), jnp.float32)
    m2 = 0.1 * jax.random.normal(ks[4], (C * K2,), jnp.float32)
    v2 = 0.5 + jax.random.uniform(ks[5], (C * K2,), jnp.float32)
    w3_t = 0.2 * jax.random.normal(ks[6], (O, C, K, K), jnp.float32)
    b3 = 0.1 * jax.random.normal(ks[7], (O,), jnp.float32)
    g3 = 1.0 + 0.2 * jax.random.normal(ks[8], (O,), jnp.float32)
    bt3 = 0.1 * jax.random.normal(ks[9], (O,), jnp.float32)
    m3 = 0.1 * jax.random.normal(ks[10], (O,), jnp.float32)
    v3 = 0.5 + jax.random.uniform(ks[11], (O,), jnp.float32)
    return (w1_t, w2_t, g2, b2, m2, v2, w3_t, b3, g3, bt3, m3, v3)


if __name__ == "__main__":
    key = jax.random.PRNGKey(0)
    kx, kp = jax.random.split(key)
    B, C, H, W, O = 2, 4, 16, 16, 8
    x = jax.random.normal(kx, (B, C, H, W), jnp.float32)
    params = init_params(kp, C, O)

    out = jax.block_until_ready(rfaconv_pallas(x, params))
    ref = jax.block_until_ready(rfaconv_ref(x, params))
    # The kernel path is now near-exact f32 (Newton-corrected reciprocal, exact
    # VPU depthwise conv); the tolerance is kept at the previously validated
    # 5e-3 mainly to absorb the XLA reference conv path's default TPU matmul
    # precision, not kernel approximation error.
    np.testing.assert_allclose(np.asarray(out), np.asarray(ref), atol=5e-3, rtol=5e-3)
    print("KERNEL_OK")
</pallas_src>

<mosaic_0001>
module attributes {stable_mosaic.version = 11 : i64} {
  func.func @kernel(%arg0: i32, %arg1: i32, %arg2: memref<1x1x8x512xf32, #tpu.memory_space<vmem>>, %arg3: memref<2x256xf32, #tpu.memory_space<vmem>>, %arg4: memref<8x128xf32, #tpu.memory_space<vmem>>, %arg5: memref<8x128xf32, #tpu.memory_space<vmem>>, %arg6: memref<1x8x256xf32, #tpu.memory_space<vmem>>, %arg7: memref<72x256xf32, #tpu.memory_space<vmem>>) attributes {dimension_semantics = [#tpu.dimension_semantics<parallel>, #tpu.dimension_semantics<parallel>], iteration_bounds = array<i64: 2, 1>, scalar_prefetch = 0 : i64, scratch_operands = 1 : i64, tpu.core_type = #tpu.core_type<tc>, window_params = [{transform_indices = @transform_0, window_bounds = array<i64: 1, 1, 8, 512>}, {transform_indices = @transform_1, window_bounds = array<i64: 2, 256>}, {pipeline_mode = #tpu.pipeline_mode<synchronous>, transform_indices = @transform_2, window_bounds = array<i64: 8, 128>}, {pipeline_mode = #tpu.pipeline_mode<synchronous>, transform_indices = @transform_3, window_bounds = array<i64: 8, 128>}, {transform_indices = @transform_4, window_bounds = array<i64: 1, 8, 256>}]} {
    %c0 = arith.constant 0 : index
    %c0_0 = arith.constant 0 : index
    %0 = vector.load %arg5[%c0, %c0_0] : memref<8x128xf32, #tpu.memory_space<vmem>>, vector<8x72xf32>
    %c0_1 = arith.constant 0 : index
    %c72 = arith.constant 72 : index
    %1 = vector.load %arg5[%c0_1, %c72] : memref<8x128xf32, #tpu.memory_space<vmem>>, vector<8x1xf32>
    %c0_2 = arith.constant 0 : index
    %c9 = arith.constant 9 : index
    %2 = vector.load %arg4[%c0_2, %c9] : memref<8x128xf32, #tpu.memory_space<vmem>>, vector<8x1xf32>
    %c0_3 = arith.constant 0 : index
    %c10 = arith.constant 10 : index
    %3 = vector.load %arg4[%c0_3, %c10] : memref<8x128xf32, #tpu.memory_space<vmem>>, vector<8x1xf32>
    %c0_4 = arith.constant 0 : index
    %c0_5 = arith.constant 0 : index
    %4 = vector.load %arg3[%c0_4, %c0_5] : memref<2x256xf32, #tpu.memory_space<vmem>>, vector<1x256xf32>
    %c1 = arith.constant 1 : index
    %c0_6 = arith.constant 0 : index
    %5 = vector.load %arg3[%c1, %c0_6] : memref<2x256xf32, #tpu.memory_space<vmem>>, vector<1x256xf32>
    %c0_7 = arith.constant 0 : index
    %c0_8 = arith.constant 0 : index
    %c0_9 = arith.constant 0 : index
    %c111 = arith.constant 111 : index
    %6 = vector.load %arg2[%c0_7, %c0_8, %c0_9, %c111] : memref<1x1x8x512xf32, #tpu.memory_space<vmem>>, vector<1x1x8x256xf32>
    %7 = vector.shape_cast %6 : vector<1x1x8x256xf32> to vector<8x256xf32>
    %8 = vector.broadcast %4 : vector<1x256xf32> to vector<8x256xf32>
    %9 = arith.mulf %7, %8 : vector<8x256xf32>
    %c0_10 = arith.constant 0 : index
    %c0_11 = arith.constant 0 : index
    %c0_12 = arith.constant 0 : index
    %c112 = arith.constant 112 : index
    %10 = vector.load %arg2[%c0_10, %c0_11, %c0_12, %c112] : memref<1x1x8x512xf32, #tpu.memory_space<vmem>>, vector<1x1x8x256xf32>
    %11 = vector.shape_cast %10 : vector<1x1x8x256xf32> to vector<8x256xf32>
    %c0_13 = arith.constant 0 : index
    %c0_14 = arith.constant 0 : index
    %c0_15 = arith.constant 0 : index
    %c113 = arith.constant 113 : index
    %12 = vector.load %arg2[%c0_13, %c0_14, %c0_15, %c113] : memref<1x1x8x512xf32, #tpu.memory_space<vmem>>, vector<1x1x8x256xf32>
    %13 = vector.shape_cast %12 : vector<1x1x8x256xf32> to vector<8x256xf32>
    %14 = vector.broadcast %5 : vector<1x256xf32> to vector<8x256xf32>
    %15 = arith.mulf %13, %14 : vector<8x256xf32>
    %c0_16 = arith.constant 0 : index
    %c0_17 = arith.constant 0 : index
    %c0_18 = arith.constant 0 : index
    %c127 = arith.constant 127 : index
    %16 = vector.load %arg2[%c0_16, %c0_17, %c0_18, %c127] : memref<1x1x8x512xf32, #tpu.memory_space<vmem>>, vector<1x1x8x256xf32>
    %17 = vector.shape_cast %16 : vector<1x1x8x256xf32> to vector<8x256xf32>
    %18 = vector.broadcast %4 : vector<1x256xf32> to vector<8x256xf32>
    %19 = arith.mulf %17, %18 : vector<8x256xf32>
    %c0_19 = arith.constant 0 : index
    %c0_20 = arith.constant 0 : index
    %c0_21 = arith.constant 0 : index
    %c128 = arith.constant 128 : index
    %20 = vector.load %arg2[%c0_19, %c0_20, %c0_21, %c128] : memref<1x1x8x512xf32, #tpu.memory_space<vmem>>, vector<1x1x8x256xf32>
    %21 = vector.shape_cast %20 : vector<1x1x8x256xf32> to vector<8x256xf32>
    %c0_22 = arith.constant 0 : index
    %c0_23 = arith.constant 0 : index
    %c0_24 = arith.constant 0 : index
    %c129 = arith.constant 129 : index
    %22 = vector.load %arg2[%c0_22, %c0_23, %c0_24, %c129] : memref<1x1x8x512xf32, #tpu.memory_space<vmem>>, vector<1x1x8x256xf32>
    %23 = vector.shape_cast %22 : vector<1x1x8x256xf32> to vector<8x256xf32>
    %24 = vector.broadcast %5 : vector<1x256xf32> to vector<8x256xf32>
    %25 = arith.mulf %23, %24 : vector<8x256xf32>
    %c0_25 = arith.constant 0 : index
    %c0_26 = arith.constant 0 : index
    %c0_27 = arith.constant 0 : index
    %c143 = arith.constant 143 : index
    %26 = vector.load %arg2[%c0_25, %c0_26, %c0_27, %c143] : memref<1x1x8x512xf32, #tpu.memory_space<vmem>>, vector<1x1x8x256xf32>
    %27 = vector.shape_cast %26 : vector<1x1x8x256xf32> to vector<8x256xf32>
    %28 = vector.broadcast %4 : vector<1x256xf32> to vector<8x256xf32>
    %29 = arith.mulf %27, %28 : vector<8x256xf32>
    %c0_28 = arith.constant 0 : index
    %c0_29 = arith.constant 0 : index
    %c0_30 = arith.constant 0 : index
    %c144 = arith.constant 144 : index
    %30 = vector.load %arg2[%c0_28, %c0_29, %c0_30, %c144] : memref<1x1x8x512xf32, #tpu.memory_space<vmem>>, vector<1x1x8x256xf32>
    %31 = vector.shape_cast %30 : vector<1x1x8x256xf32> to vector<8x256xf32>
    %c0_31 = arith.constant 0 : index
    %c0_32 = arith.constant 0 : index
    %c0_33 = arith.constant 0 : index
    %c145 = arith.constant 145 : index
    %32 = vector.load %arg2[%c0_31, %c0_32, %c0_33, %c145] : memref<1x1x8x512xf32, #tpu.memory_space<vmem>>, vector<1x1x8x256xf32>
    %33 = vector.shape_cast %32 : vector<1x1x8x256xf32> to vector<8x256xf32>
    %34 = vector.broadcast %5 : vector<1x256xf32> to vector<8x256xf32>
    %35 = arith.mulf %33, %34 : vector<8x256xf32>
    %36 = arith.addf %9, %11 : vector<8x256xf32>
    %37 = arith.addf %36, %15 : vector<8x256xf32>
    %38 = arith.addf %37, %19 : vector<8x256xf32>
    %39 = arith.addf %38, %21 : vector<8x256xf32>
    %40 = arith.addf %39, %25 : vector<8x256xf32>
    %41 = arith.addf %40, %29 : vector<8x256xf32>
    %42 = arith.addf %41, %31 : vector<8x256xf32>
    %43 = arith.addf %42, %35 : vector<8x256xf32>
    %44 = vector.broadcast %2 : vector<8x1xf32> to vector<8x256xf32>
    %45 = arith.mulf %43, %44 : vector<8x256xf32>
    %46 = vector.broadcast %3 : vector<8x1xf32> to vector<8x256xf32>
    %47 = arith.mulf %43, %46 : vector<8x256xf32>
    %48 = arith.maximumf %45, %47 : vector<8x256xf32>
    %c0_34 = arith.constant 0 : index
    %c0_35 = arith.constant 0 : index
    %49 = vector.load %arg4[%c0_34, %c0_35] : memref<8x128xf32, #tpu.memory_space<vmem>>, vector<8x1xf32>
    %50 = vector.broadcast %49 : vector<8x1xf32> to vector<8x256xf32>
    %51 = arith.mulf %43, %50 : vector<8x256xf32>
    %52 = arith.subf %51, %48 : vector<8x256xf32>
    %53 = math.exp %52 : vector<8x256xf32>
    %c0_36 = arith.constant 0 : index
    %c1_37 = arith.constant 1 : index
    %54 = vector.load %arg4[%c0_36, %c1_37] : memref<8x128xf32, #tpu.memory_space<vmem>>, vector<8x1xf32>
    %55 = vector.broadcast %54 : vector<8x1xf32> to vector<8x256xf32>
    %56 = arith.mulf %43, %55 : vector<8x256xf32>
    %57 = arith.subf %56, %48 : vector<8x256xf32>
    %58 = math.exp %57 : vector<8x256xf32>
    %59 = arith.addf %53, %58 : vector<8x256xf32>
    %c0_38 = arith.constant 0 : index
    %c2 = arith.constant 2 : index
    %60 = vector.load %arg4[%c0_38, %c2] : memref<8x128xf32, #tpu.memory_space<vmem>>, vector<8x1xf32>
    %61 = vector.broadcast %60 : vector<8x1xf32> to vector<8x256xf32>
    %62 = arith.mulf %43, %61 : vector<8x256xf32>
    %63 = arith.subf %62, %48 : vector<8x256xf32>
    %64 = math.exp %63 : vector<8x256xf32>
    %65 = arith.addf %59, %64 : vector<8x256xf32>
    %c0_39 = arith.constant 0 : index
    %c3 = arith.constant 3 : index
    %66 = vector.load %arg4[%c0_39, %c3] : memref<8x128xf32, #tpu.memory_space<vmem>>, vector<8x1xf32>
    %67 = vector.broadcast %66 : vector<8x1xf32> to vector<8x256xf32>
    %68 = arith.mulf %43, %67 : vector<8x256xf32>
    %69 = arith.subf %68, %48 : vector<8x256xf32>
    %70 = math.exp %69 : vector<8x256xf32>
    %71 = arith.addf %65, %70 : vector<8x256xf32>
    %c0_40 = arith.constant 0 : index
    %c4 = arith.constant 4 : index
    %72 = vector.load %arg4[%c0_40, %c4] : memref<8x128xf32, #tpu.memory_space<vmem>>, vector<8x1xf32>
    %73 = vector.broadcast %72 : vector<8x1xf32> to vector<8x256xf32>
    %74 = arith.mulf %43, %73 : vector<8x256xf32>
    %75 = arith.subf %74, %48 : vector<8x256xf32>
    %76 = math.exp %75 : vector<8x256xf32>
    %77 = arith.addf %71, %76 : vector<8x256xf32>
    %c0_41 = arith.constant 0 : index
    %c5 = arith.constant 5 : index
    %78 = vector.load %arg4[%c0_41, %c5] : memref<8x128xf32, #tpu.memory_space<vmem>>, vector<8x1xf32>
    %79 = vector.broadcast %78 : vector<8x1xf32> to vector<8x256xf32>
    %80 = arith.mulf %43, %79 : vector<8x256xf32>
    %81 = arith.subf %80, %48 : vector<8x256xf32>
    %82 = math.exp %81 : vector<8x256xf32>
    %83 = arith.addf %77, %82 : vector<8x256xf32>
    %c0_42 = arith.constant 0 : index
    %c6 = arith.constant 6 : index
    %84 = vector.load %arg4[%c0_42, %c6] : memref<8x128xf32, #tpu.memory_space<vmem>>, vector<8x1xf32>
    %85 = vector.broadcast %84 : vector<8x1xf32> to vector<8x256xf32>
    %86 = arith.mulf %43, %85 : vector<8x256xf32>
    %87 = arith.subf %86, %48 : vector<8x256xf32>
    %88 = math.exp %87 : vector<8x256xf32>
    %89 = arith.addf %83, %88 : vector<8x256xf32>
    %c0_43 = arith.constant 0 : index
    %c7 = arith.constant 7 : index
    %90 = vector.load %arg4[%c0_43, %c7] : memref<8x128xf32, #tpu.memory_space<vmem>>, vector<8x1xf32>
    %91 = vector.broadcast %90 : vector<8x1xf32> to vector<8x256xf32>
    %92 = arith.mulf %43, %91 : vector<8x256xf32>
    %93 = arith.subf %92, %48 : vector<8x256xf32>
    %94 = math.exp %93 : vector<8x256xf32>
    %95 = arith.addf %89, %94 : vector<8x256xf32>
    %c0_44 = arith.constant 0 : index
    %c8 = arith.constant 8 : index
    %96 = vector.load %arg4[%c0_44, %c8] : memref<8x128xf32, #tpu.memory_space<vmem>>, vector<8x1xf32>
    %97 = vector.broadcast %96 : vector<8x1xf32> to vector<8x256xf32>
    %98 = arith.mulf %43, %97 : vector<8x256xf32>
    %99 = arith.subf %98, %48 : vector<8x256xf32>
    %100 = math.exp %99 : vector<8x256xf32>
    %101 = arith.addf %95, %100 : vector<8x256xf32>
    %102 = tpu.reciprocal %101 {approx = true} : vector<8x256xf32> -> vector<8x256xf32>
    %103 = arith.mulf %101, %102 : vector<8x256xf32>
    %cst = arith.constant 2.000000e+00 : f32
    %104 = vector.broadcast %cst : f32 to vector<8x256xf32>
    %105 = arith.subf %104, %103 : vector<8x256xf32>
    %106 = arith.mulf %102, %105 : vector<8x256xf32>
    %c0_45 = arith.constant 0 : index
    %c11 = arith.constant 11 : index
    %107 = vector.load %arg4[%c0_45, %c11] : memref<8x128xf32, #tpu.memory_space<vmem>>, vector<8x1xf32>
    %108 = vector.broadcast %107 : vector<8x1xf32> to vector<8x256xf32>
    %109 = arith.mulf %9, %108 : vector<8x256xf32>
    %c0_46 = arith.constant 0 : index
    %c12 = arith.constant 12 : index
    %110 = vector.load %arg4[%c0_46, %c12] : memref<8x128xf32, #tpu.memory_space<vmem>>, vector<8x1xf32>
    %111 = vector.broadcast %110 : vector<8x1xf32> to vector<8x256xf32>
    %112 = arith.mulf %11, %111 : vector<8x256xf32>
    %113 = arith.addf %109, %112 : vector<8x256xf32>
    %c0_47 = arith.constant 0 : index
    %c13 = arith.constant 13 : index
    %114 = vector.load %arg4[%c0_47, %c13] : memref<8x128xf32, #tpu.memory_space<vmem>>, vector<8x1xf32>
    %115 = vector.broadcast %114 : vector<8x1xf32> to vector<8x256xf32>
    %116 = arith.mulf %15, %115 : vector<8x256xf32>
    %117 = arith.addf %113, %116 : vector<8x256xf32>
    %c0_48 = arith.constant 0 : index
    %c14 = arith.constant 14 : index
    %118 = vector.load %arg4[%c0_48, %c14] : memref<8x128xf32, #tpu.memory_space<vmem>>, vector<8x1xf32>
    %119 = vector.broadcast %118 : vector<8x1xf32> to vector<8x256xf32>
    %120 = arith.mulf %19, %119 : vector<8x256xf32>
    %121 = arith.addf %117, %120 : vector<8x256xf32>
    %c0_49 = arith.constant 0 : index
    %c15 = arith.constant 15 : index
    %122 = vector.load %arg4[%c0_49, %c15] : memref<8x128xf32, #tpu.memory_space<vmem>>, vector<8x1xf32>
    %123 = vector.broadcast %122 : vector<8x1xf32> to vector<8x256xf32>
    %124 = arith.mulf %21, %123 : vector<8x256xf32>
    %125 = arith.addf %121, %124 : vector<8x256xf32>
    %c0_50 = arith.constant 0 : index
    %c16 = arith.constant 16 : index
    %126 = vector.load %arg4[%c0_50, %c16] : memref<8x128xf32, #tpu.memory_space<vmem>>, vector<8x1xf32>
    %127 = vector.broadcast %126 : vector<8x1xf32> to vector<8x256xf32>
    %128 = arith.mulf %25, %127 : vector<8x256xf32>
    %129 = arith.addf %125, %128 : vector<8x256xf32>
    %c0_51 = arith.constant 0 : index
    %c17 = arith.constant 17 : index
    %130 = vector.load %arg4[%c0_51, %c17] : memref<8x128xf32, #tpu.memory_space<vmem>>, vector<8x1xf32>
    %131 = vector.broadcast %130 : vector<8x1xf32> to vector<8x256xf32>
    %132 = arith.mulf %29, %131 : vector<8x256xf32>
    %133 = arith.addf %129, %132 : vector<8x256xf32>
    %c0_52 = arith.constant 0 : index
    %c18 = arith.constant 18 : index
    %134 = vector.load %arg4[%c0_52, %c18] : memref<8x128xf32, #tpu.memory_space<vmem>>, vector<8x1xf32>
    %135 = vector.broadcast %134 : vector<8x1xf32> to vector<8x256xf32>
    %136 = arith.mulf %31, %135 : vector<8x256xf32>
    %137 = arith.addf %133, %136 : vector<8x256xf32>
    %c0_53 = arith.constant 0 : index
    %c19 = arith.constant 19 : index
    %138 = vector.load %arg4[%c0_53, %c19] : memref<8x128xf32, #tpu.memory_space<vmem>>, vector<8x1xf32>
    %139 = vector.broadcast %138 : vector<8x1xf32> to vector<8x256xf32>
    %140 = arith.mulf %35, %139 : vector<8x256xf32>
    %141 = arith.addf %137, %140 : vector<8x256xf32>
    %c0_54 = arith.constant 0 : index
    %c92 = arith.constant 92 : index
    %142 = vector.load %arg4[%c0_54, %c92] : memref<8x128xf32, #tpu.memory_space<vmem>>, vector<8x1xf32>
    %143 = vector.broadcast %142 : vector<8x1xf32> to vector<8x256xf32>
    %144 = arith.addf %141, %143 : vector<8x256xf32>
    %cst_55 = arith.constant 0.000000e+00 : f32
    %145 = vector.broadcast %cst_55 : f32 to vector<8x256xf32>
    %146 = arith.maximumf %144, %145 : vector<8x256xf32>
    %147 = arith.mulf %53, %106 : vector<8x256xf32>
    %148 = arith.mulf %146, %147 : vector<8x256xf32>
    %c0_56 = arith.constant 0 : index
    %c0_57 = arith.constant 0 : index
    %149 = vector.load %arg7[%c0_56, %c0_57] : memref<72x256xf32, #tpu.memory_space<vmem>>, vector<8x256xf32>
    tpu.vector_store %arg7[%c0_56, %c0_57], %148 {strides = array<i32>} : memref<72x256xf32, #tpu.memory_space<vmem>>, vector<8x256xf32>,
    %c0_58 = arith.constant 0 : index
    %c20 = arith.constant 20 : index
    %150 = vector.load %arg4[%c0_58, %c20] : memref<8x128xf32, #tpu.memory_space<vmem>>, vector<8x1xf32>
    %151 = vector.broadcast %150 : vector<8x1xf32> to vector<8x256xf32>
    %152 = arith.mulf %9, %151 : vector<8x256xf32>
    %c0_59 = arith.constant 0 : index
    %c21 = arith.constant 21 : index
    %153 = vector.load %arg4[%c0_59, %c21] : memref<8x128xf32, #tpu.memory_space<vmem>>, vector<8x1xf32>
    %154 = vector.broadcast %153 : vector<8x1xf32> to vector<8x256xf32>
    %155 = arith.mulf %11, %154 : vector<8x256xf32>
    %156 = arith.addf %152, %155 : vector<8x256xf32>
    %c0_60 = arith.constant 0 : index
    %c22 = arith.constant 22 : index
    %157 = vector.load %arg4[%c0_60, %c22] : memref<8x128xf32, #tpu.memory_space<vmem>>, vector<8x1xf32>
    %158 = vector.broadcast %157 : vector<8x1xf32> to vector<8x256xf32>
    %159 = arith.mulf %15, %158 : vector<8x256xf32>
    %160 = arith.addf %156, %159 : vector<8x256xf32>
    %c0_61 = arith.constant 0 : index
    %c23 = arith.constant 23 : index
    %161 = vector.load %arg4[%c0_61, %c23] : memref<8x128xf32, #tpu.memory_space<vmem>>, vector<8x1xf32>
    %162 = vector.broadcast %161 : vector<8x1xf32> to vector<8x256xf32>
    %163 = arith.mulf %19, %162 : vector<8x256xf32>
    %164 = arith.addf %160, %163 : vector<8x256xf32>
    %c0_62 = arith.constant 0 : index
    %c24 = arith.constant 24 : index
    %165 = vector.load %arg4[%c0_62, %c24] : memref<8x128xf32, #tpu.memory_space<vmem>>, vector<8x1xf32>
    %166 = vector.broadcast %165 : vector<8x1xf32> to vector<8x256xf32>
    %167 = arith.mulf %21, %166 : vector<8x256xf32>
    %168 = arith.addf %164, %167 : vector<8x256xf32>
    %c0_63 = arith.constant 0 : index
    %c25 = arith.constant 25 : index
    %169 = vector.load %arg4[%c0_63, %c25] : memref<8x128xf32, #tpu.memory_space<vmem>>, vector<8x1xf32>
    %170 = vector.broadcast %169 : vector<8x1xf32> to vector<8x256xf32>
    %171 = arith.mulf %25, %170 : vector<8x256xf32>
    %172 = arith.addf %168, %171 : vector<8x256xf32>
    %c0_64 = arith.constant 0 : index
    %c26 = arith.constant 26 : index
    %173 = vector.load %arg4[%c0_64, %c26] : memref<8x128xf32, #tpu.memory_space<vmem>>, vector<8x1xf32>
    %174 = vector.broadcast %173 : vector<8x1xf32> to vector<8x256xf32>
    %175 = arith.mulf %29, %174 : vector<8x256xf32>
    %176 = arith.addf %172, %175 : vector<8x256xf32>
    %c0_65 = arith.constant 0 : index
    %c27 = arith.constant 27 : index
    %177 = vector.load %arg4[%c0_65, %c27] : memref<8x128xf32, #tpu.memory_space<vmem>>, vector<8x1xf32>
    %178 = vector.broadcast %177 : vector<8x1xf32> to vector<8x256xf32>
    %179 = arith.mulf %31, %178 : vector<8x256xf32>
    %180 = arith.addf %176, %179 : vector<8x256xf32>
    %c0_66 = arith.constant 0 : index
    %c28 = arith.constant 28 : index
    %181 = vector.load %arg4[%c0_66, %c28] : memref<8x128xf32, #tpu.memory_space<vmem>>, vector<8x1xf32>
    %182 = vector.broadcast %181 : vector<8x1xf32> to vector<8x256xf32>
    %183 = arith.mulf %35, %182 : vector<8x256xf32>
    %184 = arith.addf %180, %183 : vector<8x256xf32>
    %c0_67 = arith.constant 0 : index
    %c93 = arith.constant 93 : index
    %185 = vector.load %arg4[%c0_67, %c93] : memref<8x128xf32, #tpu.memory_space<vmem>>, vector<8x1xf32>
    %186 = vector.broadcast %185 : vector<8x1xf32> to vector<8x256xf32>
    %187 = arith.addf %184, %186 : vector<8x256xf32>
    %cst_68 = arith.constant 0.000000e+00 : f32
    %188 = vector.broadcast %cst_68 : f32 to vector<8x256xf32>
    %189 = arith.maximumf %187, %188 : vector<8x256xf32>
    %190 = arith.mulf %58, %106 : vector<8x256xf32>
    %191 = arith.mulf %189, %190 : vector<8x256xf32>
    %c8_69 = arith.constant 8 : index
    %c0_70 = arith.constant 0 : index
    %192 = vector.load %arg7[%c8_69, %c0_70] : memref<72x256xf32, #tpu.memory_space<vmem>>, vector<8x256xf32>
    tpu.vector_store %arg7[%c8_69, %c0_70], %191 {strides = array<i32>} : memref<72x256xf32, #tpu.memory_space<vmem>>, vector<8x256xf32>,
    %c0_71 = arith.constant 0 : index
    %c29 = arith.constant 29 : index
    %193 = vector.load %arg4[%c0_71, %c29] : memref<8x128xf32, #tpu.memory_space<vmem>>, vector<8x1xf32>
    %194 = vector.broadcast %193 : vector<8x1xf32> to vector<8x256xf32>
    %195 = arith.mulf %9, %194 : vector<8x256xf32>
    %c0_72 = arith.constant 0 : index
    %c30 = arith.constant 30 : index
    %196 = vector.load %arg4[%c0_72, %c30] : memref<8x128xf32, #tpu.memory_space<vmem>>, vector<8x1xf32>
    %197 = vector.broadcast %196 : vector<8x1xf32> to vector<8x256xf32>
    %198 = arith.mulf %11, %197 : vector<8x256xf32>
    %199 = arith.addf %195, %198 : vector<8x256xf32>
    %c0_73 = arith.constant 0 : index
    %c31 = arith.constant 31 : index
    %200 = vector.load %arg4[%c0_73, %c31] : memref<8x128xf32, #tpu.memory_space<vmem>>, vector<8x1xf32>
    %201 = vector.broadcast %200 : vector<8x1xf32> to vector<8x256xf32>
    %202 = arith.mulf %15, %201 : vector<8x256xf32>
    %203 = arith.addf %199, %202 : vector<8x256xf32>
    %c0_74 = arith.constant 0 : index
    %c32 = arith.constant 32 : index
    %204 = vector.load %arg4[%c0_74, %c32] : memref<8x128xf32, #tpu.memory_space<vmem>>, vector<8x1xf32>
    %205 = vector.broadcast %204 : vector<8x1xf32> to vector<8x256xf32>
    %206 = arith.mulf %19, %205 : vector<8x256xf32>
    %207 = arith.addf %203, %206 : vector<8x256xf32>
    %c0_75 = arith.constant 0 : index
    %c33 = arith.constant 33 : index
    %208 = vector.load %arg4[%c0_75, %c33] : memref<8x128xf32, #tpu.memory_space<vmem>>, vector<8x1xf32>
    %209 = vector.broadcast %208 : vector<8x1xf32> to vector<8x256xf32>
    %210 = arith.mulf %21, %209 : vector<8x256xf32>
    %211 = arith.addf %207, %210 : vector<8x256xf32>
    %c0_76 = arith.constant 0 : index
    %c34 = arith.constant 34 : index
    %212 = vector.load %arg4[%c0_76, %c34] : memref<8x128xf32, #tpu.memory_space<vmem>>, vector<8x1xf32>
    %213 = vector.broadcast %212 : vector<8x1xf32> to vector<8x256xf32>
    %214 = arith.mulf %25, %213 : vector<8x256xf32>
    %215 = arith.addf %211, %214 : vector<8x256xf32>
    %c0_77 = arith.constant 0 : index
    %c35 = arith.constant 35 : index
    %216 = vector.load %arg4[%c0_77, %c35] : memref<8x128xf32, #tpu.memory_space<vmem>>, vector<8x1xf32>
    %217 = vector.broadcast %216 : vector<8x1xf32> to vector<8x256xf32>
    %218 = arith.mulf %29, %217 : vector<8x256xf32>
    %219 = arith.addf %215, %218 : vector<8x256xf32>
    %c0_78 = arith.constant 0 : index
    %c36 = arith.constant 36 : index
    %220 = vector.load %arg4[%c0_78, %c36] : memref<8x128xf32, #tpu.memory_space<vmem>>, vector<8x1xf32>
    %221 = vector.broadcast %220 : vector<8x1xf32> to vector<8x256xf32>
    %222 = arith.mulf %31, %221 : vector<8x256xf32>
    %223 = arith.addf %219, %222 : vector<8x256xf32>
    %c0_79 = arith.constant 0 : index
    %c37 = arith.constant 37 : index
    %224 = vector.load %arg4[%c0_79, %c37] : memref<8x128xf32, #tpu.memory_space<vmem>>, vector<8x1xf32>
    %225 = vector.broadcast %224 : vector<8x1xf32> to vector<8x256xf32>
    %226 = arith.mulf %35, %225 : vector<8x256xf32>
    %227 = arith.addf %223, %226 : vector<8x256xf32>
    %c0_80 = arith.constant 0 : index
    %c94 = arith.constant 94 : index
    %228 = vector.load %arg4[%c0_80, %c94] : memref<8x128xf32, #tpu.memory_space<vmem>>, vector<8x1xf32>
    %229 = vector.broadcast %228 : vector<8x1xf32> to vector<8x256xf32>
    %230 = arith.addf %227, %229 : vector<8x256xf32>
    %cst_81 = arith.constant 0.000000e+00 : f32
    %231 = vector.broadcast %cst_81 : f32 to vector<8x256xf32>
    %232 = arith.maximumf %230, %231 : vector<8x256xf32>
    %233 = arith.mulf %64, %106 : vector<8x256xf32>
    %234 = arith.mulf %232, %233 : vector<8x256xf32>
    %c16_82 = arith.constant 16 : index
    %c0_83 = arith.constant 0 : index
    %235 = vector.load %arg7[%c16_82, %c0_83] : memref<72x256xf32, #tpu.memory_space<vmem>>, vector<8x256xf32>
    tpu.vector_store %arg7[%c16_82, %c0_83], %234 {strides = array<i32>} : memref<72x256xf32, #tpu.memory_space<vmem>>, vector<8x256xf32>,
    %c0_84 = arith.constant 0 : index
    %c38 = arith.constant 38 : index
    %236 = vector.load %arg4[%c0_84, %c38] : memref<8x128xf32, #tpu.memory_space<vmem>>, vector<8x1xf32>
    %237 = vector.broadcast %236 : vector<8x1xf32> to vector<8x256xf32>
    %238 = arith.mulf %9, %237 : vector<8x256xf32>
    %c0_85 = arith.constant 0 : index
    %c39 = arith.constant 39 : index
    %239 = vector.load %arg4[%c0_85, %c39] : memref<8x128xf32, #tpu.memory_space<vmem>>, vector<8x1xf32>
    %240 = vector.broadcast %239 : vector<8x1xf32> to vector<8x256xf32>
    %241 = arith.mulf %11, %240 : vector<8x256xf32>
    %242 = arith.addf %238, %241 : vector<8x256xf32>
    %c0_86 = arith.constant 0 : index
    %c40 = arith.constant 40 : index
    %243 = vector.load %arg4[%c0_86, %c40] : memref<8x128xf32, #tpu.memory_space<vmem>>, vector<8x1xf32>
    %244 = vector.broadcast %243 : vector<8x1xf32> to vector<8x256xf32>
    %245 = arith.mulf %15, %244 : vector<8x256xf32>
    %246 = arith.addf %242, %245 : vector<8x256xf32>
    %c0_87 = arith.constant 0 : index
    %c41 = arith.constant 41 : index
    %247 = vector.load %arg4[%c0_87, %c41] : memref<8x128xf32, #tpu.memory_space<vmem>>, vector<8x1xf32>
    %248 = vector.broadcast %247 : vector<8x1xf32> to vector<8x256xf32>
    %249 = arith.mulf %19, %248 : vector<8x256xf32>
    %250 = arith.addf %246, %249 : vector<8x256xf32>
    %c0_88 = arith.constant 0 : index
    %c42 = arith.constant 42 : index
    %251 = vector.load %arg4[%c0_88, %c42] : memref<8x128xf32, #tpu.memory_space<vmem>>, vector<8x1xf32>
    %252 = vector.broadcast %251 : vector<8x1xf32> to vector<8x256xf32>
    %253 = arith.mulf %21, %252 : vector<8x256xf32>
    %254 = arith.addf %250, %253 : vector<8x256xf32>
    %c0_89 = arith.constant 0 : index
    %c43 = arith.constant 43 : index
    %255 = vector.load %arg4[%c0_89, %c43] : memref<8x128xf32, #tpu.memory_space<vmem>>, vector<8x1xf32>
    %256 = vector.broadcast %255 : vector<8x1xf32> to vector<8x256xf32>
    %257 = arith.mulf %25, %256 : vector<8x256xf32>
    %258 = arith.addf %254, %257 : vector<8x256xf32>
    %c0_90 = arith.constant 0 : index
    %c44 = arith.constant 44 : index
    %259 = vector.load %arg4[%c0_90, %c44] : memref<8x128xf32, #tpu.memory_space<vmem>>, vector<8x1xf32>
    %260 = vector.broadcast %259 : vector<8x1xf32> to vector<8x256xf32>
    %261 = arith.mulf %29, %260 : vector<8x256xf32>
    %262 = arith.addf %258, %261 : vector<8x256xf32>
    %c0_91 = arith.constant 0 : index
    %c45 = arith.constant 45 : index
    %263 = vector.load %arg4[%c0_91, %c45] : memref<8x128xf32, #tpu.memory_space<vmem>>, vector<8x1xf32>
    %264 = vector.broadcast %263 : vector<8x1xf32> to vector<8x256xf32>
    %265 = arith.mulf %31, %264 : vector<8x256xf32>
    %266 = arith.addf %262, %265 : vector<8x256xf32>
    %c0_92 = arith.constant 0 : index
    %c46 = arith.constant 46 : index
    %267 = vector.load %arg4[%c0_92, %c46] : memref<8x128xf32, #tpu.memory_space<vmem>>, vector<8x1xf32>
    %268 = vector.broadcast %267 : vector<8x1xf32> to vector<8x256xf32>
    %269 = arith.mulf %35, %268 : vector<8x256xf32>
    %270 = arith.addf %266, %269 : vector<8x256xf32>
    %c0_93 = arith.constant 0 : index
    %c95 = arith.constant 95 : index
    %271 = vector.load %arg4[%c0_93, %c95] : memref<8x128xf32, #tpu.memory_space<vmem>>, vector<8x1xf32>
    %272 = vector.broadcast %271 : vector<8x1xf32> to vector<8x256xf32>
    %273 = arith.addf %270, %272 : vector<8x256xf32>
    %cst_94 = arith.constant 0.000000e+00 : f32
    %274 = vector.broadcast %cst_94 : f32 to vector<8x256xf32>
    %275 = arith.maximumf %273, %274 : vector<8x256xf32>
    %276 = arith.mulf %70, %106 : vector<8x256xf32>
    %277 = arith.mulf %275, %276 : vector<8x256xf32>
    %c24_95 = arith.constant 24 : index
    %c0_96 = arith.constant 0 : index
    %278 = vector.load %arg7[%c24_95, %c0_96] : memref<72x256xf32, #tpu.memory_space<vmem>>, vector<8x256xf32>
    tpu.vector_store %arg7[%c24_95, %c0_96], %277 {strides = array<i32>} : memref<72x256xf32, #tpu.memory_space<vmem>>, vector<8x256xf32>,
    %c0_97 = arith.constant 0 : index
    %c47 = arith.constant 47 : index
    %279 = vector.load %arg4[%c0_97, %c47] : memref<8x128xf32, #tpu.memory_space<vmem>>, vector<8x1xf32>
    %280 = vector.broadcast %279 : vector<8x1xf32> to vector<8x256xf32>
    %281 = arith.mulf %9, %280 : vector<8x256xf32>
    %c0_98 = arith.constant 0 : index
    %c48 = arith.constant 48 : index
    %282 = vector.load %arg4[%c0_98, %c48] : memref<8x128xf32, #tpu.memory_space<vmem>>, vector<8x1xf32>
    %283 = vector.broadcast %282 : vector<8x1xf32> to vector<8x256xf32>
    %284 = arith.mulf %11, %283 : vector<8x256xf32>
    %285 = arith.addf %281, %284 : vector<8x256xf32>
    %c0_99 = arith.constant 0 : index
    %c49 = arith.constant 49 : index
    %286 = vector.load %arg4[%c0_99, %c49] : memref<8x128xf32, #tpu.memory_space<vmem>>, vector<8x1xf32>
    %287 = vector.broadcast %286 : vector<8x1xf32> to vector<8x256xf32>
    %288 = arith.mulf %15, %287 : vector<8x256xf32>
    %289 = arith.addf %285, %288 : vector<8x256xf32>
    %c0_100 = arith.constant 0 : index
    %c50 = arith.constant 50 : index
    %290 = vector.load %arg4[%c0_100, %c50] : memref<8x128xf32, #tpu.memory_space<vmem>>, vector<8x1xf32>
    %291 = vector.broadcast %290 : vector<8x1xf32> to vector<8x256xf32>
    %292 = arith.mulf %19, %291 : vector<8x256xf32>
    %293 = arith.addf %289, %292 : vector<8x256xf32>
    %c0_101 = arith.constant 0 : index
    %c51 = arith.constant 51 : index
    %294 = vector.load %arg4[%c0_101, %c51] : memref<8x128xf32, #tpu.memory_space<vmem>>, vector<8x1xf32>
    %295 = vector.broadcast %294 : vector<8x1xf32> to vector<8x256xf32>
    %296 = arith.mulf %21, %295 : vector<8x256xf32>
    %297 = arith.addf %293, %296 : vector<8x256xf32>
    %c0_102 = arith.constant 0 : index
    %c52 = arith.constant 52 : index
    %298 = vector.load %arg4[%c0_102, %c52] : memref<8x128xf32, #tpu.memory_space<vmem>>, vector<8x1xf32>
    %299 = vector.broadcast %298 : vector<8x1xf32> to vector<8x256xf32>
    %300 = arith.mulf %25, %299 : vector<8x256xf32>
    %301 = arith.addf %297, %300 : vector<8x256xf32>
    %c0_103 = arith.constant 0 : index
    %c53 = arith.constant 53 : index
    %302 = vector.load %arg4[%c0_103, %c53] : memref<8x128xf32, #tpu.memory_space<vmem>>, vector<8x1xf32>
    %303 = vector.broadcast %302 : vector<8x1xf32> to vector<8x256xf32>
    %304 = arith.mulf %29, %303 : vector<8x256xf32>
    %305 = arith.addf %301, %304 : vector<8x256xf32>
    %c0_104 = arith.constant 0 : index
    %c54 = arith.constant 54 : index
    %306 = vector.load %arg4[%c0_104, %c54] : memref<8x128xf32, #tpu.memory_space<vmem>>, vector<8x1xf32>
    %307 = vector.broadcast %306 : vector<8x1xf32> to vector<8x256xf32>
    %308 = arith.mulf %31, %307 : vector<8x256xf32>
    %309 = arith.addf %305, %308 : vector<8x256xf32>
    %c0_105 = arith.constant 0 : index
    %c55 = arith.constant 55 : index
    %310 = vector.load %arg4[%c0_105, %c55] : memref<8x128xf32, #tpu.memory_space<vmem>>, vector<8x1xf32>
    %311 = vector.broadcast %310 : vector<8x1xf32> to vector<8x256xf32>
    %312 = arith.mulf %35, %311 : vector<8x256xf32>
    %313 = arith.addf %309, %312 : vector<8x256xf32>
    %c0_106 = arith.constant 0 : index
    %c96 = arith.constant 96 : index
    %314 = vector.load %arg4[%c0_106, %c96] : memref<8x128xf32, #tpu.memory_space<vmem>>, vector<8x1xf32>
    %315 = vector.broadcast %314 : vector<8x1xf32> to vector<8x256xf32>
    %316 = arith.addf %313, %315 : vector<8x256xf32>
    %cst_107 = arith.constant 0.000000e+00 : f32
    %317 = vector.broadcast %cst_107 : f32 to vector<8x256xf32>
    %318 = arith.maximumf %316, %317 : vector<8x256xf32>
    %319 = arith.mulf %76, %106 : vector<8x256xf32>
    %320 = arith.mulf %318, %319 : vector<8x256xf32>
    %c32_108 = arith.constant 32 : index
    %c0_109 = arith.constant 0 : index
    %321 = vector.load %arg7[%c32_108, %c0_109] : memref<72x256xf32, #tpu.memory_space<vmem>>, vector<8x256xf32>
    tpu.vector_store %arg7[%c32_108, %c0_109], %320 {strides = array<i32>} : memref<72x256xf32, #tpu.memory_space<vmem>>, vector<8x256xf32>,
    %c0_110 = arith.constant 0 : index
    %c56 = arith.constant 56 : index
    %322 = vector.load %arg4[%c0_110, %c56] : memref<8x128xf32, #tpu.memory_space<vmem>>, vector<8x1xf32>
    %323 = vector.broadcast %322 : vector<8x1xf32> to vector<8x256xf32>
    %324 = arith.mulf %9, %323 : vector<8x256xf32>
    %c0_111 = arith.constant 0 : index
    %c57 = arith.constant 57 : index
    %325 = vector.load %arg4[%c0_111, %c57] : memref<8x128xf32, #tpu.memory_space<vmem>>, vector<8x1xf32>
    %326 = vector.broadcast %325 : vector<8x1xf32> to vector<8x256xf32>
    %327 = arith.mulf %11, %326 : vector<8x256xf32>
    %328 = arith.addf %324, %327 : vector<8x256xf32>
    %c0_112 = arith.constant 0 : index
    %c58 = arith.constant 58 : index
    %329 = vector.load %arg4[%c0_112, %c58] : memref<8x128xf32, #tpu.memory_space<vmem>>, vector<8x1xf32>
    %330 = vector.broadcast %329 : vector<8x1xf32> to vector<8x256xf32>
    %331 = arith.mulf %15, %330 : vector<8x256xf32>
    %332 = arith.addf %328, %331 : vector<8x256xf32>
    %c0_113 = arith.constant 0 : index
    %c59 = arith.constant 59 : index
    %333 = vector.load %arg4[%c0_113, %c59] : memref<8x128xf32, #tpu.memory_space<vmem>>, vector<8x1xf32>
    %334 = vector.broadcast %333 : vector<8x1xf32> to vector<8x256xf32>
    %335 = arith.mulf %19, %334 : vector<8x256xf32>
    %336 = arith.addf %332, %335 : vector<8x256xf32>
    %c0_114 = arith.constant 0 : index
    %c60 = arith.constant 60 : index
    %337 = vector.load %arg4[%c0_114, %c60] : memref<8x128xf32, #tpu.memory_space<vmem>>, vector<8x1xf32>
    %338 = vector.broadcast %337 : vector<8x1xf32> to vector<8x256xf32>
    %339 = arith.mulf %21, %338 : vector<8x256xf32>
    %340 = arith.addf %336, %339 : vector<8x256xf32>
    %c0_115 = arith.constant 0 : index
    %c61 = arith.constant 61 : index
    %341 = vector.load %arg4[%c0_115, %c61] : memref<8x128xf32, #tpu.memory_space<vmem>>, vector<8x1xf32>
    %342 = vector.broadcast %341 : vector<8x1xf32> to vector<8x256xf32>
    %343 = arith.mulf %25, %342 : vector<8x256xf32>
    %344 = arith.addf %340, %343 : vector<8x256xf32>
    %c0_116 = arith.constant 0 : index
    %c62 = arith.constant 62 : index
    %345 = vector.load %arg4[%c0_116, %c62] : memref<8x128xf32, #tpu.memory_space<vmem>>, vector<8x1xf32>
    %346 = vector.broadcast %345 : vector<8x1xf32> to vector<8x256xf32>
    %347 = arith.mulf %29, %346 : vector<8x256xf32>
    %348 = arith.addf %344, %347 : vector<8x256xf32>
    %c0_117 = arith.constant 0 : index
    %c63 = arith.constant 63 : index
    %349 = vector.load %arg4[%c0_117, %c63] : memref<8x128xf32, #tpu.memory_space<vmem>>, vector<8x1xf32>
    %350 = vector.broadcast %349 : vector<8x1xf32> to vector<8x256xf32>
    %351 = arith.mulf %31, %350 : vector<8x256xf32>
    %352 = arith.addf %348, %351 : vector<8x256xf32>
    %c0_118 = arith.constant 0 : index
    %c64 = arith.constant 64 : index
    %353 = vector.load %arg4[%c0_118, %c64] : memref<8x128xf32, #tpu.memory_space<vmem>>, vector<8x1xf32>
    %354 = vector.broadcast %353 : vector<8x1xf32> to vector<8x256xf32>
    %355 = arith.mulf %35, %354 : vector<8x256xf32>
    %356 = arith.addf %352, %355 : vector<8x256xf32>
    %c0_119 = arith.constant 0 : index
    %c97 = arith.constant 97 : index
    %357 = vector.load %arg4[%c0_119, %c97] : memref<8x128xf32, #tpu.memory_space<vmem>>, vector<8x1xf32>
    %358 = vector.broadcast %357 : vector<8x1xf32> to vector<8x256xf32>
    %359 = arith.addf %356, %358 : vector<8x256xf32>
    %cst_120 = arith.constant 0.000000e+00 : f32
    %360 = vector.broadcast %cst_120 : f32 to vector<8x256xf32>
    %361 = arith.maximumf %359, %360 : vector<8x256xf32>
    %362 = arith.mulf %82, %106 : vector<8x256xf32>
    %363 = arith.mulf %361, %362 : vector<8x256xf32>
    %c40_121 = arith.constant 40 : index
    %c0_122 = arith.constant 0 : index
    %364 = vector.load %arg7[%c40_121, %c0_122] : memref<72x256xf32, #tpu.memory_space<vmem>>, vector<8x256xf32>
    tpu.vector_store %arg7[%c40_121, %c0_122], %363 {strides = array<i32>} : memref<72x256xf32, #tpu.memory_space<vmem>>, vector<8x256xf32>,
    %c0_123 = arith.constant 0 : index
    %c65 = arith.constant 65 : index
    %365 = vector.load %arg4[%c0_123, %c65] : memref<8x128xf32, #tpu.memory_space<vmem>>, vector<8x1xf32>
    %366 = vector.broadcast %365 : vector<8x1xf32> to vector<8x256xf32>
    %367 = arith.mulf %9, %366 : vector<8x256xf32>
    %c0_124 = arith.constant 0 : index
    %c66 = arith.constant 66 : index
    %368 = vector.load %arg4[%c0_124, %c66] : memref<8x128xf32, #tpu.memory_space<vmem>>, vector<8x1xf32>
    %369 = vector.broadcast %368 : vector<8x1xf32> to vector<8x256xf32>
    %370 = arith.mulf %11, %369 : vector<8x256xf32>
    %371 = arith.addf %367, %370 : vector<8x256xf32>
    %c0_125 = arith.constant 0 : index
    %c67 = arith.constant 67 : index
    %372 = vector.load %arg4[%c0_125, %c67] : memref<8x128xf32, #tpu.memory_space<vmem>>, vector<8x1xf32>
    %373 = vector.broadcast %372 : vector<8x1xf32> to vector<8x256xf32>
    %374 = arith.mulf %15, %373 : vector<8x256xf32>
    %375 = arith.addf %371, %374 : vector<8x256xf32>
    %c0_126 = arith.constant 0 : index
    %c68 = arith.constant 68 : index
    %376 = vector.load %arg4[%c0_126, %c68] : memref<8x128xf32, #tpu.memory_space<vmem>>, vector<8x1xf32>
    %377 = vector.broadcast %376 : vector<8x1xf32> to vector<8x256xf32>
    %378 = arith.mulf %19, %377 : vector<8x256xf32>
    %379 = arith.addf %375, %378 : vector<8x256xf32>
    %c0_127 = arith.constant 0 : index
    %c69 = arith.constant 69 : index
    %380 = vector.load %arg4[%c0_127, %c69] : memref<8x128xf32, #tpu.memory_space<vmem>>, vector<8x1xf32>
    %381 = vector.broadcast %380 : vector<8x1xf32> to vector<8x256xf32>
    %382 = arith.mulf %21, %381 : vector<8x256xf32>
    %383 = arith.addf %379, %382 : vector<8x256xf32>
    %c0_128 = arith.constant 0 : index
    %c70 = arith.constant 70 : index
    %384 = vector.load %arg4[%c0_128, %c70] : memref<8x128xf32, #tpu.memory_space<vmem>>, vector<8x1xf32>
    %385 = vector.broadcast %384 : vector<8x1xf32> to vector<8x256xf32>
    %386 = arith.mulf %25, %385 : vector<8x256xf32>
    %387 = arith.addf %383, %386 : vector<8x256xf32>
    %c0_129 = arith.constant 0 : index
    %c71 = arith.constant 71 : index
    %388 = vector.load %arg4[%c0_129, %c71] : memref<8x128xf32, #tpu.memory_space<vmem>>, vector<8x1xf32>
    %389 = vector.broadcast %388 : vector<8x1xf32> to vector<8x256xf32>
    %390 = arith.mulf %29, %389 : vector<8x256xf32>
    %391 = arith.addf %387, %390 : vector<8x256xf32>
    %c0_130 = arith.constant 0 : index
    %c72_131 = arith.constant 72 : index
    %392 = vector.load %arg4[%c0_130, %c72_131] : memref<8x128xf32, #tpu.memory_space<vmem>>, vector<8x1xf32>
    %393 = vector.broadcast %392 : vector<8x1xf32> to vector<8x256xf32>
    %394 = arith.mulf %31, %393 : vector<8x256xf32>
    %395 = arith.addf %391, %394 : vector<8x256xf32>
    %c0_132 = arith.constant 0 : index
    %c73 = arith.constant 73 : index
    %396 = vector.load %arg4[%c0_132, %c73] : memref<8x128xf32, #tpu.memory_space<vmem>>, vector<8x1xf32>
    %397 = vector.broadcast %396 : vector<8x1xf32> to vector<8x256xf32>
    %398 = arith.mulf %35, %397 : vector<8x256xf32>
    %399 = arith.addf %395, %398 : vector<8x256xf32>
    %c0_133 = arith.constant 0 : index
    %c98 = arith.constant 98 : index
    %400 = vector.load %arg4[%c0_133, %c98] : memref<8x128xf32, #tpu.memory_space<vmem>>, vector<8x1xf32>
    %401 = vector.broadcast %400 : vector<8x1xf32> to vector<8x256xf32>
    %402 = arith.addf %399, %401 : vector<8x256xf32>
    %cst_134 = arith.constant 0.000000e+00 : f32
    %403 = vector.broadcast %cst_134 : f32 to vector<8x256xf32>
    %404 = arith.maximumf %402, %403 : vector<8x256xf32>
    %405 = arith.mulf %88, %106 : vector<8x256xf32>
    %406 = arith.mulf %404, %405 : vector<8x256xf32>
    %c48_135 = arith.constant 48 : index
    %c0_136 = arith.constant 0 : index
    %407 = vector.load %arg7[%c48_135, %c0_136] : memref<72x256xf32, #tpu.memory_space<vmem>>, vector<8x256xf32>
    tpu.vector_store %arg7[%c48_135, %c0_136], %406 {strides = array<i32>} : memref<72x256xf32, #tpu.memory_space<vmem>>, vector<8x256xf32>,
    %c0_137 = arith.constant 0 : index
    %c74 = arith.constant 74 : index
    %408 = vector.load %arg4[%c0_137, %c74] : memref<8x128xf32, #tpu.memory_space<vmem>>, vector<8x1xf32>
    %409 = vector.broadcast %408 : vector<8x1xf32> to vector<8x256xf32>
    %410 = arith.mulf %9, %409 : vector<8x256xf32>
    %c0_138 = arith.constant 0 : index
    %c75 = arith.constant 75 : index
    %411 = vector.load %arg4[%c0_138, %c75] : memref<8x128xf32, #tpu.memory_space<vmem>>, vector<8x1xf32>
    %412 = vector.broadcast %411 : vector<8x1xf32> to vector<8x256xf32>
    %413 = arith.mulf %11, %412 : vector<8x256xf32>
    %414 = arith.addf %410, %413 : vector<8x256xf32>
    %c0_139 = arith.constant 0 : index
    %c76 = arith.constant 76 : index
    %415 = vector.load %arg4[%c0_139, %c76] : memref<8x128xf32, #tpu.memory_space<vmem>>, vector<8x1xf32>
    %416 = vector.broadcast %415 : vector<8x1xf32> to vector<8x256xf32>
    %417 = arith.mulf %15, %416 : vector<8x256xf32>
    %418 = arith.addf %414, %417 : vector<8x256xf32>
    %c0_140 = arith.constant 0 : index
    %c77 = arith.constant 77 : index
    %419 = vector.load %arg4[%c0_140, %c77] : memref<8x128xf32, #tpu.memory_space<vmem>>, vector<8x1xf32>
    %420 = vector.broadcast %419 : vector<8x1xf32> to vector<8x256xf32>
    %421 = arith.mulf %19, %420 : vector<8x256xf32>
    %422 = arith.addf %418, %421 : vector<8x256xf32>
    %c0_141 = arith.constant 0 : index
    %c78 = arith.constant 78 : index
    %423 = vector.load %arg4[%c0_141, %c78] : memref<8x128xf32, #tpu.memory_space<vmem>>, vector<8x1xf32>
    %424 = vector.broadcast %423 : vector<8x1xf32> to vector<8x256xf32>
    %425 = arith.mulf %21, %424 : vector<8x256xf32>
    %426 = arith.addf %422, %425 : vector<8x256xf32>
    %c0_142 = arith.constant 0 : index
    %c79 = arith.constant 79 : index
    %427 = vector.load %arg4[%c0_142, %c79] : memref<8x128xf32, #tpu.memory_space<vmem>>, vector<8x1xf32>
    %428 = vector.broadcast %427 : vector<8x1xf32> to vector<8x256xf32>
    %429 = arith.mulf %25, %428 : vector<8x256xf32>
    %430 = arith.addf %426, %429 : vector<8x256xf32>
    %c0_143 = arith.constant 0 : index
    %c80 = arith.constant 80 : index
    %431 = vector.load %arg4[%c0_143, %c80] : memref<8x128xf32, #tpu.memory_space<vmem>>, vector<8x1xf32>
    %432 = vector.broadcast %431 : vector<8x1xf32> to vector<8x256xf32>
    %433 = arith.mulf %29, %432 : vector<8x256xf32>
    %434 = arith.addf %430, %433 : vector<8x256xf32>
    %c0_144 = arith.constant 0 : index
    %c81 = arith.constant 81 : index
    %435 = vector.load %arg4[%c0_144, %c81] : memref<8x128xf32, #tpu.memory_space<vmem>>, vector<8x1xf32>
    %436 = vector.broadcast %435 : vector<8x1xf32> to vector<8x256xf32>
    %437 = arith.mulf %31, %436 : vector<8x256xf32>
    %438 = arith.addf %434, %437 : vector<8x256xf32>
    %c0_145 = arith.constant 0 : index
    %c82 = arith.constant 82 : index
    %439 = vector.load %arg4[%c0_145, %c82] : memref<8x128xf32, #tpu.memory_space<vmem>>, vector<8x1xf32>
    %440 = vector.broadcast %439 : vector<8x1xf32> to vector<8x256xf32>
    %441 = arith.mulf %35, %440 : vector<8x256xf32>
    %442 = arith.addf %438, %441 : vector<8x256xf32>
    %c0_146 = arith.constant 0 : index
    %c99 = arith.constant 99 : index
    %443 = vector.load %arg4[%c0_146, %c99] : memref<8x128xf32, #tpu.memory_space<vmem>>, vector<8x1xf32>
    %444 = vector.broadcast %443 : vector<8x1xf32> to vector<8x256xf32>
    %445 = arith.addf %442, %444 : vector<8x256xf32>
    %cst_147 = arith.constant 0.000000e+00 : f32
    %446 = vector.broadcast %cst_147 : f32 to vector<8x256xf32>
    %447 = arith.maximumf %445, %446 : vector<8x256xf32>
    %448 = arith.mulf %94, %106 : vector<8x256xf32>
    %449 = arith.mulf %447, %448 : vector<8x256xf32>
    %c56_148 = arith.constant 56 : index
    %c0_149 = arith.constant 0 : index
    %450 = vector.load %arg7[%c56_148, %c0_149] : memref<72x256xf32, #tpu.memory_space<vmem>>, vector<8x256xf32>
    tpu.vector_store %arg7[%c56_148, %c0_149], %449 {strides = array<i32>} : memref<72x256xf32, #tpu.memory_space<vmem>>, vector<8x256xf32>,
    %c0_150 = arith.constant 0 : index
    %c83 = arith.constant 83 : index
    %451 = vector.load %arg4[%c0_150, %c83] : memref<8x128xf32, #tpu.memory_space<vmem>>, vector<8x1xf32>
    %452 = vector.broadcast %451 : vector<8x1xf32> to vector<8x256xf32>
    %453 = arith.mulf %9, %452 : vector<8x256xf32>
    %c0_151 = arith.constant 0 : index
    %c84 = arith.constant 84 : index
    %454 = vector.load %arg4[%c0_151, %c84] : memref<8x128xf32, #tpu.memory_space<vmem>>, vector<8x1xf32>
    %455 = vector.broadcast %454 : vector<8x1xf32> to vector<8x256xf32>
    %456 = arith.mulf %11, %455 : vector<8x256xf32>
    %457 = arith.addf %453, %456 : vector<8x256xf32>
    %c0_152 = arith.constant 0 : index
    %c85 = arith.constant 85 : index
    %458 = vector.load %arg4[%c0_152, %c85] : memref<8x128xf32, #tpu.memory_space<vmem>>, vector<8x1xf32>
    %459 = vector.broadcast %458 : vector<8x1xf32> to vector<8x256xf32>
    %460 = arith.mulf %15, %459 : vector<8x256xf32>
    %461 = arith.addf %457, %460 : vector<8x256xf32>
    %c0_153 = arith.constant 0 : index
    %c86 = arith.constant 86 : index
    %462 = vector.load %arg4[%c0_153, %c86] : memref<8x128xf32, #tpu.memory_space<vmem>>, vector<8x1xf32>
    %463 = vector.broadcast %462 : vector<8x1xf32> to vector<8x256xf32>
    %464 = arith.mulf %19, %463 : vector<8x256xf32>
    %465 = arith.addf %461, %464 : vector<8x256xf32>
    %c0_154 = arith.constant 0 : index
    %c87 = arith.constant 87 : index
    %466 = vector.load %arg4[%c0_154, %c87] : memref<8x128xf32, #tpu.memory_space<vmem>>, vector<8x1xf32>
    %467 = vector.broadcast %466 : vector<8x1xf32> to vector<8x256xf32>
    %468 = arith.mulf %21, %467 : vector<8x256xf32>
    %469 = arith.addf %465, %468 : vector<8x256xf32>
    %c0_155 = arith.constant 0 : index
    %c88 = arith.constant 88 : index
    %470 = vector.load %arg4[%c0_155, %c88] : memref<8x128xf32, #tpu.memory_space<vmem>>, vector<8x1xf32>
    %471 = vector.broadcast %470 : vector<8x1xf32> to vector<8x256xf32>
    %472 = arith.mulf %25, %471 : vector<8x256xf32>
    %473 = arith.addf %469, %472 : vector<8x256xf32>
    %c0_156 = arith.constant 0 : index
    %c89 = arith.constant 89 : index
    %474 = vector.load %arg4[%c0_156, %c89] : memref<8x128xf32, #tpu.memory_space<vmem>>, vector<8x1xf32>
    %475 = vector.broadcast %474 : vector<8x1xf32> to vector<8x256xf32>
    %476 = arith.mulf %29, %475 : vector<8x256xf32>
    %477 = arith.addf %473, %476 : vector<8x256xf32>
    %c0_157 = arith.constant 0 : index
    %c90 = arith.constant 90 : index
    %478 = vector.load %arg4[%c0_157, %c90] : memref<8x128xf32, #tpu.memory_space<vmem>>, vector<8x1xf32>
    %479 = vector.broadcast %478 : vector<8x1xf32> to vector<8x256xf32>
    %480 = arith.mulf %31, %479 : vector<8x256xf32>
    %481 = arith.addf %477, %480 : vector<8x256xf32>
    %c0_158 = arith.constant 0 : index
    %c91 = arith.constant 91 : index
    %482 = vector.load %arg4[%c0_158, %c91] : memref<8x128xf32, #tpu.memory_space<vmem>>, vector<8x1xf32>
    %483 = vector.broadcast %482 : vector<8x1xf32> to vector<8x256xf32>
    %484 = arith.mulf %35, %483 : vector<8x256xf32>
    %485 = arith.addf %481, %484 : vector<8x256xf32>
    %c0_159 = arith.constant 0 : index
    %c100 = arith.constant 100 : index
    %486 = vector.load %arg4[%c0_159, %c100] : memref<8x128xf32, #tpu.memory_space<vmem>>, vector<8x1xf32>
    %487 = vector.broadcast %486 : vector<8x1xf32> to vector<8x256xf32>
    %488 = arith.addf %485, %487 : vector<8x256xf32>
    %cst_160 = arith.constant 0.000000e+00 : f32
    %489 = vector.broadcast %cst_160 : f32 to vector<8x256xf32>
    %490 = arith.maximumf %488, %489 : vector<8x256xf32>
    %491 = arith.mulf %100, %106 : vector<8x256xf32>
    %492 = arith.mulf %490, %491 : vector<8x256xf32>
    %c64_161 = arith.constant 64 : index
    %c0_162 = arith.constant 0 : index
    %493 = vector.load %arg7[%c64_161, %c0_162] : memref<72x256xf32, #tpu.memory_space<vmem>>, vector<8x256xf32>
    tpu.vector_store %arg7[%c64_161, %c0_162], %492 {strides = array<i32>} : memref<72x256xf32, #tpu.memory_space<vmem>>, vector<8x256xf32>,
    %c0_163 = arith.constant 0 : index
    %c0_164 = arith.constant 0 : index
    %494 = vector.load %arg7[%c0_163, %c0_164] : memref<72x256xf32, #tpu.memory_space<vmem>>, vector<72x256xf32>
    %cst_165 = arith.constant dense<0.000000e+00> : vector<8x256xf32>
    %495 = tpu.matmul %0, %494, %cst_165 {dimension_numbers = #tpu.dot_dimension_numbers<[1], [0], [0], [1], [0, 0, 1, 1], [], []>} : vector<8x72xf32>, vector<72x256xf32>, vector<8x256xf32> -> vector<8x256xf32>
    %496 = vector.broadcast %1 : vector<8x1xf32> to vector<8x256xf32>
    %497 = arith.addf %495, %496 : vector<8x256xf32>
    %cst_166 = arith.constant 0.000000e+00 : f32
    %498 = vector.broadcast %cst_166 : f32 to vector<8x256xf32>
    %499 = arith.maximumf %497, %498 : vector<8x256xf32>
    %c0_167 = arith.constant 0 : index
    %c0_168 = arith.constant 0 : index
    %c0_169 = arith.constant 0 : index
    %500 = vector.load %arg6[%c0_167, %c0_168, %c0_169] : memref<1x8x256xf32, #tpu.memory_space<vmem>>, vector<1x8x256xf32>
    %501 = vector.shape_cast %500 : vector<1x8x256xf32> to vector<8x256xf32>
    %502 = vector.shape_cast %499 : vector<8x256xf32> to vector<1x8x256xf32>
    tpu.vector_store %arg6[%c0_167, %c0_168, %c0_169], %502 {strides = array<i32>} : memref<1x8x256xf32, #tpu.memory_space<vmem>>, vector<1x8x256xf32>,
    return
  }
  func.func @transform_0(%arg0: i32, %arg1: i32) -> (i32, i32, i32, i32) {
    %c0_i32 = arith.constant 0 : i32
    %c0_i32_0 = arith.constant 0 : i32
    %c0_i32_1 = arith.constant 0 : i32
    return %arg0, %arg1, %c0_i32, %c0_i32_0 : i32, i32, i32, i32
  }
  func.func @transform_1(%arg0: i32, %arg1: i32) -> (i32, i32) {
    %c0_i32 = arith.constant 0 : i32
    %c0_i32_0 = arith.constant 0 : i32
    return %c0_i32, %arg1 : i32, i32
  }
  func.func @transform_2(%arg0: i32, %arg1: i32) -> (i32, i32) {
    %c0_i32 = arith.constant 0 : i32
    %c0_i32_0 = arith.constant 0 : i32
    %c0_i32_1 = arith.constant 0 : i32
    return %c0_i32, %c0_i32_0 : i32, i32
  }
  func.func @transform_3(%arg0: i32, %arg1: i32) -> (i32, i32) {
    %c0_i32 = arith.constant 0 : i32
    %c0_i32_0 = arith.constant 0 : i32
    %c0_i32_1 = arith.constant 0 : i32
    return %c0_i32, %c0_i32_0 : i32, i32
  }
  func.func @transform_4(%arg0: i32, %arg1: i32) -> (i32, i32, i32) {
    %c0_i32 = arith.constant 0 : i32
    %c0_i32_0 = arith.constant 0 : i32
    return %arg0, %c0_i32, %arg1 : i32, i32, i32
  }
}

</mosaic_0001>

<bundles_post_ra>
// kernel: tpu_custom_call.1
= control target key start
LH: loop header
LB: loop body
LE: loop exit
PB: predicated region body
PF: predicated region fallthrough
CT: control target
= control target key end

     0   :  { %9 = vsyncpa [#allocation4], 0  ;;  %s5945_s0 = inlined_call_operand.hbm [shape: f32[2,1,8,512], index: 0, kind: input, shape index: {}]   ;;  %s5946_s1 = inlined_call_operand.hbm [shape: f32[2,256], index: 1, kind: input, shape index: {}]   ;;  %s5947_s2 = inlined_call_operand.hbm [shape: f32[8,128], index: 2, kind: input, shape index: {}]   ;;  %s5948_s3 = inlined_call_operand.vmem [shape: f32[8,128], index: 3, kind: input, shape index: {}]   ;;  %s5949_s4 = inlined_call_operand.hbm [shape: f32[2,8,256], index: 4, kind: output, shape index: {}]  }
   0x1   :  { %11 = vsyncpa [#allocation4 + $0x1], 0 }
   0x2   :  { %12 = vsyncpa [#allocation7], 0 }
   0x3   :  { %13 = vsyncpa [#allocation5], 0 }
   0x4   :  { %15 = vsyncpa [#allocation5 + $0x1], 0  ;;  %s3741_s15 = smov 0   ;;  %s3743_s16 = smov 0  }
   0x5   :  { %s3745_s17 = smov 0   ;;  %s3747_s18 = smov 0  }
   0x6   :  { %s3749_s19 = smov 0   ;;  %s3751_s20 = smov 0  }
   0x7 LB: > { %s2966_s21 = sadd.s32 4294967295, %s3596_s20   ;;  %s2967_s22 = sadd.s32 4294967294, %s3596_s20   ;;  %s3596_s20 = sphi %s3751_s20, %s21_s20   ;;  %s3592_s19 = sphi %s3749_s19, %s6218_s19   ;;  %s3588_s18 = sphi %s3747_s18, %s6217_s18   ;;  %s3584_s17 = sphi %s3745_s17, %s6216_s17   ;;  %s3580_s16 = sphi %s3743_s16, %s6215_s16   ;;  %s3576_s15 = sphi %s3741_s15, %s6214_s15  }
   0x8   : > { %p55_p0 = scmp.ne.s32.totalorder %s3580_s16, %s3576_s15  ;;  %p3775_p1 = scmp.eq.s32.totalorder %s2966_s21, 0 }
   0x9   : > { %p3779_p2 = scmp.eq.s32.totalorder %s2966_s21, 1  ;;  %p155_p3 = scmp.eq.s32.totalorder %s2967_s22, 1 }
   0xa   : > { %s6029_s23 = scalar_select %p3775_p1, 1, 0 }
   0xb   : > { %s6030_s24 = scalar_select %p3779_p2, 1, 0 }
   0xc   : > { %p3785_p4 = por %p3775_p1, %p55_p0  ;;  %p2968_p5 = scmp.ge.s32.totalorder %s3596_s20, 1 }
   0xd   : > { %p3790_p6 = por %p155_p3, %p55_p0  ;;  %p162_p7 = scmp.lt.s32.totalorder %s3596_s20, 3 }
   0xe   : > { %s6031_s25 = scalar_select %p3785_p4, 1, 0 }
   0xf   : > { %s6032_s26 = scalar_select %p3790_p6, 1, 0 }
  0x10   : > { %p3795_p8 = pnand %p2968_p5, %p162_p7  ;;  %s3598_s28 = smov [#allocation6]  }
  0x11   : > { %s178_s29 = sshll.u32 %s3598_s28, 4  ;;  %s3599_s30 = smov [#allocation8]   ;;  %s179_s29 = int_to_ptr.vmem [resolvable:$true] %s178_s29 }
  0x12   : > { %s6033_s27 = scalar_select %p3795_p8, 1, 0 }
  0x13   : > { %p3016_p10 = pneg %p3795_p8  ;;  %s189_s5 = sshll.u32 %s3599_s30, 4  ;;  %s3808_s5 = int_to_ptr.vmem [resolvable:$true] %s189_s5 }
  0x14   : > { %s3424_s9 = scalar_lea.hbm %s5946_s1, 64 }
  0x15   : > { %p3804_p11 = pnand %p3016_p10, %p3775_p1  ;;  %p3425_p12 = scmp.ne.s32.totalorder %s5946_s1, %s3424_s9 }
  0x16   : > { %p3431_p5 = scmp.lt.u32.totalorder %s3424_s9, %s5946_s1 }
  0x17   : > { %p3426_p13 = pneg %p3804_p11 }
  0x19   : > { %p3427_p0 = pnand %p3426_p13, %p3425_p12 }
  0x1b   : > { %p3428_p3 = pneg %p3427_p0 }
  0x1d   : > { %p3433_p7 = pnand %p3431_p5, %p3428_p3 }
  0x1f   : > { %3436 = shalt.err (!%p3433_p7)
}
  0x20   : > { %s3437_s14 = scalar_lea.vmem %s179_s29, 64  ;;  %p3445_p1 = scmp.lt.s32.totalorder %s179_s29, %s179_s29 }
  0x21   : > { %p3438_p10 = scmp.ne.s32.totalorder %s179_s29, %s3437_s14  ;;  %p3446_p4 = scmp.lt.s32.totalorder %s3437_s14, %s3437_s14 }
  0x23   : > { %p3440_p9 = pnand %p3438_p10, %p3426_p13  ;;  %p3447_p8 = por %p3446_p4, %p3445_p1 }
  0x25   : > { %p3441_p6 = pneg %p3440_p9 }
  0x27   : > { %p3448_p2 = pnand %p3447_p8, %p3441_p6 }
  0x29   : > { %3451 = shalt.err (!%p3448_p2)
}
  0x2a   : > { %3019 = dma.hbm_to_vmem [thread:$0]  (!%p3804_p11), %s5946_s1, 64, %s179_s29, [#allocation7]  }
  0x2b   : > { %s3452_s7 = scalar_lea.hbm %s5947_s2, 128 }
  0x2c   : > { %p3453_p9 = scmp.ne.s32.totalorder %s5947_s2, %s3452_s7  ;;  %p3459_p2 = scmp.lt.u32.totalorder %s3452_s7, %s5947_s2 }
  0x2e   : > { %p3455_p1 = pnand %p3453_p9, %p3426_p13 }
  0x30   : > { %p3456_p4 = pneg %p3455_p1 }
  0x32   : > { %p3461_p6 = pnand %p3459_p2, %p3456_p4 }
  0x34   : > { %3464 = shalt.err (!%p3461_p6)
}
  0x35   : > { %s3465_s29 = scalar_lea.vmem %s3808_s5, 128  ;;  %p3473_p3 = scmp.lt.s32.totalorder %s3808_s5, %s3808_s5 }
  0x36   : > { %p3466_p8 = scmp.ne.s32.totalorder %s3808_s5, %s3465_s29  ;;  %p3474_p5 = scmp.lt.s32.totalorder %s3465_s29, %s3465_s29 }
  0x38   : > { %p3468_p12 = pnand %p3466_p8, %p3426_p13  ;;  %p3475_p7 = por %p3474_p5, %p3473_p3 }
  0x3a   : > { %p3469_p0 = pneg %p3468_p12 }
  0x3c   : > { %p3476_p10 = pnand %p3475_p7, %p3469_p0 }
  0x3e   : > { %3479 = shalt.err (!%p3476_p10)
}
  0x3f   : > { %3022 = dma.hbm_to_vmem [thread:$0]  (!%p3804_p11), %s5947_s2, 128, %s3808_s5, [#allocation7]  }
  0x40   : > { %s33_s14 = sadd.s32 1, %s3592_s19  ;;  %s42_s21 = sadd.s32 1, %s3584_s17 }
  0x41   : > { %p35_p13 = scmp.ge.s32.totalorder %s33_s14, 2  ;;  %p49_p9 = scmp.ne.s32.totalorder %s3584_s17, %s3580_s16 }
  0x42   : > { %p50_p1 = scmp.eq.s32.totalorder %s3596_s20, 0  ;;  %p3033_p4 = scmp.lt.s32.totalorder %s3596_s20, 2 }
  0x43   : > { %s6220_s14 = smov (%p35_p13, %s33_s14), 0  ;;  %p6035_p6 = scmp.ne.s32.totalorder %s6030_s24, 0 }
  0x44   : > { %p51_p2 = por %p50_p1, %p49_p9  ;;  %s37_s22 = ssub.s32 %s3592_s19, %s6220_s14 }
  0x45   : > { %p3867_p8 = por %p6035_p6, %p49_p9  ;;  %s203_s28 = sand.u32 1, %s3584_s17  }
  0x46   : > { %p40_p12 = scmp.eq.s32.totalorder %s37_s22, 0  ;;  %s2972_s5 = sshll.u32 %s203_s28, 5 }
  0x47   : > { %s2986_s30 = sshll.u32 %s3592_s19, 9  ;;  %s207_s24 = scalar_lea.vmem [#allocation3], %s2972_s5 }
  0x48   : > { %s3876_s7 = scalar_select %p40_p12, %s3584_s17, %s42_s21  }
  0x49   : > { %s3881_s10 = scalar_lea.hbm %s5945_s0, %s2986_s30  ;;  %s217_s11 = sshll.u32 %s207_s24, 4  ;;  %s3889_s11 = int_to_ptr.vmem [resolvable:$true] %s217_s11 }
  0x4a   : > { %p3885_p11 = pnand %p3033_p4, %p51_p2  ;;  %s204_s12 = scalar_lea.sflag [#allocation4], %s203_s28 }
  0x4b   : > { %s3480_s13 = scalar_lea.hbm %s3881_s10, 512  ;;  %s3485_s5 = scalar_lea.hbm %s5945_s0, 1024 }
  0x4c   : > { %p3481_p0 = scmp.ne.s32.totalorder %s3881_s10, %s3480_s13  ;;  %p3482_p3 = pneg %p3885_p11 }
  0x4d   : > { %p3486_p10 = scmp.lt.u32.totalorder %s3881_s10, %s5945_s0  ;;  %p3487_p13 = scmp.lt.u32.totalorder %s3485_s5, %s3480_s13 }
  0x4e   : > { %p3483_p5 = pnand %p3482_p3, %p3481_p0  ;;  %p3489_p1 = scmp.lt.u32.totalorder %s3480_s13, %s3881_s10 }
  0x4f   : > { %p3488_p9 = por %p3487_p13, %p3486_p10 }
  0x50   : > { %p3484_p7 = pneg %p3483_p5 }
  0x51   : > { %p3490_p4 = por %p3489_p1, %p3488_p9 }
  0x53   : > { %p3491_p2 = pnand %p3490_p4, %p3484_p7 }
  0x55   : > { %3494 = shalt.err (!%p3491_p2)
}
  0x56   : > { %s3495_s28 = scalar_lea.vmem %s3889_s11, 512  ;;  %s3600_s9 = smov [#allocation3]  }
  0x57   : > { %p3496_p6 = scmp.ne.s32.totalorder %s3889_s11, %s3495_s28  ;;  %s3500_s24 = sshll.u32 %s3600_s9, 4  ;;  %s3501_s24 = int_to_ptr.vmem [resolvable:$false] %s3500_s24 }
  0x58   : > { %s3502_s21 = scalar_lea.vmem %s3501_s24, 1024  ;;  %p3503_p5 = scmp.lt.s32.totalorder %s3889_s11, %s3501_s24 }
  0x59   : > { %p3498_p12 = pnand %p3496_p6, %p3482_p3  ;;  %p3504_p10 = scmp.lt.s32.totalorder %s3502_s21, %s3495_s28 }
  0x5b   : > { %p3499_p0 = pneg %p3498_p12  ;;  %p3505_p13 = por %p3504_p10, %p3503_p5 }
  0x5d   : > { %p3506_p9 = pnand %p3505_p13, %p3499_p0 }
  0x5f   : > { %3509 = shalt.err (!%p3506_p9)
}
  0x60   : > { %3026 = dma.hbm_to_vmem [thread:$0]  (!%p3885_p11), %s3881_s10, 512, %s3889_s11, %s204_s12  }
  0x61   : > { %p6038_p7 = scmp.ne.s32.totalorder %s6033_s27, 0 }
  0x63   : > { %226 = sbr.rel (%p6038_p7) target bundleno = 5418 (0x152a), region = 36 }
  0x6a   : > { %s3919_s13 = sand.u32 1, %s3580_s16   ;;  %p6039_p3 = scmp.ne.s32.totalorder %s6031_s25, 0 }
  0x6b   : > { %s2976_s22 = sshll.u32 %s3919_s13, 5  ;;  %s229_s5 = scalar_lea.sflag [#allocation4], %s3919_s13 }
  0x6c   : > { %s3923_s30 = scalar_lea.vmem [#allocation3], %s2976_s22 }
  0x6d   : > { %3563 = dma.done.wait (%p6039_p3), %s229_s5, 512  }
  0x6e   : > { %3565 = vsyncadd (%p6039_p3), %s229_s5, 4294966784  ;;  %p6040_p11 = scmp.ne.s32.totalorder %s6029_s23, 0 }
  0x70   : > { %3567 = dma.done.wait (%p6040_p11), [#allocation7], 192  }
  0x71   : > { %3569 = vsyncadd (%p6040_p11), [#allocation7], 4294967104  ;;  %v276_v0 = vlaneseq  ;;  %v3601_v1 = vmov 10   ;;  %v3602_v2 = vmov 9   ;;  %s3603_s25 = smov 113   ;;  %s3604_s27 = smov 111  }
  0x72   : > { %3202 = vset.pattern.permute.xlu0 %v3601_v1  ;;  %3201 = vset.pattern.permute.xlu1 %v3602_v2  ;;  %v271_v6 = vld [vmem:[#allocation6 + $0x1] ss:$2 sm:$0x3]  ;;  %v269_v7 = vld [vmem:[#allocation6] ss:$2 sm:$0x3] }
  0x73   : > { %v277_v3 = vshrl.u32 %v276_v0, 7  ;;  %s3605_s23 = smov 127   ;;  %s3606_s10 = smov 1   ;;  %v3940_v12 = vld [vmem:[%s3923_s30 + $0x8] sm:$0xff]  ;;  %v3943_v13 = vld [vmem:[%s3923_s30] sm:$0xff]  ;;  %v3950_v14 = vld [vmem:[%s3923_s30 + $0x10] sm:$0xff] }
  0x74   : > { %s3607_s11 = smov 15   ;;  %s3608_s29 = smov 17   ;;  %v3961_v15 = vld [vmem:[%s3923_s30 + $0x18] sm:$0xff]  ;;  %v3967_v16 = vld [vmem:[#allocation8] sm:$0xff]  ;;  %v3610_v17 = vmov 2   ;;  %v3611_v18 = vmov 0  }
  0x75   : > { %v278_v4 = vsub.s32 0, %v277_v3  ;;  %v282_v5 = vsub.s32 1, %v277_v3  ;;  %s3609_s12 = smov 95   ;;  %v3612_v19 = vmov 5   ;;  %v3613_v20 = vmov 1   ;;  %s3626_s8 = smov 126  }
  0x76   : > { %v3614_v21 = vmov 8   ;;  %v3615_v22 = vmov 3   ;;  %v3616_v23 = vmov 16   ;;  %v3617_v24 = vmov 4   ;;  %s3627_s28 = smov 112   ;;  %s3628_s9 = smov 110  }
  0x77   : > { %v300_v8 = vrot.slane %v271_v6, %v278_v4  ;;  %v279_v9 = vrot.slane %v269_v7, %v278_v4  ;;  %v304_v10 = vrot.slane %v271_v6, %v282_v5  ;;  %v283_v11 = vrot.slane %v269_v7, %v282_v5  ;;  %s3629_s24 = smov 96   ;;  %s3630_s21 = smov 94  }
  0x78   : > { %v3618_v25 = vmov 6   ;;  %v3619_v26 = vmov 7   ;;  %v3620_v27 = vmov 11   ;;  %v3621_v28 = vmov 12  }
  0x79   : > { %305 = vrot.lane.b32.xlu1 %v300_v8, %s3603_s25  ;;  %284 = vrot.lane.b32.xlu0 %v279_v9, %s3604_s27  ;;  %v3622_v29 = vmov 13   ;;  %v3623_v30 = vmov 14   ;;  %v3624_v31 = vmov 15   ;;  %v3625_v32 = vmov 17  }
  0x7a   : > { %vm321_vm0 = vcmask 1039360   ;;  %vm348_vm1 = vcmask 121856   ;;  %vm360_vm2 = vcmask 138240   ;;  %vm309_vm3 = vcmask 924672  }
  0x7b   : > { %vm336_vm4 = vcmask 7168   ;;  %vm288_vm5 = vcmask 908288   ;;  %vm394_vm6 = vcmask 1031168   ;;  %vm412_vm7 = vcmask 916480  }
  0x7c   : > { %vm441_vm8 = vcmask 900096   ;;  %vm459_vm9 = vcmask 785408   ;;  %vm477_vm10 = vcmask 777216   ;;  %vm495_vm11 = vcmask 769024  }
  0x7d   : > { %307 = vrot.lane.b32.xlu1 %v304_v10, %s3603_s25  ;;  %286 = vrot.lane.b32.xlu0 %v283_v11, %s3604_s27  ;;  %vm2766_vm12 = vcmask 588800   ;;  %s2987_s25 = sshll.u32 %s3588_s18, 8  ;;  %s3715_s18 = smov [#allocation9]  }
  0x81   : > { %319 = vrot.lane.b32.xlu1 %v283_v11, %s3605_s23  ;;  %317 = vrot.lane.b32.xlu0 %v279_v9, %s3605_s23 }
  0x85   : > { %334 = vrot.lane.b32.xlu1 %v304_v10, %s3606_s10  ;;  %332 = vrot.lane.b32.xlu0 %v300_v8, %s3606_s10 }
  0x89   : > { %346 = vrot.lane.b32.xlu1 %v283_v11, %s3607_s11  ;;  %344 = vrot.lane.b32.xlu0 %v279_v9, %s3607_s11 }
  0x8d   : > { %358 = vrot.lane.b32.xlu1 %v304_v10, %s3608_s29  ;;  %356 = vrot.lane.b32.xlu0 %v300_v8, %s3608_s29 }
  0x91   : > { %373 = vrot.lane.b32.xlu1 %v3940_v12, %s3605_s23  ;;  %371 = vrot.lane.b32.xlu0 %v3943_v13, %s3605_s23 }
  0x95   : > { %421 = vrot.lane.b32.xlu1 %v3940_v12, %s3604_s27  ;;  %375 = vrot.lane.b32.xlu0 %v3950_v14, %s3605_s23 }
  0x99   : > { %471 = vrot.lane.b32.xlu1 %v3940_v12, %s3609_s12  ;;  %423 = vrot.lane.b32.xlu0 %v3950_v14, %s3604_s27 }
  0x9d   : > { %475 = vrot.lane.b32.xlu1 %v3961_v15, %s3609_s12  ;;  %473 = vrot.lane.b32.xlu0 %v3950_v14, %s3609_s12 }
  0xa1   : > { %513 = vperm.xlu0 %3202, %v3967_v16   ;;  %506 = vperm.xlu1 %3201, %v3967_v16  }
  0xa5   : > { %3205 = vset.pattern.permute.xlu0 %v3610_v17  ;;  %3203 = vset.pattern.permute.xlu1 %v3611_v18 }
  0xa6   : > { %558 = vperm.xlu0 %3205, %v3967_v16   ;;  %523 = vperm.xlu1 %3203, %v3967_v16  }
  0xaa   : > { %3208 = vset.pattern.permute.xlu0 %v3612_v19  ;;  %3204 = vset.pattern.permute.xlu1 %v3613_v20 }
  0xab   : > { %615 = vperm.xlu0 %3208, %v3967_v16   ;;  %539 = vperm.xlu1 %3204, %v3967_v16  }
  0xaf   : > { %3211 = vset.pattern.permute.xlu0 %v3614_v21  ;;  %3206 = vset.pattern.permute.xlu1 %v3615_v22 }
  0xb0   : > { %672 = vperm.xlu0 %3211, %v3967_v16   ;;  %577 = vperm.xlu1 %3206, %v3967_v16  }
  0xb4   : > { %3217 = vset.pattern.permute.xlu0 %v3616_v23  ;;  %3207 = vset.pattern.permute.xlu1 %v3617_v24 }
  0xb5   : > { %801 = vperm.xlu0 %3217, %v3967_v16   ;;  %596 = vperm.xlu1 %3207, %v3967_v16  }
  0xb9   : > { %3209 = vset.pattern.permute.xlu1 %v3618_v25 }
  0xba   : > { %634 = vperm.xlu1 %3209, %v3967_v16  }
  0xbe   : > { %3210 = vset.pattern.permute.xlu1 %v3619_v26 }
  0xbf   : > { %653 = vperm.xlu1 %3210, %v3967_v16  }
  0xc3   : > { %3212 = vset.pattern.permute.xlu1 %v3620_v27 }
  0xc4   : > { %703 = vperm.xlu1 %3212, %v3967_v16  }
  0xc8   : > { %3213 = vset.pattern.permute.xlu1 %v3621_v28 }
  0xc9   : > { %710 = vperm.xlu1 %3213, %v3967_v16  }
  0xcd   : > { %3214 = vset.pattern.permute.xlu1 %v3622_v29 }
  0xce   : > { %734 = vperm.xlu1 %3214, %v3967_v16  }
  0xd2   : > { %3215 = vset.pattern.permute.xlu1 %v3623_v30 }
  0xd3   : > { %758 = vperm.xlu1 %3215, %v3967_v16  }
  0xd7   : > { %3216 = vset.pattern.permute.xlu1 %v3624_v31 }
  0xd8   : > { %782 = vperm.xlu1 %3216, %v3967_v16  }
  0xdc   : > { %3218 = vset.pattern.permute.xlu1 %v3625_v32 }
  0xeb   : > { %v306_v33 = vpop.permute.xlu1 %305  ;;  %v3986_v34 = vpop.permute.xlu0 %284 }
  0xec   : > { %v3989_v35 = vmul.f32 %v306_v33, %v3943_v13 }
  0xee   : > { %6041 = vst [vmem:[#allocation13_spill] sm:$0xff] %v3989_v35  ;;  %388 = vrot.lane.b32.xlu1 %v3989_v35, %s3626_s8 }
  0xef   : > { %v308_v36 = vpop.permute.xlu1 %307  ;;  %v3993_v37 = vpop.permute.xlu0 %286 }
  0xf0   : > { %v3996_v38 = vmul.f32 %v308_v36, %v3950_v14  ;;  %v310_v61 = vsel %vm309_vm3, %v306_v33, %v308_v36 }
  0xf1   : > { %v4060_v63 = vmul.f32 %v310_v61, %v3940_v12 }
  0xf2   : > { %6042 = vst [vmem:[#allocation14_spill] sm:$0xff] %v3996_v38  ;;  %392 = vrot.lane.b32.xlu1 %v3996_v38, %s3626_s8 }
  0xf3   : > { %v320_v39 = vpop.permute.xlu1 %319  ;;  %v318_v40 = vpop.permute.xlu0 %317  ;;  %6054 = vst [vmem:[#allocation26_spill] sm:$0xff] %v4060_v63 }
  0xf4   : > { %v4001_v41 = vmul.f32 %v318_v40, %v3943_v13  ;;  %v4006_v44 = vmul.f32 %v320_v39, %v3950_v14  ;;  %v322_v50 = vsel %vm321_vm0, %v318_v40, %v320_v39 }
  0xf5   : > { %v4027_v51 = vmul.f32 %v322_v50, %v3940_v12 }
  0xf6   : > { %6043 = vst [vmem:[#allocation15_spill] sm:$0xff] %v4001_v41  ;;  %406 = vrot.lane.b32.xlu0 %v4001_v41, %s3627_s28  ;;  %6044 = vst [vmem:[#allocation16_spill] sm:$0xff] %v4006_v44 }
  0xf7   : > { %v335_v42 = vpop.permute.xlu1 %334  ;;  %v333_v43 = vpop.permute.xlu0 %332  ;;  %6048 = vst [vmem:[#allocation20_spill] sm:$0xff] %v4027_v51 }
  0xf8   : > { %v4009_v45 = vmul.f32 %v333_v43, %v3940_v12  ;;  %v4016_v47 = vmul.f32 %v335_v42, %v3961_v15  ;;  %v337_v0 = vsel %vm336_vm4, %v333_v43, %v335_v42 }
  0xf9   : > { %v4065_v1 = vmul.f32 %v337_v0, %v3950_v14  ;;  %v3631_v0 = vmov 18  }
  0xfa   : > { %6045 = vst [vmem:[#allocation17_spill] sm:$0xff] %v4009_v45  ;;  %410 = vrot.lane.b32.xlu0 %v4006_v44, %s3627_s28  ;;  %435 = vrot.lane.b32.xlu1 %v4009_v45, %s3628_s9  ;;  %6046 = vst [vmem:[#allocation18_spill] sm:$0xff] %v4016_v47 }
  0xfb   : > { %v345_v46 = vpop.permute.xlu0 %344  ;;  %v347_v48 = vpop.permute.xlu1 %346  ;;  %6055 = vst [vmem:[#allocation27_spill] sm:$0xff] %v4065_v1 }
  0xfc   : > { %v4019_v49 = vmul.f32 %v345_v46, %v3940_v12  ;;  %v4030_v52 = vmul.f32 %v347_v48, %v3961_v15  ;;  %v349_v53 = vsel %vm348_vm1, %v345_v46, %v347_v48 }
  0xfd   : > { %v4040_v57 = vmul.f32 %v349_v53, %v3950_v14 }
  0xfe   : > { %6047 = vst [vmem:[#allocation19_spill] sm:$0xff] %v4019_v49  ;;  %453 = vrot.lane.b32.xlu0 %v4019_v49, %s3629_s24  ;;  %439 = vrot.lane.b32.xlu1 %v4016_v47, %s3628_s9  ;;  %6049 = vst [vmem:[#allocation21_spill] sm:$0xff] %v4030_v52 }
  0xff   : > { %v357_v54 = vpop.permute.xlu0 %356  ;;  %v359_v55 = vpop.permute.xlu1 %358  ;;  %6051 = vst [vmem:[#allocation23_spill] sm:$0xff] %v4040_v57 }
 0x100   : > { %v4033_v56 = vmul.f32 %v357_v54, %v3940_v12  ;;  %v361_v58 = vsel %vm360_vm2, %v357_v54, %v359_v55  ;;  %v4048_v59 = vmul.f32 %v359_v55, %v3961_v15 }
 0x101   : > { %v4051_v60 = vmul.f32 %v361_v58, %v3950_v14 }
 0x102   : > { %6050 = vst [vmem:[#allocation22_spill] sm:$0xff] %v4033_v56  ;;  %457 = vrot.lane.b32.xlu0 %v4030_v52, %s3629_s24  ;;  %408 = vrot.lane.b32.xlu1 %v4027_v51, %s3627_s28  ;;  %6052 = vst [vmem:[#allocation24_spill] sm:$0xff] %v4048_v59 }
 0x103   : > { %6053 = vst [vmem:[#allocation25_spill] sm:$0xff] %v4051_v60  ;;  %v4053_v62 = vpop.permute.xlu1 %373  ;;  %v4081_v8 = vpop.permute.xlu0 %371 }
 0x106   : > { %489 = vrot.lane.b32.xlu0 %v4033_v56, %s3630_s21  ;;  %455 = vrot.lane.b32.xlu1 %v4040_v57, %s3629_s24 }
 0x107   : > { %v4067_v2 = vpop.permute.xlu1 %421  ;;  %v4085_v10 = vpop.permute.xlu0 %375 }
 0x10a   : > { %493 = vrot.lane.b32.xlu0 %v4048_v59, %s3630_s21  ;;  %491 = vrot.lane.b32.xlu1 %v4051_v60, %s3630_s21 }
 0x10b   : > { %v4071_v3 = vpop.permute.xlu1 %471  ;;  %v4089_v17 = vpop.permute.xlu0 %423 }
 0x10e   : > { %390 = vrot.lane.b32.xlu0 %v4060_v63, %s3626_s8 }
 0x10f   : > { %v4073_v4 = vpop.permute.xlu1 %475  ;;  %v4093_v19 = vpop.permute.xlu0 %473 }
 0x112   : > { %437 = vrot.lane.b32.xlu0 %v4065_v1, %s3628_s9 }
 0x120   : > { %v4075_v5 = vpop.permute.xlu1 %506  ;;  %v4097_v21 = vpop.permute.xlu0 %513 }
 0x125   : > { %v4077_v6 = vpop.permute.xlu1 %523  ;;  %v4101_v23 = vpop.permute.xlu0 %558 }
 0x12a   : > { %v4079_v7 = vpop.permute.xlu1 %539  ;;  %v4107_v27 = vpop.permute.xlu0 %615 }
 0x12f   : > { %v4083_v9 = vpop.permute.xlu1 %577  ;;  %v4114_v33 = vpop.permute.xlu0 %672 }
 0x134   : > { %v4087_v11 = vpop.permute.xlu1 %596  ;;  %v802_v43 = vpop.permute.xlu0 %801 }
 0x135   : > { %v804_v48 = vmul.f32 %v802_v43, %v4009_v45  ;;  %v805_v53 = vmul.f32 %v802_v43, %v4065_v1  ;;  %v806_v55 = vmul.f32 %v802_v43, %v4016_v47 }
 0x139   : > { %v4091_v18 = vpop.permute.xlu1 %634 }
 0x13e   : > { %v4095_v20 = vpop.permute.xlu1 %653 }
 0x143   : > { %v4099_v22 = vpop.permute.xlu1 %703 }
 0x144   : > { %6056 = vst [vmem:[#allocation28_spill] sm:$0xff] %v4099_v22 }
 0x148   : > { %v711_v24 = vpop.permute.xlu1 %710 }
 0x149   : > { %v714_v25 = vmul.f32 %v711_v24, %v3940_v12  ;;  %v713_v26 = vmul.f32 %v711_v24, %v3943_v13  ;;  %v715_v29 = vmul.f32 %v711_v24, %v3950_v14 }
 0x14b   : > { %721 = vrot.lane.b32.xlu1 %v714_v25, %s3605_s23  ;;  %719 = vrot.lane.b32.xlu0 %v713_v26, %s3605_s23 }
 0x14d   : > { %v735_v28 = vpop.permute.xlu1 %734 }
 0x14e   : > { %v738_v30 = vmul.f32 %v735_v28, %v4060_v63  ;;  %v737_v31 = vmul.f32 %v735_v28, %v3989_v35  ;;  %v739_v39 = vmul.f32 %v735_v28, %v3996_v38 }
 0x14f   : > { %723 = vrot.lane.b32.xlu0 %v715_v29, %s3605_s23 }
 0x150   : > { %745 = vrot.lane.b32.xlu1 %v738_v30, %s3626_s8 }
 0x152   : > { %v759_v32 = vpop.permute.xlu1 %758 }
 0x153   : > { %743 = vrot.lane.b32.xlu0 %v737_v31, %s3626_s8  ;;  %v762_v36 = vmul.f32 %v759_v32, %v4027_v51  ;;  %v761_v46 = vmul.f32 %v759_v32, %v4001_v41  ;;  %v763_v50 = vmul.f32 %v759_v32, %v4006_v44  ;;  %v4138_v31 = vmul.f32 %v3993_v37, %v3950_v14 }
 0x155   : > { %769 = vrot.lane.b32.xlu1 %v762_v36, %s3627_s28  ;;  %6057 = vst [vmem:[#allocation29_spill] sm:$0xff] %v4138_v31  ;;  %v289_v36 = vsel %vm288_vm5, %v3986_v34, %v3993_v37 }
 0x157   : > { %747 = vrot.lane.b32.xlu0 %v739_v39, %s3626_s8  ;;  %v783_v40 = vpop.permute.xlu1 %782  ;;  %v4145_v39 = vmul.f32 %v3986_v34, %v3943_v13 }
 0x158   : > { %v786_v42 = vmul.f32 %v783_v40, %v3950_v14  ;;  %v785_v54 = vmul.f32 %v783_v40, %v3940_v12  ;;  %v4148_v40 = vmul.f32 %v289_v36, %v3940_v12 }
 0x15a   : > { %791 = vrot.lane.b32.xlu1 %v786_v42, %s3604_s27  ;;  %v384_v42 = vadd.f32 %v4085_v10, %v4138_v31 }
 0x15b   : > { %767 = vrot.lane.b32.xlu0 %v761_v46, %s3627_s28  ;;  %v377_v46 = vsel %vm321_vm0, %v4081_v8, %v4053_v62 }
 0x15c   : > { %v382_v34 = vadd.f32 %v377_v46, %v4145_v39 }
 0x15e   : > { %810 = vrot.lane.b32.xlu1 %v804_v48, %s3628_s9  ;;  %v378_v48 = vsel %vm321_vm0, %v4053_v62, %v4085_v10 }
 0x15f   : > { %771 = vrot.lane.b32.xlu0 %v763_v50, %s3627_s28 }
 0x160   : > { %v389_v58 = vpop.permute.xlu1 %388 }
 0x162   : > { %812 = vrot.lane.b32.xlu1 %v805_v53, %s3628_s9  ;;  %v383_v53 = vadd.f32 %v378_v48, %v4148_v40 }
 0x163   : > { %789 = vrot.lane.b32.xlu0 %v785_v54, %s3604_s27 }
 0x164   : > { %v393_v25 = vpop.permute.xlu1 %392 }
 0x165   : > { %v402_v50 = vadd.f32 %v393_v25, %v384_v42 }
 0x166   : > { %825 = vperm.xlu1 %3218, %v3967_v16  }
 0x167   : > { %814 = vrot.lane.b32.xlu0 %v806_v55, %s3628_s9 }
 0x168   : > { %v407_v61 = vpop.permute.xlu0 %406 }
 0x16a   : > { %3219 = vset.pattern.permute.xlu1 %v3631_v0 }
 0x16c   : > { %v411_v24 = vpop.permute.xlu0 %410  ;;  %v436_v28 = vpop.permute.xlu1 %435 }
 0x16d   : > { %v420_v54 = vadd.f32 %v411_v24, %v402_v50 }
 0x16f   : > { %v431_v42 = vadd.f32 %v4089_v17, %v420_v54 }
 0x170   : > { %v454_v26 = vpop.permute.xlu0 %453  ;;  %v440_v30 = vpop.permute.xlu1 %439 }
 0x174   : > { %v458_v29 = vpop.permute.xlu0 %457  ;;  %v409_v37 = vpop.permute.xlu1 %408 }
 0x175   : > { %v413_v22 = vsel %vm412_vm7, %v407_v61, %v409_v37  ;;  %v414_v62 = vsel %vm412_vm7, %v409_v37, %v411_v24 }
 0x178   : > { %v490_v32 = vpop.permute.xlu0 %489  ;;  %v456_v10 = vpop.permute.xlu1 %455 }
 0x179   : > { %v461_v24 = vsel %vm459_vm9, %v456_v10, %v458_v29  ;;  %v478_v29 = vsel %vm477_vm10, %v4071_v3, %v4093_v19 }
 0x17c   : > { %v494_v43 = vpop.permute.xlu0 %493 }
 0x180   : > { %v391_v55 = vpop.permute.xlu0 %390 }
 0x181   : > { %v395_v0 = vsel %vm394_vm6, %v389_v58, %v391_v55  ;;  %v396_v36 = vsel %vm394_vm6, %v391_v55, %v393_v25  ;;  %v425_v58 = vsel %vm288_vm5, %v4067_v2, %v4089_v17  ;;  %v460_v17 = vsel %vm459_vm9, %v454_v26, %v456_v10 }
 0x182   : > { %v400_v31 = vadd.f32 %v395_v0, %v382_v34  ;;  %v401_v8 = vadd.f32 %v396_v36, %v383_v53 }
 0x184   : > { %v418_v46 = vadd.f32 %v413_v22, %v400_v31  ;;  %v419_v48 = vadd.f32 %v414_v62, %v401_v8  ;;  %v438_v50 = vpop.permute.xlu0 %437  ;;  %v479_v31 = vsel %vm477_vm10, %v4093_v19, %v4073_v4 }
 0x185   : > { %v443_v25 = vsel %vm441_vm8, %v438_v50, %v440_v30  ;;  %v442_v37 = vsel %vm441_vm8, %v436_v28, %v438_v50  ;;  %v492_v30 = vpop.permute.xlu1 %491 }
 0x186   : > { %v429_v34 = vadd.f32 %v4067_v2, %v418_v46  ;;  %v430_v53 = vadd.f32 %v425_v58, %v419_v48  ;;  %v449_v61 = vadd.f32 %v443_v25, %v431_v42  ;;  %v497_v8 = vsel %vm495_vm11, %v492_v30, %v494_v43 }
 0x187   : > { %v496_v42 = vsel %vm495_vm11, %v490_v32, %v492_v30 }
 0x188   : > { %v447_v54 = vadd.f32 %v436_v28, %v429_v34  ;;  %v448_v55 = vadd.f32 %v442_v37, %v430_v53  ;;  %v467_v22 = vadd.f32 %v461_v24, %v449_v61 }
 0x18a   : > { %v465_v0 = vadd.f32 %v454_v26, %v447_v54  ;;  %v466_v36 = vadd.f32 %v460_v17, %v448_v55  ;;  %v485_v2 = vadd.f32 %v479_v31, %v467_v22 }
 0x18c   : > { %v483_v28 = vadd.f32 %v4071_v3, %v465_v0  ;;  %v484_v62 = vadd.f32 %v478_v29, %v466_v36  ;;  %v4182_v46 = vadd.f32 %v497_v8, %v485_v2 }
 0x18e   : > { %v4184_v4 = vadd.f32 %v490_v32, %v483_v28  ;;  %v4186_v10 = vadd.f32 %v496_v42, %v484_v62  ;;  %v511_v32 = vmul.f32 %v4075_v5, %v4182_v46  ;;  %v518_v50 = vmul.f32 %v4097_v21, %v4182_v46 }
 0x190   : > { %v509_v26 = vmul.f32 %v4075_v5, %v4184_v4  ;;  %v516_v48 = vmul.f32 %v4097_v21, %v4184_v4  ;;  %v510_v19 = vmul.f32 %v4075_v5, %v4186_v10  ;;  %v542_v3 = vmul.f32 %v4079_v7, %v4184_v4 }
 0x191   : > { %v517_v43 = vmul.f32 %v4097_v21, %v4186_v10  ;;  %v543_v25 = vmul.f32 %v4079_v7, %v4186_v10  ;;  %v526_v34 = vmul.f32 %v4077_v6, %v4184_v4  ;;  %v561_v53 = vmul.f32 %v4101_v23, %v4184_v4 }
 0x192   : > { %v4202_v58 = vmax.f32 %v509_v26, %v516_v48  ;;  %v527_v24 = vmul.f32 %v4077_v6, %v4186_v10  ;;  %v562_v5 = vmul.f32 %v4101_v23, %v4186_v10  ;;  %v580_v21 = vmul.f32 %v4083_v9, %v4184_v4 }
 0x193   : > { %v4210_v61 = vmax.f32 %v510_v19, %v517_v43  ;;  %v581_v22 = vmul.f32 %v4083_v9, %v4186_v10  ;;  %v599_v0 = vmul.f32 %v4087_v11, %v4184_v4  ;;  %v600_v42 = vmul.f32 %v4087_v11, %v4186_v10 }
 0x194   : > { %v545_v37 = vsub.f32 %v542_v3, %v4202_v58  ;;  %v529_v54 = vsub.f32 %v526_v34, %v4202_v58  ;;  %v564_v55 = vsub.f32 %v561_v53, %v4202_v58  ;;  %v583_v29 = vsub.f32 %v580_v21, %v4202_v58 }
 0x195   : > { %v546_v31 = vsub.f32 %v543_v25, %v4210_v61  ;;  %v530_v17 = vsub.f32 %v527_v24, %v4210_v61  ;;  %v565_v30 = vsub.f32 %v562_v5, %v4210_v61  ;;  %v584_v8 = vsub.f32 %v581_v22, %v4210_v61 }
 0x196   : > { %v548_v36 = vmul.f32 1.442695, %v545_v37  ;;  %v532_v2 = vmul.f32 1.442695, %v529_v54  ;;  %v528_v26 = vmul.f32 %v4077_v6, %v4182_v46  ;;  %v567_v48 = vmul.f32 1.442695, %v564_v55 }
 0x197   : > { %v550_v28 = vmul.f32 1.442695, %v546_v31  ;;  %v534_v62 = vmul.f32 1.442695, %v530_v17  ;;  %v569_v19 = vmul.f32 1.442695, %v565_v30  ;;  %v602_v3 = vsub.f32 %v599_v0, %v4202_v58 }
 0x198   : > { %3354 = vpow2.f32 %v548_v36  ;;  %v603_v43 = vsub.f32 %v600_v42, %v4210_v61  ;;  %v618_v25 = vmul.f32 %v4107_v27, %v4184_v4  ;;  %v619_v34 = vmul.f32 %v4107_v27, %v4186_v10 }
 0x199   : > { %3356 = vpow2.f32 %v550_v28  ;;  %v586_v53 = vmul.f32 1.442695, %v583_v29  ;;  %v588_v24 = vmul.f32 1.442695, %v584_v8  ;;  %v637_v6 = vmul.f32 %v4091_v18, %v4184_v4 }
 0x19a   : > { %3358 = vpow2.f32 %v532_v2  ;;  %v621_v5 = vsub.f32 %v618_v25, %v4202_v58  ;;  %v622_v21 = vsub.f32 %v619_v34, %v4210_v61  ;;  %v638_v37 = vmul.f32 %v4091_v18, %v4186_v10 }
 0x19b   : > { %3360 = vpow2.f32 %v534_v62  ;;  %v605_v54 = vmul.f32 1.442695, %v602_v3  ;;  %v640_v55 = vsub.f32 %v637_v6, %v4202_v58  ;;  %v656_v22 = vmul.f32 %v4095_v20, %v4184_v4 }
 0x19c   : > { %3362 = vpow2.f32 %v567_v48  ;;  %v607_v31 = vmul.f32 1.442695, %v603_v43  ;;  %v641_v17 = vsub.f32 %v638_v37, %v4210_v61  ;;  %v657_v30 = vmul.f32 %v4095_v20, %v4186_v10 }
 0x19d   : > { %3364 = vpow2.f32 %v569_v19  ;;  %v624_v0 = vmul.f32 1.442695, %v621_v5  ;;  %v626_v36 = vmul.f32 1.442695, %v622_v21  ;;  %v659_v2 = vsub.f32 %v656_v22, %v4202_v58 }
 0x19e   : > { %3366 = vpow2.f32 %v586_v53  ;;  %v660_v29 = vsub.f32 %v657_v30, %v4210_v61  ;;  %v675_v8 = vmul.f32 %v4114_v33, %v4184_v4  ;;  %v676_v28 = vmul.f32 %v4114_v33, %v4186_v10 }
 0x19f   : > { %3368 = vpow2.f32 %v588_v24  ;;  %v643_v62 = vmul.f32 1.442695, %v640_v55  ;;  %v4258_v42 = vmax.f32 %v511_v32, %v518_v50  ;;  %v544_v48 = vmul.f32 %v4079_v7, %v4182_v46 }
 0x1a0   : > { %3370 = vpow2.f32 %v605_v54  ;;  %v645_v19 = vmul.f32 1.442695, %v641_v17  ;;  %v678_v3 = vsub.f32 %v675_v8, %v4202_v58  ;;  %v679_v43 = vsub.f32 %v676_v28, %v4210_v61 }
 0x1a1   : > { %3372 = vpow2.f32 %v607_v31  ;;  %v662_v4 = vmul.f32 1.442695, %v659_v2  ;;  %v531_v34 = vsub.f32 %v528_v26, %v4258_v42  ;;  %v664_v32 = vmul.f32 1.442695, %v660_v29 }
 0x1a2   : > { %v4264_v25 = vpop.eup %3354  ;;  %3374 = vpow2.f32 %v624_v0  ;;  %v547_v50 = vsub.f32 %v544_v48, %v4258_v42  ;;  %v563_v7 = vmul.f32 %v4101_v23, %v4182_v46  ;;  %v681_v58 = vmul.f32 1.442695, %v678_v3 }
 0x1a3   : > { %6058 = vst [vmem:[#allocation30_spill] sm:$0xff] %v4264_v25  ;;  %v4267_v10 = vpop.eup %3356  ;;  %3376 = vpow2.f32 %v626_v36  ;;  %v582_v61 = vmul.f32 %v4083_v9, %v4182_v46  ;;  %v683_v6 = vmul.f32 1.442695, %v679_v43  ;;  %v536_v37 = vmul.f32 1.442695, %v531_v34 }
 0x1a4   : > { %6059 = vst [vmem:[#allocation31_spill] sm:$0xff] %v4267_v10  ;;  %v4272_v53 = vpop.eup %3358  ;;  %3378 = vpow2.f32 %v643_v62  ;;  %v566_v5 = vsub.f32 %v563_v7, %v4258_v42  ;;  %v601_v54 = vmul.f32 %v4087_v11, %v4182_v46  ;;  %v552_v22 = vmul.f32 1.442695, %v547_v50 }
 0x1a5   : > { %6060 = vst [vmem:[#allocation32_spill] sm:$0xff] %v4272_v53  ;;  %v4276_v24 = vpop.eup %3360  ;;  %v554_v26 = vadd.f32 %v4272_v53, %v4264_v25  ;;  %3380 = vpow2.f32 %v645_v19  ;;  %v585_v31 = vsub.f32 %v582_v61, %v4258_v42  ;;  %v620_v0 = vmul.f32 %v4107_v27, %v4182_v46 }
 0x1a6   : > { %6061 = vst [vmem:[#allocation33_spill] sm:$0xff] %v4276_v24  ;;  %v4281_v21 = vpop.eup %3362  ;;  %v555_v23 = vadd.f32 %v4276_v24, %v4267_v10  ;;  %3382 = vpow2.f32 %v662_v4  ;;  %v571_v2 = vmul.f32 1.442695, %v566_v5  ;;  %v604_v29 = vsub.f32 %v601_v54, %v4258_v42 }
 0x1a7   : > { %v4287_v9 = vpop.eup %3364  ;;  %v573_v55 = vadd.f32 %v4281_v21, %v554_v26  ;;  %3384 = vpow2.f32 %v664_v32  ;;  %v623_v62 = vsub.f32 %v620_v0, %v4258_v42  ;;  %v639_v48 = vmul.f32 %v4091_v18, %v4182_v46 }
 0x1a8   : > { %v4291_v17 = vpop.eup %3366  ;;  %v574_v30 = vadd.f32 %v4287_v9, %v555_v23  ;;  %3386 = vpow2.f32 %v681_v58  ;;  %v590_v3 = vmul.f32 1.442695, %v585_v31  ;;  %v609_v7 = vmul.f32 1.442695, %v604_v29 }
 0x1a9   : > { %v4296_v36 = vpop.eup %3368  ;;  %v592_v11 = vadd.f32 %v4291_v17, %v573_v55  ;;  %3388 = vpow2.f32 %v683_v6  ;;  %v642_v34 = vsub.f32 %v639_v48, %v4258_v42  ;;  %v658_v18 = vmul.f32 %v4095_v20, %v4182_v46 }
 0x1aa   : > { %v4300_v8 = vpop.eup %3370  ;;  %v593_v28 = vadd.f32 %v4296_v36, %v574_v30  ;;  %3390 = vpow2.f32 %v536_v37  ;;  %v628_v26 = vmul.f32 1.442695, %v623_v62  ;;  %v677_v37 = vmul.f32 %v4114_v33, %v4182_v46 }
 0x1ab   : > { %v4306_v19 = vpop.eup %3372  ;;  %v611_v27 = vadd.f32 %v4300_v8, %v592_v11  ;;  %3392 = vpow2.f32 %v552_v22  ;;  %v661_v23 = vsub.f32 %v658_v18, %v4258_v42  ;;  %v647_v22 = vmul.f32 1.442695, %v642_v34 }
 0x1ac   : > { %v4309_v43 = vpop.eup %3374  ;;  %v612_v4 = vadd.f32 %v4306_v19, %v593_v28  ;;  %3394 = vpow2.f32 %v571_v2  ;;  %v680_v30 = vsub.f32 %v677_v37, %v4258_v42 }
 0x1ad   : > { %v4313_v32 = vpop.eup %3376  ;;  %v630_v50 = vadd.f32 %v4309_v43, %v611_v27  ;;  %3396 = vpow2.f32 %v590_v3  ;;  %v666_v28 = vmul.f32 1.442695, %v661_v23 }
 0x1ae   : > { %v4318_v58 = vpop.eup %3378  ;;  %v631_v61 = vadd.f32 %v4313_v32, %v612_v4  ;;  %3398 = vpow2.f32 %v609_v7  ;;  %v685_v46 = vmul.f32 1.442695, %v680_v30 }
 0x1af   : > { %v4321_v6 = vpop.eup %3380  ;;  %v649_v5 = vadd.f32 %v4318_v58, %v630_v50  ;;  %3400 = vpow2.f32 %v628_v26 }
 0x1b0   : > { %v3383_v54 = vpop.eup %3382  ;;  %v650_v55 = vadd.f32 %v4321_v6, %v631_v61  ;;  %3402 = vpow2.f32 %v647_v22 }
 0x1b1   : > { %v3385_v20 = vpop.eup %3384  ;;  %v668_v31 = vadd.f32 %v3383_v54, %v649_v5 }
 0x1b2   : > { %v3387_v0 = vpop.eup %3386  ;;  %v669_v11 = vadd.f32 %v3385_v20, %v650_v55 }
 0x1b3   : > { %v3389_v2 = vpop.eup %3388  ;;  %v687_v29 = vadd.f32 %v3387_v0, %v668_v31 }
 0x1b4   : > { %v4329_v62 = vpop.eup %3390  ;;  %v688_v48 = vadd.f32 %v3389_v2, %v669_v11 }
 0x1b5   : > { %6062 = vst [vmem:[#allocation34_spill] sm:$0xff] %v4329_v62  ;;  %v4331_v33 = vpop.eup %3392  ;;  %3404 = vrcp.f32 %v687_v29 }
 0x1b6   : > { %6063 = vst [vmem:[#allocation35_spill] sm:$0xff] %v4331_v33  ;;  %3406 = vrcp.f32 %v688_v48  ;;  %v556_v27 = vadd.f32 %v4331_v33, %v4329_v62  ;;  %v3395_v3 = vpop.eup %3394 }
 0x1b7   : > { %3408 = vpow2.f32 %v666_v28  ;;  %v3397_v4 = vpop.eup %3396 }
 0x1b8   : > { %v575_v42 = vadd.f32 %v3395_v3, %v556_v27  ;;  %3410 = vpow2.f32 %v685_v46  ;;  %v3399_v50 = vpop.eup %3398 }
 0x1b9   : > { %v3401_v18 = vpop.eup %3400 }
 0x1ba   : > { %v594_v34 = vadd.f32 %v3397_v4, %v575_v42  ;;  %v3403_v61 = vpop.eup %3402 }
 0x1bc   : > { %v613_v7 = vadd.f32 %v3399_v50, %v594_v34 }
 0x1bd   : > { %v4335_v10 = vpop.permute.xlu1 %721 }
 0x1be   : > { %v632_v26 = vadd.f32 %v3401_v18, %v613_v7 }
 0x1bf   : > { %v3405_v5 = vpop.eup %3404 }
 0x1c0   : > { %v3407_v23 = vpop.eup %3406  ;;  %v693_v37 = vmul.f32 %v3405_v5, %v687_v29  ;;  %v651_v55 = vadd.f32 %v3403_v61, %v632_v26 }
 0x1c1   : > { %v3409_v22 = vpop.eup %3408  ;;  %v694_v31 = vmul.f32 %v3407_v23, %v688_v48 }
 0x1c2   : > { %v696_v30 = vsub.f32 2.0, %v693_v37  ;;  %v670_v11 = vadd.f32 %v3409_v22, %v651_v55  ;;  %v3411_v33 = vpop.eup %3410 }
 0x1c3   : > { %v697_v28 = vsub.f32 2.0, %v694_v31 }
 0x1c4   : > { %v4337_v27 = vmul.f32 %v3405_v5, %v696_v30  ;;  %v689_v46 = vadd.f32 %v3411_v33, %v670_v11  ;;  %v4361_v5 = vpop.permute.xlu1 %745 }
 0x1c5   : > { %v4339_v42 = vmul.f32 %v3407_v23, %v697_v28 }
 0x1c6   : > { %6064 = vst [vmem:[#allocation36_spill] sm:$0xff] %v4337_v27  ;;  %3412 = vrcp.f32 %v689_v46  ;;  %v4343_v34 = vmul.f32 %v4281_v21, %v4337_v27  ;;  %v4351_v48 = vmul.f32 %v4291_v17, %v4337_v27  ;;  %v4359_v26 = vmul.f32 %v4300_v8, %v4337_v27 }
 0x1c7   : > { %6065 = vst [vmem:[#allocation37_spill] sm:$0xff] %v4339_v42  ;;  %v4347_v29 = vmul.f32 %v4287_v9, %v4339_v42  ;;  %v4355_v7 = vmul.f32 %v4296_v36, %v4339_v42  ;;  %v4365_v21 = vmul.f32 %v4306_v19, %v4339_v42  ;;  %v4369_v9 = vmul.f32 %v4309_v43, %v4337_v27 }
 0x1c8   : > { %6066 = vst [vmem:[#allocation38_spill] sm:$0xff] %v4343_v34  ;;  %6068 = vst [vmem:[#allocation40_spill] sm:$0xff] %v4351_v48  ;;  %v4373_v17 = vmul.f32 %v4313_v32, %v4339_v42  ;;  %v4376_v36 = vmul.f32 %v3383_v54, %v4337_v27  ;;  %v4380_v8 = vmul.f32 %v4318_v58, %v4337_v27  ;;  %v4395_v37 = vpop.permute.xlu1 %769 }
 0x1c9   : > { %6067 = vst [vmem:[#allocation39_spill] sm:$0xff] %v4347_v29  ;;  %6069 = vst [vmem:[#allocation41_spill] sm:$0xff] %v4355_v7  ;;  %v4384_v23 = vmul.f32 %v4321_v6, %v4339_v42  ;;  %v4387_v19 = vmul.f32 %v3385_v20, %v4339_v42  ;;  %v4390_v43 = vmul.f32 %v3387_v0, %v4337_v27  ;;  %v4523_v29 = vld [vmem:[%s3923_s30 + $0x8] sm:$0xff] }
 0x1ca   : > { %6070 = vst [vmem:[#allocation42_spill] sm:$0xff] %v4359_v26  ;;  %6071 = vst [vmem:[#allocation43_spill] sm:$0xff] %v4365_v21  ;;  %v4393_v32 = vmul.f32 %v3389_v2, %v4339_v42 }
 0x1cb   : > { %6072 = vst [vmem:[#allocation44_spill] sm:$0xff] %v4369_v9  ;;  %6073 = vst [vmem:[#allocation45_spill] sm:$0xff] %v4373_v17 }
 0x1cc   : > { %6074 = vst [vmem:[#allocation46_spill] sm:$0xff] %v4376_v36  ;;  %6075 = vst [vmem:[#allocation47_spill] sm:$0xff] %v4380_v8  ;;  %v4397_v58 = vpop.permute.xlu1 %791 }
 0x1cd   : > { %6076 = vst [vmem:[#allocation48_spill] sm:$0xff] %v4384_v23  ;;  %6077 = vst [vmem:[#allocation49_spill] sm:$0xff] %v4387_v19 }
 0x1ce   : > { %6078 = vst [vmem:[#allocation50_spill] sm:$0xff] %v4390_v43  ;;  %6079 = vst [vmem:[#allocation51_spill] sm:$0xff] %v4393_v32 }
 0x1cf   : > { %6092 = vst [vmem:[#allocation64_spill] sm:$0xff] %v4523_v29 }
 0x1d0   : > { %v3413_v54 = vpop.eup %3412 }
 0x1d1   : > { %v695_v55 = vmul.f32 %v3413_v54, %v689_v46 }
 0x1d3   : > { %v698_v31 = vsub.f32 2.0, %v695_v55 }
 0x1d5   : > { %v4399_v30 = vmul.f32 %v3413_v54, %v698_v31 }
 0x1d7   : > { %6080 = vst [vmem:[#allocation52_spill] sm:$0xff] %v4399_v30  ;;  %v4402_v6 = vmul.f32 %v3395_v3, %v4399_v30  ;;  %v4405_v20 = vmul.f32 %v3397_v4, %v4399_v30  ;;  %v4408_v0 = vmul.f32 %v3399_v50, %v4399_v30  ;;  %v4411_v2 = vmul.f32 %v3401_v18, %v4399_v30  ;;  %v4422_v3 = vpop.permute.xlu1 %810 }
 0x1d8   : > { %v4414_v11 = vmul.f32 %v3403_v61, %v4399_v30  ;;  %v4417_v28 = vmul.f32 %v3409_v22, %v4399_v30  ;;  %v4420_v46 = vmul.f32 %v3411_v33, %v4399_v30  ;;  %v3632_v33 = vmov 19  }
 0x1d9   : > { %6081 = vst [vmem:[#allocation53_spill] sm:$0xff] %v4402_v6  ;;  %6082 = vst [vmem:[#allocation54_spill] sm:$0xff] %v4405_v20 }
 0x1da   : > { %6083 = vst [vmem:[#allocation55_spill] sm:$0xff] %v4408_v0  ;;  %6084 = vst [vmem:[#allocation56_spill] sm:$0xff] %v4411_v2  ;;  %v3638_v0 = vmov 24  }
 0x1db   : > { %6085 = vst [vmem:[#allocation57_spill] sm:$0xff] %v4414_v11  ;;  %6086 = vst [vmem:[#allocation58_spill] sm:$0xff] %v4417_v28  ;;  %v4424_v54 = vpop.permute.xlu1 %812 }
 0x1dc   : > { %6087 = vst [vmem:[#allocation59_spill] sm:$0xff] %v4420_v46 }
 0x1e5   : > { %v826_v4 = vpop.permute.xlu1 %825 }
 0x1e6   : > { %v829_v50 = vmul.f32 %v826_v4, %v4040_v57  ;;  %v828_v55 = vmul.f32 %v826_v4, %v4019_v49  ;;  %v830_v18 = vmul.f32 %v826_v4, %v4030_v52  ;;  %v3633_v4 = vmov 92  }
 0x1e8   : > { %836 = vrot.lane.b32.xlu1 %v829_v50, %s3629_s24  ;;  %834 = vrot.lane.b32.xlu0 %v828_v55, %s3629_s24  ;;  %v3634_v55 = vmov 20  }
 0x1e9   : > { %3222 = vset.pattern.permute.xlu0 %v3634_v55 }
 0x1ec   : > { %849 = vperm.xlu1 %3219, %v3967_v16   ;;  %838 = vrot.lane.b32.xlu0 %v830_v18, %s3629_s24 }
 0x1f0   : > { %3220 = vset.pattern.permute.xlu1 %v3632_v33 }
 0x25a   : > { %v4433_v61 = vpop.permute.xlu1 %836 }
 0x26b   : > { %v850_v22 = vpop.permute.xlu1 %849 }
 0x26c   : > { %v853_v31 = vmul.f32 %v850_v22, %v3950_v14  ;;  %v852_v46 = vmul.f32 %v850_v22, %v3940_v12  ;;  %v854_v50 = vmul.f32 %v850_v22, %v3961_v15  ;;  %v3636_v22 = vmov 22  }
 0x26e   : > { %860 = vrot.lane.b32.xlu1 %v853_v31, %s3609_s12  ;;  %858 = vrot.lane.b32.xlu0 %v852_v46, %s3609_s12  ;;  %v3635_v46 = vmov 21  }
 0x272   : > { %873 = vperm.xlu1 %3220, %v3967_v16   ;;  %862 = vrot.lane.b32.xlu0 %v854_v50, %s3609_s12 }
 0x276   : > { %3221 = vset.pattern.permute.xlu1 %v3633_v4 }
 0x2e0   : > { %v4442_v18 = vpop.permute.xlu1 %860 }
 0x2f1   : > { %v874_v33 = vpop.permute.xlu1 %873 }
 0x2f2   : > { %v877_v32 = vmul.f32 %v874_v33, %v4051_v60  ;;  %v876_v43 = vmul.f32 %v874_v33, %v4033_v56  ;;  %v878_v15 = vmul.f32 %v874_v33, %v4048_v59  ;;  %v3637_v33 = vmov 23  }
 0x2f4   : > { %884 = vrot.lane.b32.xlu1 %v877_v32, %s3630_s21  ;;  %882 = vrot.lane.b32.xlu0 %v876_v43, %s3630_s21 }
 0x2f8   : > { %897 = vperm.xlu1 %3221, %v3967_v16   ;;  %886 = vrot.lane.b32.xlu0 %v878_v15, %s3630_s21  ;;  %v4464_v15 = vpop.permute.xlu0 %719 }
 0x2fc   : > { %3223 = vset.pattern.permute.xlu1 %v3635_v46  ;;  %930 = vperm.xlu0 %3222, %v3967_v16   ;;  %v4466_v46 = vpop.permute.xlu0 %723 }
 0x2fd   : > { %937 = vperm.xlu1 %3223, %v3967_v16  }
 0x300   : > { %3224 = vset.pattern.permute.xlu0 %v3636_v22  ;;  %v4468_v22 = vpop.permute.xlu0 %743 }
 0x301   : > { %3225 = vset.pattern.permute.xlu1 %v3637_v33 }
 0x366   : > { %v4453_v31 = vpop.permute.xlu1 %884 }
 0x367   : > { %6088 = vst [vmem:[#allocation60_spill] sm:$0xff] %v4453_v31 }
 0x377   : > { %v4455_v50 = vpop.permute.xlu1 %897 }
 0x378   : > { %6089 = vst [vmem:[#allocation61_spill] sm:$0xff] %v4455_v50 }
 0x37c   : > { %v938_v32 = vpop.permute.xlu1 %937 }
 0x37d   : > { %v940_v43 = vmul.f32 %v938_v32, %v3943_v13  ;;  %v941_v4 = vmul.f32 %v938_v32, %v3940_v12  ;;  %v942_v55 = vmul.f32 %v938_v32, %v3950_v14  ;;  %v4470_v13 = vpop.permute.xlu0 %747 }
 0x37f   : > { %946 = vrot.lane.b32.xlu1 %v940_v43, %s3605_s23  ;;  %948 = vrot.lane.b32.xlu0 %v941_v4, %s3605_s23 }
 0x381   : > { %v4472_v12 = vpop.permute.xlu0 %767 }
 0x383   : > { %950 = vrot.lane.b32.xlu1 %v942_v55, %s3605_s23  ;;  %961 = vperm.xlu0 %3224, %v3967_v16  }
 0x385   : > { %v4474_v43 = vpop.permute.xlu0 %771 }
 0x389   : > { %v4476_v4 = vpop.permute.xlu0 %789 }
 0x38d   : > { %v4478_v14 = vpop.permute.xlu0 %814 }
 0x391   : > { %v4480_v32 = vpop.permute.xlu0 %834 }
 0x395   : > { %v4482_v55 = vpop.permute.xlu0 %838 }
 0x399   : > { %v4484_v33 = vpop.permute.xlu0 %858 }
 0x39d   : > { %v4486_v28 = vpop.permute.xlu0 %862 }
 0x3a1   : > { %v4488_v19 = vpop.permute.xlu0 %882 }
 0x3a2   : > { %6090 = vst [vmem:[#allocation62_spill] sm:$0xff] %v4488_v19 }
 0x3a5   : > { %v4490_v11 = vpop.permute.xlu0 %886 }
 0x3a6   : > { %6091 = vst [vmem:[#allocation63_spill] sm:$0xff] %v4490_v11 }
 0x3a9   : > { %v4492_v23 = vpop.permute.xlu0 %930 }
 0x3f1   : > { %v4494_v8 = vpop.permute.xlu0 %948  ;;  %v4503_v21 = vpop.permute.xlu1 %946 }
 0x3f5   : > { %v4505_v26 = vpop.permute.xlu1 %950 }
 0x402   : > { %v962_v36 = vpop.permute.xlu0 %961 }
 0x403   : > { %v966_v2 = vmul.f32 %v962_v36, %v3996_v38  ;;  %v964_v17 = vmul.f32 %v962_v36, %v3989_v35  ;;  %v965_v9 = vmul.f32 %v962_v36, %v4060_v63 }
 0x405   : > { %974 = vrot.lane.b32.xlu0 %v966_v2, %s3626_s8  ;;  %970 = vrot.lane.b32.xlu1 %v964_v17, %s3626_s8 }
 0x409   : > { %972 = vrot.lane.b32.xlu1 %v965_v9, %s3626_s8  ;;  %v4516_v9 = vld [vmem:[#allocation8] sm:$0xff] }
 0x40d   : > { %985 = vperm.xlu1 %3225, %v3967_v16  }
 0x411   : > { %3226 = vset.pattern.permute.xlu1 %v3638_v0  ;;  %v3639_v0 = vmov 25  }
 0x412   : > { %3227 = vset.pattern.permute.xlu0 %v3639_v0 }
 0x477   : > { %v4507_v20 = vpop.permute.xlu1 %970 }
 0x47b   : > { %v4509_v7 = vpop.permute.xlu1 %972 }
 0x48c   : > { %v986_v2 = vpop.permute.xlu1 %985 }
 0x48d   : > { %v989_v17 = vmul.f32 %v986_v2, %v4027_v51  ;;  %v988_v36 = vmul.f32 %v986_v2, %v4001_v41  ;;  %v990_v16 = vmul.f32 %v986_v2, %v4006_v44  ;;  %v3640_v2 = vmov 26  }
 0x48f   : > { %996 = vrot.lane.b32.xlu1 %v989_v17, %s3627_s28  ;;  %994 = vrot.lane.b32.xlu0 %v988_v36, %s3627_s28  ;;  %v4527_v17 = vld [vmem:[%s3923_s30 + $0x10] sm:$0xff] }
 0x490   : > { %6093 = vst [vmem:[#allocation65_spill] sm:$0xff] %v4527_v17 }
 0x493   : > { %1009 = vperm.xlu1 %3226, %v4516_v9   ;;  %998 = vrot.lane.b32.xlu0 %v990_v16, %s3627_s28  ;;  %v4533_v16 = vpop.permute.xlu0 %974 }
 0x497   : > { %3228 = vset.pattern.permute.xlu1 %v3640_v2 }
 0x501   : > { %v4520_v48 = vpop.permute.xlu1 %996  ;;  %v4535_v0 = vpop.permute.xlu0 %994 }
 0x505   : > { %v4537_v25 = vpop.permute.xlu0 %998 }
 0x512   : > { %v1010_v6 = vpop.permute.xlu1 %1009 }
 0x513   : > { %v1012_v34 = vmul.f32 %v4523_v29, %v1010_v6  ;;  %v1013_v36 = vmul.f32 %v4527_v17, %v1010_v6 }
 0x515   : > { %1018 = vrot.lane.b32.xlu1 %v1013_v36, %s3604_s27  ;;  %1016 = vrot.lane.b32.xlu0 %v1012_v34, %s3604_s27  ;;  %v3641_v36 = vmov 27  }
 0x519   : > { %1028 = vperm.xlu0 %3227, %v4516_v9  }
 0x587   : > { %v4539_v62 = vpop.permute.xlu0 %1016  ;;  %v4548_v2 = vpop.permute.xlu1 %1018 }
 0x598   : > { %v1029_v30 = vpop.permute.xlu0 %1028 }
 0x599   : > { %v1031_v24 = vmul.f32 %v1029_v30, %v4009_v45  ;;  %v1033_v6 = vmul.f32 %v1029_v30, %v4016_v47  ;;  %v1032_v34 = vmul.f32 %v1029_v30, %v4065_v1 }
 0x59b   : > { %1041 = vrot.lane.b32.xlu0 %v1033_v6, %s3628_s9  ;;  %1037 = vrot.lane.b32.xlu1 %v1031_v24, %s3628_s9 }
 0x59f   : > { %1039 = vrot.lane.b32.xlu1 %v1032_v34, %s3628_s9  ;;  %v3642_v34 = vmov 28  }
 0x5a3   : > { %1052 = vperm.xlu1 %3228, %v4516_v9  }
 0x5a7   : > { %3229 = vset.pattern.permute.xlu1 %v3641_v36 }
 0x60d   : > { %v4550_v42 = vpop.permute.xlu1 %1037 }
 0x611   : > { %v4552_v53 = vpop.permute.xlu1 %1039 }
 0x622   : > { %v1053_v27 = vpop.permute.xlu1 %1052 }
 0x623   : > { %v1056_v6 = vmul.f32 %v1053_v27, %v4040_v57  ;;  %v1055_v24 = vmul.f32 %v1053_v27, %v4019_v49  ;;  %v1057_v30 = vmul.f32 %v1053_v27, %v4030_v52 }
 0x625   : > { %1063 = vrot.lane.b32.xlu1 %v1056_v6, %s3629_s24  ;;  %1061 = vrot.lane.b32.xlu0 %v1055_v24, %s3629_s24  ;;  %v4568_v6 = vld [vmem:[%s3923_s30 + $0x18] sm:$0xff]  ;;  %v3643_v24 = vmov 93  }
 0x626   : > { %6095 = vst [vmem:[#allocation67_spill] sm:$0xff] %v4568_v6 }
 0x629   : > { %1076 = vperm.xlu1 %3229, %v4516_v9   ;;  %1065 = vrot.lane.b32.xlu0 %v1057_v30, %s3629_s24  ;;  %v3644_v30 = vmov 29  }
 0x62a   : > { %3232 = vset.pattern.permute.xlu0 %v3644_v30 }
 0x62d   : > { %3230 = vset.pattern.permute.xlu1 %v3642_v34 }
 0x697   : > { %v4561_v36 = vpop.permute.xlu1 %1063 }
 0x698   : > { %6094 = vst [vmem:[#allocation66_spill] sm:$0xff] %v4561_v36 }
 0x6a8   : > { %v1077_v50 = vpop.permute.xlu1 %1076 }
 0x6a9   : > { %v1080_v11 = vmul.f32 %v4527_v17, %v1077_v50  ;;  %v1079_v19 = vmul.f32 %v4523_v29, %v1077_v50  ;;  %v1081_v27 = vmul.f32 %v4568_v6, %v1077_v50  ;;  %v4582_v50 = vld [vmem:[#allocation8] sm:$0xff] }
 0x6ab   : > { %1087 = vrot.lane.b32.xlu1 %v1080_v11, %s3609_s12  ;;  %1085 = vrot.lane.b32.xlu0 %v1079_v19, %s3609_s12 }
 0x6af   : > { %1100 = vperm.xlu1 %3230, %v4516_v9   ;;  %1089 = vrot.lane.b32.xlu0 %v1081_v27, %s3609_s12  ;;  %v3645_v27 = vmov 30  }
 0x6b3   : > { %3231 = vset.pattern.permute.xlu1 %v3643_v24  ;;  %v3646_v24 = vmov 31  }
 0x71d   : > { %v4573_v34 = vpop.permute.xlu1 %1087 }
 0x71e   : > { %6096 = vst [vmem:[#allocation68_spill] sm:$0xff] %v4573_v34 }
 0x72e   : > { %v1101_v36 = vpop.permute.xlu1 %1100 }
 0x72f   : > { %v1103_v31 = vmul.f32 %v1101_v36, %v4033_v56  ;;  %v1104_v11 = vmul.f32 %v1101_v36, %v4051_v60  ;;  %v1105_v19 = vmul.f32 %v1101_v36, %v4048_v59  ;;  %v4591_v36 = vld [vmem:[%s3923_s30] sm:$0xff]  ;;  %v4600_v59 = vpop.permute.xlu0 %1041 }
 0x730   : > { %6099 = vst [vmem:[#allocation71_spill] sm:$0xff] %v4591_v36 }
 0x731   : > { %1111 = vrot.lane.b32.xlu1 %v1104_v11, %s3630_s21  ;;  %1109 = vrot.lane.b32.xlu0 %v1103_v31, %s3630_s21 }
 0x733   : > { %v4602_v60 = vpop.permute.xlu0 %1061 }
 0x735   : > { %1124 = vperm.xlu1 %3231, %v4516_v9   ;;  %1113 = vrot.lane.b32.xlu0 %v1105_v19, %s3630_s21 }
 0x737   : > { %v4604_v56 = vpop.permute.xlu0 %1065 }
 0x738   : > { %6100 = vst [vmem:[#allocation72_spill] sm:$0xff] %v4604_v56 }
 0x739   : > { %3233 = vset.pattern.permute.xlu1 %v3645_v27  ;;  %1157 = vperm.xlu0 %3232, %v4582_v50  }
 0x73a   : > { %1164 = vperm.xlu1 %3233, %v4582_v50  }
 0x73d   : > { %3234 = vset.pattern.permute.xlu0 %v3646_v24  ;;  %v3647_v24 = vmov 32  }
 0x73e   : > { %3235 = vset.pattern.permute.xlu1 %v3647_v24 }
 0x7a3   : > { %v4586_v30 = vpop.permute.xlu1 %1111 }
 0x7a4   : > { %6097 = vst [vmem:[#allocation69_spill] sm:$0xff] %v4586_v30 }
 0x7b4   : > { %v4588_v11 = vpop.permute.xlu1 %1124 }
 0x7b5   : > { %6098 = vst [vmem:[#allocation70_spill] sm:$0xff] %v4588_v11 }
 0x7b9   : > { %v1165_v31 = vpop.permute.xlu1 %1164 }
 0x7ba   : > { %v1167_v9 = vmul.f32 %v4591_v36, %v1165_v31  ;;  %v1168_v19 = vmul.f32 %v4523_v29, %v1165_v31  ;;  %v1169_v27 = vmul.f32 %v4527_v17, %v1165_v31  ;;  %v4606_v36 = vpop.permute.xlu0 %1085 }
 0x7bc   : > { %1173 = vrot.lane.b32.xlu1 %v1167_v9, %s3605_s23  ;;  %1175 = vrot.lane.b32.xlu0 %v1168_v19, %s3605_s23 }
 0x7be   : > { %v4608_v11 = vpop.permute.xlu0 %1089 }
 0x7bf   : > { %6101 = vst [vmem:[#allocation73_spill] sm:$0xff] %v4608_v11 }
 0x7c0   : > { %1177 = vrot.lane.b32.xlu1 %v1169_v27, %s3605_s23  ;;  %1188 = vperm.xlu0 %3234, %v4582_v50  }
 0x7c2   : > { %v4610_v9 = vpop.permute.xlu0 %1109 }
 0x7c6   : > { %v4612_v19 = vpop.permute.xlu0 %1113 }
 0x7c7   : > { %6102 = vst [vmem:[#allocation74_spill] sm:$0xff] %v4612_v19  ;;  %v3648_v19 = vmov 33  }
 0x7ca   : > { %v4614_v31 = vpop.permute.xlu0 %1157 }
 0x7cb   : > { %6103 = vst [vmem:[#allocation75_spill] sm:$0xff] %v4614_v31 }
 0x82e   : > { %v4616_v27 = vpop.permute.xlu0 %1175  ;;  %v4625_v31 = vpop.permute.xlu1 %1173 }
 0x82f   : > { %6104 = vst [vmem:[#allocation76_spill] sm:$0xff] %v4616_v27 }
 0x832   : > { %v4627_v27 = vpop.permute.xlu1 %1177 }
 0x83f   : > { %v1189_v30 = vpop.permute.xlu0 %1188 }
 0x840   : > { %v1191_v24 = vmul.f32 %v1189_v30, %v3989_v35  ;;  %v1193_v34 = vmul.f32 %v1189_v30, %v3996_v38  ;;  %v1192_v56 = vmul.f32 %v1189_v30, %v4060_v63  ;;  %v3649_v30 = vmov 34  }
 0x841   : > { %3237 = vset.pattern.permute.xlu0 %v3649_v30 }
 0x842   : > { %1201 = vrot.lane.b32.xlu0 %v1193_v34, %s3626_s8  ;;  %1197 = vrot.lane.b32.xlu1 %v1191_v24, %s3626_s8 }
 0x846   : > { %1199 = vrot.lane.b32.xlu1 %v1192_v56, %s3626_s8 }
 0x84a   : > { %1212 = vperm.xlu1 %3235, %v4582_v50  }
 0x84e   : > { %3236 = vset.pattern.permute.xlu1 %v3648_v19 }
 0x8b4   : > { %v4629_v11 = vpop.permute.xlu1 %1197 }
 0x8b5   : > { %6105 = vst [vmem:[#allocation77_spill] sm:$0xff] %v4629_v11 }
 0x8b8   : > { %v4631_v35 = vpop.permute.xlu1 %1199 }
 0x8c9   : > { %v1213_v38 = vpop.permute.xlu1 %1212 }
 0x8ca   : > { %v1215_v34 = vmul.f32 %v1213_v38, %v4001_v41  ;;  %v1216_v24 = vmul.f32 %v1213_v38, %v4027_v51  ;;  %v1217_v56 = vmul.f32 %v1213_v38, %v4006_v44  ;;  %v3650_v38 = vmov 35  }
 0x8cc   : > { %1223 = vrot.lane.b32.xlu1 %v1216_v24, %s3627_s28  ;;  %1221 = vrot.lane.b32.xlu0 %v1215_v34, %s3627_s28  ;;  %v4647_v34 = vpop.permute.xlu0 %1201 }
 0x8d0   : > { %1236 = vperm.xlu1 %3236, %v4582_v50   ;;  %1225 = vrot.lane.b32.xlu0 %v1217_v56, %s3627_s28 }
 0x8d4   : > { %3238 = vset.pattern.permute.xlu1 %v3650_v38 }
 0x93e   : > { %v4640_v19 = vpop.permute.xlu1 %1223  ;;  %v4649_v24 = vpop.permute.xlu0 %1221 }
 0x942   : > { %v4651_v56 = vpop.permute.xlu0 %1225 }
 0x943   : > { %6106 = vst [vmem:[#allocation78_spill] sm:$0xff] %v4651_v56 }
 0x94f   : > { %v1237_v63 = vpop.permute.xlu1 %1236 }
 0x950   : > { %v1239_v11 = vmul.f32 %v4523_v29, %v1237_v63  ;;  %v1240_v41 = vmul.f32 %v4527_v17, %v1237_v63 }
 0x952   : > { %1245 = vrot.lane.b32.xlu1 %v1240_v41, %s3604_s27  ;;  %1243 = vrot.lane.b32.xlu0 %v1239_v11, %s3604_s27  ;;  %v3651_v11 = vmov 36  }
 0x956   : > { %1255 = vperm.xlu0 %3237, %v4582_v50  }
 0x9c4   : > { %v4653_v30 = vpop.permute.xlu0 %1243  ;;  %v4662_v38 = vpop.permute.xlu1 %1245 }
 0x9c5   : > { %6107 = vst [vmem:[#allocation79_spill] sm:$0xff] %v4653_v30 }
 0x9d5   : > { %v1256_v44 = vpop.permute.xlu0 %1255 }
 0x9d6   : > { %v1258_v51 = vmul.f32 %v1256_v44, %v4009_v45  ;;  %v1260_v63 = vmul.f32 %v1256_v44, %v4016_v47  ;;  %v1259_v41 = vmul.f32 %v1256_v44, %v4065_v1 }
 0x9d8   : > { %1268 = vrot.lane.b32.xlu0 %v1260_v63, %s3628_s9  ;;  %1264 = vrot.lane.b32.xlu1 %v1258_v51, %s3628_s9  ;;  %v3652_v51 = vmov 37  }
 0x9dc   : > { %1266 = vrot.lane.b32.xlu1 %v1259_v41, %s3628_s9 }
 0x9e0   : > { %1279 = vperm.xlu1 %3238, %v4582_v50  }
 0x9e4   : > { %3239 = vset.pattern.permute.xlu1 %v3651_v11 }
 0xa4a   : > { %v4664_v30 = vpop.permute.xlu1 %1264 }
 0xa4e   : > { %v4666_v56 = vpop.permute.xlu1 %1266 }
 0xa5f   : > { %v1280_v45 = vpop.permute.xlu1 %1279 }
 0xa60   : > { %v1282_v47 = vmul.f32 %v1280_v45, %v4019_v49  ;;  %v1283_v63 = vmul.f32 %v1280_v45, %v4040_v57  ;;  %v1284_v44 = vmul.f32 %v1280_v45, %v4030_v52  ;;  %v3653_v45 = vmov 94   ;;  %v6109_v52 = vld [vmem:[#allocation29_spill] sm:$0xff] }
 0xa62   : > { %1290 = vrot.lane.b32.xlu1 %v1283_v63, %s3629_s24  ;;  %1288 = vrot.lane.b32.xlu0 %v1282_v47, %s3629_s24  ;;  %v725_v63 = vsel %vm321_vm0, %v4464_v15, %v4335_v10 }
 0xa66   : > { %1303 = vperm.xlu1 %3239, %v4582_v50   ;;  %1292 = vrot.lane.b32.xlu0 %v1284_v44, %s3629_s24  ;;  %v6108_v44 = vld [vmem:[#allocation28_spill] sm:$0xff] }
 0xa6a   : > { %3240 = vset.pattern.permute.xlu1 %v3652_v51  ;;  %v706_v51 = vmul.f32 %v6108_v44, %v4145_v39 }
 0xad4   : > { %v4675_v41 = vpop.permute.xlu1 %1290 }
 0xae5   : > { %v1304_v11 = vpop.permute.xlu1 %1303 }
 0xae6   : > { %v1306_v1 = vmul.f32 %v4523_v29, %v1304_v11  ;;  %v1307_v49 = vmul.f32 %v4527_v17, %v1304_v11  ;;  %v1308_v47 = vmul.f32 %v4568_v6, %v1304_v11  ;;  %v707_v11 = vmul.f32 %v6108_v44, %v4148_v40 }
 0xae7   : > { %v750_v6 = vsel %vm394_vm6, %v4361_v5, %v4470_v13  ;;  %v773_v17 = vsel %vm412_vm7, %v4472_v12, %v4395_v37  ;;  %v952_v12 = vsel %vm321_vm0, %v4503_v21, %v4494_v8  ;;  %v977_v21 = vsel %vm394_vm6, %v4509_v7, %v4533_v16 }
 0xae8   : > { %1314 = vrot.lane.b32.xlu1 %v1307_v49, %s3609_s12  ;;  %1312 = vrot.lane.b32.xlu0 %v1306_v1, %s3609_s12  ;;  %v708_v49 = vmul.f32 %v6108_v44, %v6109_v52  ;;  %v726_v1 = vsel %vm321_vm0, %v4335_v10, %v4466_v46  ;;  %v774_v44 = vsel %vm412_vm7, %v4395_v37, %v4474_v43 }
 0xae9   : > { %v731_v57 = vadd.f32 %v726_v1, %v707_v11  ;;  %v935_v11 = vmul.f32 %v4492_v23, %v6109_v52 }
 0xaea   : > { %v732_v15 = vadd.f32 %v4466_v46, %v708_v49 }
 0xaec   : > { %1327 = vperm.xlu1 %3240, %v4582_v50   ;;  %1316 = vrot.lane.b32.xlu0 %v1308_v47, %s3609_s12  ;;  %v749_v47 = vsel %vm394_vm6, %v4468_v22, %v4361_v5  ;;  %v756_v29 = vadd.f32 %v4470_v13, %v732_v15  ;;  %v755_v22 = vadd.f32 %v750_v6, %v731_v57 }
 0xaed   : > { %v793_v5 = vsel %vm288_vm5, %v4476_v4, %v4397_v58  ;;  %v953_v13 = vsel %vm321_vm0, %v4494_v8, %v4505_v26  ;;  %v933_v57 = vmul.f32 %v4492_v23, %v4145_v39  ;;  %v816_v8 = vsel %vm441_vm8, %v4422_v3, %v4424_v54 }
 0xaee   : > { %v780_v46 = vadd.f32 %v4474_v43, %v756_v29  ;;  %v934_v29 = vmul.f32 %v4492_v23, %v4148_v40  ;;  %v841_v23 = vsel %vm459_vm9, %v4433_v61, %v4482_v55 }
 0xaef   : > { %v957_v6 = vadd.f32 %v952_v12, %v933_v57 }
 0xaf0   : > { %3251 = vset.pattern.permute.xlu1 %v3653_v45  ;;  %v730_v45 = vadd.f32 %v725_v63, %v706_v51  ;;  %v779_v51 = vadd.f32 %v774_v44, %v755_v22  ;;  %v799_v43 = vadd.f32 %v4397_v58, %v780_v46  ;;  %v958_v1 = vadd.f32 %v953_v13, %v934_v29 }
 0xaf1   : > { %v865_v46 = vsel %vm477_vm10, %v4442_v18, %v4486_v28  ;;  %v6112_v28 = vld [vmem:[#allocation66_spill] sm:$0xff] }
 0xaf2   : > { %v754_v10 = vadd.f32 %v749_v47, %v730_v45  ;;  %v798_v37 = vadd.f32 %v793_v5, %v779_v51  ;;  %v982_v45 = vadd.f32 %v977_v21, %v958_v1  ;;  %v6110_v5 = vld [vmem:[#allocation60_spill] sm:$0xff] }
 0xaf4   : > { %v778_v63 = vadd.f32 %v773_v17, %v754_v10  ;;  %v817_v17 = vsel %vm441_vm8, %v4424_v54, %v4478_v14  ;;  %v822_v47 = vadd.f32 %v816_v8, %v798_v37  ;;  %v840_v54 = vsel %vm459_vm9, %v4480_v32, %v4433_v61  ;;  %v6113_v8 = vld [vmem:[#allocation68_spill] sm:$0xff] }
 0xaf5   : > { %v823_v15 = vadd.f32 %v817_v17, %v799_v43  ;;  %v864_v10 = vsel %vm477_vm10, %v4484_v33, %v4442_v18  ;;  %v1067_v18 = vsel %vm459_vm9, %v4602_v60, %v6112_v28  ;;  %v1044_v43 = vsel %vm441_vm8, %v4552_v53, %v4600_v59  ;;  %v6114_v17 = vld [vmem:[#allocation63_spill] sm:$0xff] }
 0xaf6   : > { %v797_v49 = vadd.f32 %v4476_v4, %v778_v63  ;;  %v976_v4 = vsel %vm394_vm6, %v4507_v20, %v4509_v7  ;;  %v1000_v20 = vsel %vm412_vm7, %v4535_v0, %v4520_v48  ;;  %v1001_v7 = vsel %vm412_vm7, %v4520_v48, %v4537_v25 }
 0xaf7   : > { %v981_v14 = vadd.f32 %v976_v4, %v957_v6  ;;  %v1020_v0 = vsel %vm288_vm5, %v4539_v62, %v4548_v2  ;;  %v1006_v22 = vadd.f32 %v1001_v7, %v982_v45  ;;  %v846_v63 = vadd.f32 %v840_v54, %v822_v47  ;;  %v6117_v7 = vld [vmem:[#allocation69_spill] sm:$0xff] }
 0xaf8   : > { %v821_v58 = vadd.f32 %v4422_v3, %v797_v49  ;;  %v959_v3 = vadd.f32 %v4505_v26, %v935_v11  ;;  %v1043_v26 = vsel %vm441_vm8, %v4550_v42, %v4552_v53  ;;  %v847_v55 = vadd.f32 %v841_v23, %v823_v15  ;;  %v6116_v53 = vld [vmem:[#allocation61_spill] sm:$0xff] }
 0xaf9   : > { %v1005_v44 = vadd.f32 %v1000_v20, %v981_v14  ;;  %v1025_v12 = vadd.f32 %v1020_v0, %v1006_v22  ;;  %v870_v37 = vadd.f32 %v864_v10, %v846_v63  ;;  %v889_v6 = vsel %vm495_vm11, %v6110_v5, %v6114_v17  ;;  %v6118_v45 = vld [vmem:[#allocation73_spill] sm:$0xff] }
 0xafa   : > { %v845_v48 = vadd.f32 %v4480_v32, %v821_v58  ;;  %v983_v61 = vadd.f32 %v4533_v16, %v959_v3  ;;  %v6111_v32 = vld [vmem:[#allocation62_spill] sm:$0xff]  ;;  %v871_v16 = vadd.f32 %v865_v46, %v847_v55  ;;  %v6115_v58 = vld [vmem:[#allocation72_spill] sm:$0xff]  ;;  %v1115_v47 = vsel %vm495_vm11, %v4610_v9, %v6117_v7 }
 0xafb   : > { %v888_v51 = vsel %vm495_vm11, %v6111_v32, %v6110_v5  ;;  %v1024_v49 = vadd.f32 %v4539_v62, %v1005_v44  ;;  %v1049_v4 = vadd.f32 %v1043_v26, %v1025_v12  ;;  %v1068_v59 = vsel %vm459_vm9, %v6112_v28, %v6115_v58  ;;  %v6121_v5 = vld [vmem:[#allocation36_spill] sm:$0xff] }
 0xafc   : > { %v869_v13 = vadd.f32 %v4484_v33, %v845_v48  ;;  %v1007_v57 = vadd.f32 %v4537_v25, %v983_v61  ;;  %v894_v21 = vadd.f32 %v888_v51, %v870_v37  ;;  %v1091_v25 = vsel %vm477_vm10, %v4606_v36, %v6113_v8  ;;  %v6119_v48 = vld [vmem:[#allocation74_spill] sm:$0xff] }
 0xafd   : > { %v1048_v29 = vadd.f32 %v4550_v42, %v1024_v49  ;;  %v1073_v1 = vadd.f32 %v1067_v18, %v1049_v4  ;;  %v895_v15 = vadd.f32 %v889_v6, %v871_v16  ;;  %v1116_v10 = vsel %vm495_vm11, %v6117_v7, %v6119_v48  ;;  %v6120_v61 = vld [vmem:[#allocation70_spill] sm:$0xff]  ;;  %v6124_v49 = vld [vmem:[#allocation33_spill] sm:$0xff]  ;;  %v6131_v7 = vld [vmem:[#allocation35_spill] sm:$0xff] }
 0xafe   : > { %v893_v62 = vadd.f32 %v6111_v32, %v869_v13  ;;  %v1026_v33 = vadd.f32 %v4548_v2, %v1007_v57  ;;  %v901_v20 = vadd.f32 %v6116_v53, %v894_v21  ;;  %v6122_v32 = vld [vmem:[#allocation32_spill] sm:$0xff]  ;;  %v6125_v4 = vld [vmem:[#allocation22_spill] sm:$0xff]  ;;  %v6126_v21 = vld [vmem:[#allocation25_spill] sm:$0xff] }
 0xaff   : > { %v1072_v42 = vadd.f32 %v4602_v60, %v1048_v29  ;;  %v1097_v14 = vadd.f32 %v1091_v25, %v1073_v1  ;;  %v1092_v60 = vsel %vm477_vm10, %v6113_v8, %v6118_v45  ;;  %v902_v44 = vadd.f32 %v6116_v53, %v895_v15  ;;  %v6127_v8 = vld [vmem:[#allocation52_spill] sm:$0xff]  ;;  %v6128_v25 = vld [vmem:[#allocation34_spill] sm:$0xff]  ;;  %v6130_v1 = vld [vmem:[#allocation31_spill] sm:$0xff] }
 0xb00   : > { %v900_v11 = vadd.f32 %v6116_v53, %v893_v62  ;;  %v1050_v2 = vadd.f32 %v1044_v43, %v1026_v33  ;;  %v904_v63 = vmax.f32 %v901_v20, 0.0  ;;  %v906_v51 = vmul.f32 %v6122_v32, %v6121_v5  ;;  %v6129_v6 = vld [vmem:[#allocation30_spill] sm:$0xff]  ;;  %v6132_v45 = vld [vmem:[#allocation24_spill] sm:$0xff] }
 0xb01   : > { %v1096_v54 = vadd.f32 %v4606_v36, %v1072_v42  ;;  %v1121_v0 = vadd.f32 %v1115_v47, %v1097_v14  ;;  %v905_v37 = vmax.f32 %v902_v44, 0.0  ;;  %v908_v17 = vmul.f32 %v6128_v25, %v6127_v8  ;;  %v6136_v25 = vld [vmem:[#allocation78_spill] sm:$0xff] }
 0xb02   : > { %v1074_v23 = vadd.f32 %v1068_v59, %v1050_v2  ;;  %v903_v22 = vmax.f32 %v900_v11, 0.0  ;;  %v1133_v42 = vmul.f32 %v6129_v6, %v6121_v5  ;;  %v1135_v47 = vmul.f32 %v6131_v7, %v6127_v8  ;;  %v6134_v5 = vld [vmem:[#allocation75_spill] sm:$0xff] }
 0xb03   : > { %v1120_v3 = vadd.f32 %v4610_v9, %v1096_v54  ;;  %v1128_v55 = vadd.f32 %v6120_v61, %v1121_v0  ;;  %v6123_v9 = vld [vmem:[#allocation37_spill] sm:$0xff]  ;;  %v911_v59 = vmul.f32 %v908_v17, %v905_v37  ;;  %v3654_v15 = vmov 39  }
 0xb04   : > { %v1098_v46 = vadd.f32 %v1092_v60, %v1074_v23  ;;  %v907_v12 = vmul.f32 %v6124_v49, %v6123_v9  ;;  %v909_v57 = vmul.f32 %v906_v51, %v903_v22  ;;  %v1134_v58 = vmul.f32 %v6130_v1, %v6123_v9 }
 0xb05   : > { %v1127_v26 = vadd.f32 %v6120_v61, %v1120_v3  ;;  %v1131_v43 = vmax.f32 %v1128_v55, 0.0  ;;  %v3655_v23 = vmov 38   ;;  %v1269_v3 = vpop.permute.xlu0 %1268  ;;  %v1160_v32 = vmul.f32 %v6134_v5, %v4145_v39 }
 0xb06   : > { %v1122_v13 = vadd.f32 %v1116_v10, %v1098_v46  ;;  %v910_v28 = vmul.f32 %v907_v12, %v904_v63  ;;  %3257 = vset.pattern.permute.xlu0 %v3655_v23  ;;  %v1162_v51 = vmul.f32 %v6134_v5, %v6109_v52  ;;  %v1227_v8 = vsel %vm412_vm7, %v4649_v24, %v4640_v19 }
 0xb07   : > { %v1130_v29 = vmax.f32 %v1127_v26, 0.0  ;;  %v1137_v20 = vmul.f32 %v1134_v58, %v1131_v43  ;;  %v6133_v26 = vld [vmem:[#allocation76_spill] sm:$0xff]  ;;  %v1270_v7 = vsel %vm441_vm8, %v4664_v30, %v4666_v56 }
 0xb08   : > { %v1129_v18 = vadd.f32 %v6120_v61, %v1122_v13  ;;  %v3241_v2 = vpack.i.bf16 %v910_v28, %v909_v57  ;;  %v1179_v55 = vsel %vm321_vm0, %v4625_v31, %v6133_v26  ;;  %v1180_v9 = vsel %vm321_vm0, %v6133_v26, %v4627_v27  ;;  %v6135_v31 = vld [vmem:[#allocation77_spill] sm:$0xff] }
 0xb09   : > { %v1136_v11 = vmul.f32 %v1133_v42, %v1130_v29  ;;  %v1289_v0 = vpop.permute.xlu0 %1288  ;;  %v1161_v13 = vmul.f32 %v6134_v5, %v4148_v40  ;;  %v1184_v37 = vadd.f32 %v1179_v55, %v1160_v32  ;;  %v1186_v57 = vadd.f32 %v4627_v27, %v1162_v51 }
 0xb0a   : > { %v1132_v53 = vmax.f32 %v1129_v18, 0.0  ;;  %v1203_v18 = vsel %vm394_vm6, %v6135_v31, %v4631_v35  ;;  %v1228_v27 = vsel %vm412_vm7, %v4640_v19, %v6136_v25 }
 0xb0b   : > { %v3246_v14 = vpack.i.bf16 %v1137_v20, %v1136_v11  ;;  %v1208_v58 = vadd.f32 %v1203_v18, %v1184_v37  ;;  %v6137_v11 = vld [vmem:[#allocation79_spill] sm:$0xff] }
 0xb0c   : > { %v1138_v54 = vmul.f32 %v1135_v47, %v1132_v53  ;;  %v1247_v24 = vsel %vm288_vm5, %v6137_v11, %v4662_v38  ;;  %v1271_v47 = vsel %vm441_vm8, %v4666_v56, %v1269_v3 }
 0xb0d   : > { %v1293_v48 = vpop.permute.xlu0 %1292  ;;  %v1232_v20 = vadd.f32 %v1227_v8, %v1208_v58 }
 0xb0e   : > { %v1295_v23 = vsel %vm459_vm9, %v4675_v41, %v1293_v48 }
 0xb5a   : > { %v4807_v36 = vpop.permute.xlu1 %1314  ;;  %v1313_v10 = vpop.permute.xlu0 %1312 }
 0xb5b   : > { %v1318_v56 = vsel %vm477_vm10, %v1313_v10, %v4807_v36 }
 0xb5e   : > { %v1317_v44 = vpop.permute.xlu0 %1316 }
 0xb6b   : > { %v1328_v16 = vpop.permute.xlu1 %1327 }
 0xb6c   : > { %v1330_v62 = vmul.f32 %v1328_v16, %v6125_v4  ;;  %v1331_v33 = vmul.f32 %v1328_v16, %v6126_v21  ;;  %v1332_v60 = vmul.f32 %v1328_v16, %v6132_v45  ;;  %v1204_v16 = vsel %vm394_vm6, %v4631_v35, %v4647_v34 }
 0xb6e   : > { %1338 = vrot.lane.b32.xlu1 %v1331_v33, %s3630_s21  ;;  %1336 = vrot.lane.b32.xlu0 %v1330_v62, %s3630_s21  ;;  %v1185_v62 = vadd.f32 %v1180_v9, %v1161_v13  ;;  %v1210_v33 = vadd.f32 %v4647_v34, %v1186_v57 }
 0xb70   : > { %v1234_v19 = vadd.f32 %v6136_v25, %v1210_v33  ;;  %v6141_v25 = vld [vmem:[#allocation71_spill] sm:$0xff] }
 0xb72   : > { %919 = vrot.lane.b32.xlu1 %v911_v59, %s3608_s29  ;;  %3242 = vrot.lane.b32.xlu0 %v3241_v2, %s3608_s29  ;;  %v1209_v59 = vadd.f32 %v1204_v16, %v1185_v62  ;;  %v6140_v62 = vld [vmem:[#allocation53_spill] sm:$0xff] }
 0xb74   : > { %v1233_v2 = vadd.f32 %v1228_v27, %v1209_v59 }
 0xb76   : > { %1146 = vrot.lane.b32.xlu1 %v1138_v54, %s3608_s29  ;;  %3247 = vrot.lane.b32.xlu0 %v3246_v14, %s3608_s29  ;;  %v1253_v54 = vadd.f32 %v4662_v38, %v1234_v19  ;;  %v1251_v14 = vadd.f32 %v6137_v11, %v1232_v20  ;;  %v1319_v38 = vsel %vm477_vm10, %v4807_v36, %v1317_v44  ;;  %v6144_v11 = vld [vmem:[#allocation13_spill] sm:$0xff]  ;;  %v6145_v20 = vld [vmem:[#allocation14_spill] sm:$0xff] }
 0xb77   : > { %v6146_v19 = vld [vmem:[#allocation26_spill] sm:$0xff] }
 0xb78   : > { %v1277_v26 = vadd.f32 %v1271_v47, %v1253_v54  ;;  %v3658_v47 = vmov 42  }
 0xb7a   : > { %1351 = vperm.xlu1 %3251, %v4582_v50   ;;  %1340 = vrot.lane.b32.xlu0 %v1332_v60, %s3630_s21  ;;  %v1252_v60 = vadd.f32 %v1247_v24, %v1233_v2  ;;  %v1301_v32 = vadd.f32 %v1295_v23, %v1277_v26  ;;  %v6148_v26 = vld [vmem:[#allocation20_spill] sm:$0xff] }
 0xb7c   : > { %v1325_v48 = vadd.f32 %v1319_v38, %v1301_v32 }
 0xb7e   : > { %3258 = vset.pattern.permute.xlu1 %v3654_v15  ;;  %v1294_v15 = vsel %vm459_vm9, %v1289_v0, %v4675_v41 }
 0xbe0   : > { %v1339_v22 = vpop.permute.xlu1 %1338  ;;  %v1337_v63 = vpop.permute.xlu0 %1336 }
 0xbe1   : > { %v1342_v51 = vsel %vm495_vm11, %v1337_v63, %v1339_v22 }
 0xbe4   : > { %v920_v46 = vpop.permute.xlu1 %919  ;;  %v3243_v61 = vpop.permute.xlu0 %3242 }
 0xbe5   : > { %v3245_v49 = vunpack.i.h.bf16 %v3243_v61  ;;  %v3244_v12 = vunpack.i.l.bf16 %v3243_v61  ;;  %v1276_v61 = vadd.f32 %v1270_v7, %v1252_v60 }
 0xbe7   : > { %v922_v6 = vsel %vm360_vm2, %v3245_v49, %v920_v46  ;;  %v921_v35 = vsel %vm360_vm2, %v3244_v12, %v3245_v49  ;;  %v1275_v46 = vadd.f32 %v4664_v30, %v1251_v14  ;;  %v1300_v5 = vadd.f32 %v1294_v15, %v1276_v61 }
 0xbe8   : > { %v3248_v28 = vpop.permute.xlu0 %3247  ;;  %v1147_v17 = vpop.permute.xlu1 %1146 }
 0xbe9   : > { %v3250_v29 = vunpack.i.h.bf16 %v3248_v28  ;;  %v3249_v43 = vunpack.i.l.bf16 %v3248_v28  ;;  %v1299_v3 = vadd.f32 %v1289_v0, %v1275_v46  ;;  %v1324_v41 = vadd.f32 %v1318_v56, %v1300_v5  ;;  %v6138_v0 = vld [vmem:[#allocation38_spill] sm:$0xff]  ;;  %v6147_v46 = vld [vmem:[#allocation15_spill] sm:$0xff]  ;;  %v6149_v56 = vld [vmem:[#allocation16_spill] sm:$0xff] }
 0xbeb   : > { %v1149_v42 = vsel %vm360_vm2, %v3250_v29, %v1147_v17  ;;  %v1148_v1 = vsel %vm360_vm2, %v3249_v43, %v3250_v29  ;;  %v1323_v49 = vadd.f32 %v1313_v10, %v1299_v3  ;;  %v1348_v12 = vadd.f32 %v1342_v51, %v1324_v41  ;;  %v6139_v29 = vld [vmem:[#allocation39_spill] sm:$0xff]  ;;  %v6142_v17 = vld [vmem:[#allocation64_spill] sm:$0xff] }
 0xbec   : > { %v2988_v34 = vpack.c.bf16 %v1149_v42, %v922_v6  ;;  %v2990_v53 = vpack.c.bf16 %v1148_v1, %v921_v35  ;;  %v1341_v55 = vpop.permute.xlu0 %1340  ;;  %v6143_v42 = vld [vmem:[#allocation65_spill] sm:$0xff]  ;;  %v3657_v1 = vmov 41   ;;  %v3659_v3 = vmov 43  }
 0xbed   : > { %v1343_v9 = vsel %vm495_vm11, %v1339_v22, %v1341_v55  ;;  %v1347_v30 = vadd.f32 %v1337_v63, %v1323_v49  ;;  %v3656_v22 = vmov 40   ;;  %v3660_v49 = vmov 44  }
 0xbee   : > { %2989 = vmatprep.subr.bf16.mxu0 %v2988_v34  ;;  %v1349_v13 = vadd.f32 %v1343_v9, %v1325_v48 }
 0xbef   : > { %2991 = vmatpush1.bf16.msra.mxu0 %v2990_v53 }
 0xbf9   : > { %v1352_v37 = vpop.permute.xlu1 %1351 }
 0xbfa   : > { %v1354_v57 = vadd.f32 %v1352_v37, %v1347_v30  ;;  %v1355_v28 = vadd.f32 %v1352_v37, %v1348_v12  ;;  %v1356_v31 = vadd.f32 %v1352_v37, %v1349_v13  ;;  %v6150_v37 = vld [vmem:[#allocation17_spill] sm:$0xff] }
 0xbfc   : > { %v1357_v18 = vmax.f32 %v1354_v57, 0.0  ;;  %v1358_v16 = vmax.f32 %v1355_v28, 0.0  ;;  %v1359_v36 = vmax.f32 %v1356_v31, 0.0  ;;  %v6151_v28 = vld [vmem:[#allocation18_spill] sm:$0xff] }
 0xbfe   : > { %v1363_v44 = vmul.f32 %v6138_v0, %v1357_v18  ;;  %v1364_v43 = vmul.f32 %v6139_v29, %v1358_v16  ;;  %v1365_v33 = vmul.f32 %v6140_v62, %v1359_v36  ;;  %v6152_v18 = vld [vmem:[#allocation27_spill] sm:$0xff]  ;;  %v3661_v36 = vmov 45  }
 0xbff   : > { %v6153_v62 = vld [vmem:[#allocation19_spill] sm:$0xff] }
 0xc00   : > { %1373 = vrot.lane.b32.xlu1 %v1365_v33, %s3608_s29  ;;  %v3252_v10 = vpack.i.bf16 %v1364_v43, %v1363_v44 }
 0xc02   : > { %3253 = vrot.lane.b32.xlu0 %v3252_v10, %s3608_s29  ;;  %v6154_v10 = vld [vmem:[#allocation23_spill] sm:$0xff] }
 0xc04   : > { %1391 = vperm.xlu1 %3258, %v4582_v50  }
 0xc06   : > { %1384 = vperm.xlu0 %3257, %v4582_v50  }
 0xc08   : > { %3260 = vset.pattern.permute.xlu1 %v3657_v1 }
 0xc0a   : > { %3259 = vset.pattern.permute.xlu0 %v3656_v22 }
 0xc72   : > { %v4894_v63 = vpop.permute.xlu1 %1373 }
 0xc74   : > { %v4903_v58 = vpop.permute.xlu0 %3253 }
 0xc83   : > { %v1392_v8 = vpop.permute.xlu1 %1391 }
 0xc84   : > { %v1394_v27 = vmul.f32 %v6141_v25, %v1392_v8  ;;  %v1395_v6 = vmul.f32 %v6142_v17, %v1392_v8  ;;  %v1396_v35 = vmul.f32 %v6143_v42, %v1392_v8  ;;  %v6155_v8 = vld [vmem:[#allocation21_spill] sm:$0xff] }
 0xc85   : > { %v4905_v59 = vpop.permute.xlu0 %1384 }
 0xc86   : > { %1402 = vrot.lane.b32.xlu0 %v1395_v6, %s3605_s23  ;;  %1400 = vrot.lane.b32.xlu1 %v1394_v27, %s3605_s23  ;;  %v3662_v6 = vmov 46  }
 0xc8a   : > { %1415 = vperm.xlu0 %3259, %v4582_v50   ;;  %1404 = vrot.lane.b32.xlu1 %v1396_v35, %s3605_s23 }
 0xc8e   : > { %3262 = vset.pattern.permute.xlu0 %v3659_v3  ;;  %v3665_v3 = vmov 47  }
 0xcf8   : > { %v4907_v34 = vpop.permute.xlu0 %1402  ;;  %v4916_v54 = vpop.permute.xlu1 %1400 }
 0xcfc   : > { %v4918_v14 = vpop.permute.xlu1 %1404 }
 0xd09   : > { %v1416_v53 = vpop.permute.xlu0 %1415 }
 0xd0a   : > { %v1418_v24 = vmul.f32 %v1416_v53, %v6144_v11  ;;  %v1420_v2 = vmul.f32 %v1416_v53, %v6145_v20  ;;  %v1419_v7 = vmul.f32 %v1416_v53, %v6146_v19 }
 0xd0c   : > { %1428 = vrot.lane.b32.xlu0 %v1420_v2, %s3626_s8  ;;  %1424 = vrot.lane.b32.xlu1 %v1418_v24, %s3626_s8  ;;  %v6156_v2 = vld [vmem:[#allocation67_spill] sm:$0xff] }
 0xd10   : > { %1426 = vrot.lane.b32.xlu1 %v1419_v7, %s3626_s8 }
 0xd14   : > { %1439 = vperm.xlu1 %3260, %v4582_v50  }
 0xd18   : > { %3261 = vset.pattern.permute.xlu1 %v3658_v47  ;;  %v3663_v47 = vmov 95  }
 0xd7e   : > { %v4920_v60 = vpop.permute.xlu1 %1424  ;;  %v4938_v41 = vpop.permute.xlu0 %1428 }
 0xd82   : > { %v4922_v15 = vpop.permute.xlu1 %1426 }
 0xd93   : > { %v1440_v23 = vpop.permute.xlu1 %1439 }
 0xd94   : > { %v1442_v61 = vmul.f32 %v1440_v23, %v6147_v46  ;;  %v1443_v55 = vmul.f32 %v1440_v23, %v6148_v26  ;;  %v1444_v38 = vmul.f32 %v1440_v23, %v6149_v56 }
 0xd96   : > { %1450 = vrot.lane.b32.xlu1 %v1443_v55, %s3627_s28  ;;  %1448 = vrot.lane.b32.xlu0 %v1442_v61, %s3627_s28 }
 0xd9a   : > { %1463 = vperm.xlu1 %3261, %v4582_v50   ;;  %1452 = vrot.lane.b32.xlu0 %v1444_v38, %s3627_s28  ;;  %v3664_v38 = vmov 48  }
 0xd9e   : > { %3263 = vset.pattern.permute.xlu1 %v3660_v49 }
 0xe08   : > { %v4931_v5 = vpop.permute.xlu1 %1450  ;;  %v4940_v48 = vpop.permute.xlu0 %1448 }
 0xe0c   : > { %v4942_v30 = vpop.permute.xlu0 %1452 }
 0xe19   : > { %v1464_v32 = vpop.permute.xlu1 %1463 }
 0xe1a   : > { %v1466_v51 = vmul.f32 %v6142_v17, %v1464_v32  ;;  %v1467_v9 = vmul.f32 %v6143_v42, %v1464_v32 }
 0xe1c   : > { %1472 = vrot.lane.b32.xlu1 %v1467_v9, %s3604_s27  ;;  %1470 = vrot.lane.b32.xlu0 %v1466_v51, %s3604_s27 }
 0xe20   : > { %1482 = vperm.xlu0 %3262, %v4582_v50  }
 0xe24   : > { %3272 = vset.pattern.permute.xlu0 %v3665_v3 }
 0xe8e   : > { %v4944_v12 = vpop.permute.xlu0 %1470  ;;  %v4953_v0 = vpop.permute.xlu1 %1472 }
 0xe9f   : > { %v1483_v13 = vpop.permute.xlu0 %1482 }
 0xea0   : > { %v1485_v57 = vmul.f32 %v1483_v13, %v6150_v37  ;;  %v1487_v31 = vmul.f32 %v1483_v13, %v6151_v28  ;;  %v1486_v16 = vmul.f32 %v1483_v13, %v6152_v18  ;;  %v1406_v13 = vsel %vm321_vm0, %v4916_v54, %v4907_v34 }
 0xea1   : > { %v1431_v54 = vsel %vm394_vm6, %v4922_v15, %v4938_v41 }
 0xea2   : > { %1495 = vrot.lane.b32.xlu0 %v1487_v31, %s3628_s9  ;;  %1491 = vrot.lane.b32.xlu1 %v1485_v57, %s3628_s9  ;;  %v1407_v57 = vsel %vm321_vm0, %v4907_v34, %v4918_v14  ;;  %v1387_v31 = vmul.f32 %v4905_v59, %v4145_v39 }
 0xea6   : > { %1493 = vrot.lane.b32.xlu1 %v1486_v16, %s3628_s9  ;;  %v1388_v16 = vmul.f32 %v4905_v59, %v4148_v40 }
 0xea8   : > { %v1412_v34 = vadd.f32 %v1407_v57, %v1388_v16 }
 0xeaa   : > { %1506 = vperm.xlu1 %3263, %v4582_v50  }
 0xeae   : > { %3264 = vset.pattern.permute.xlu1 %v3661_v36  ;;  %v1389_v36 = vmul.f32 %v4905_v59, %v6109_v52  ;;  %v1455_v59 = vsel %vm412_vm7, %v4931_v5, %v4942_v30 }
 0xf14   : > { %v4955_v44 = vpop.permute.xlu1 %1491  ;;  %v1496_v32 = vpop.permute.xlu0 %1495 }
 0xf18   : > { %v1494_v29 = vpop.permute.xlu1 %1493 }
 0xf29   : > { %v1507_v43 = vpop.permute.xlu1 %1506 }
 0xf2a   : > { %v1509_v33 = vmul.f32 %v1507_v43, %v6153_v62  ;;  %v1510_v22 = vmul.f32 %v1507_v43, %v6154_v10  ;;  %v1511_v27 = vmul.f32 %v1507_v43, %v6155_v8 }
 0xf2c   : > { %1517 = vrot.lane.b32.xlu1 %v1510_v22, %s3629_s24  ;;  %1515 = vrot.lane.b32.xlu0 %v1509_v33, %s3629_s24  ;;  %v1430_v33 = vsel %vm394_vm6, %v4920_v60, %v4922_v15  ;;  %v1411_v22 = vadd.f32 %v1406_v13, %v1387_v31  ;;  %v1436_v60 = vadd.f32 %v1431_v54, %v1412_v34 }
 0xf2d   : > { %v1474_v15 = vsel %vm288_vm5, %v4944_v12, %v4953_v0 }
 0xf30   : > { %1530 = vperm.xlu1 %3264, %v4582_v50   ;;  %1519 = vrot.lane.b32.xlu0 %v1511_v27, %s3629_s24  ;;  %v1413_v27 = vadd.f32 %v4918_v14, %v1389_v36 }
 0xf34   : > { %3265 = vset.pattern.permute.xlu1 %v3662_v6  ;;  %v1454_v6 = vsel %vm412_vm7, %v4940_v48, %v4931_v5  ;;  %v1497_v48 = vsel %vm441_vm8, %v4955_v44, %v1494_v29 }
 0xf9e   : > { %v1518_v35 = vpop.permute.xlu1 %1517  ;;  %v1516_v51 = vpop.permute.xlu0 %1515 }
 0xfa2   : > { %v1520_v9 = vpop.permute.xlu0 %1519 }
 0xfaf   : > { %v1531_v1 = vpop.permute.xlu1 %1530 }
 0xfb0   : > { %v1533_v53 = vmul.f32 %v6142_v17, %v1531_v1  ;;  %v1534_v24 = vmul.f32 %v6143_v42, %v1531_v1  ;;  %v1535_v7 = vmul.f32 %v6156_v2, %v1531_v1  ;;  %v1437_v1 = vadd.f32 %v4938_v41, %v1413_v27 }
 0xfb2   : > { %1541 = vrot.lane.b32.xlu1 %v1534_v24, %s3609_s12  ;;  %1539 = vrot.lane.b32.xlu0 %v1533_v53, %s3609_s12  ;;  %v1435_v53 = vadd.f32 %v1430_v33, %v1411_v22  ;;  %v1461_v14 = vadd.f32 %v4942_v30, %v1437_v1 }
 0xfb4   : > { %v1459_v2 = vadd.f32 %v1454_v6, %v1435_v53  ;;  %v1480_v5 = vadd.f32 %v4953_v0, %v1461_v14  ;;  %v6158_v53 = vld [vmem:[#allocation41_spill] sm:$0xff]  ;;  %v3255_v14 = vunpack.i.l.bf16 %v4903_v58 }
 0xfb6   : > { %1554 = vperm.xlu1 %3265, %v4582_v50   ;;  %1543 = vrot.lane.b32.xlu0 %v1535_v7, %s3609_s12  ;;  %v1460_v7 = vadd.f32 %v1455_v59, %v1436_v60  ;;  %v1478_v41 = vadd.f32 %v4944_v12, %v1459_v2 }
 0xfba   : > { %3266 = vset.pattern.permute.xlu1 %v3663_v47  ;;  %v1498_v47 = vsel %vm441_vm8, %v1494_v29, %v1496_v32 }
 0xfbb   : > { %v1504_v3 = vadd.f32 %v1498_v47, %v1480_v5 }
0x1024   : > { %v1542_v23 = vpop.permute.xlu1 %1541  ;;  %v1540_v49 = vpop.permute.xlu0 %1539 }
0x1025   : > { %v1545_v57 = vsel %vm477_vm10, %v1540_v49, %v1542_v23 }
0x1028   : > { %v1544_v43 = vpop.permute.xlu0 %1543 }
0x1029   : > { %v1546_v31 = vsel %vm477_vm10, %v1542_v23, %v1544_v43 }
0x1035   : > { %v1555_v61 = vpop.permute.xlu1 %1554 }
0x1036   : > { %v1557_v55 = vmul.f32 %v1555_v61, %v6125_v4  ;;  %v1558_v17 = vmul.f32 %v1555_v61, %v6126_v21  ;;  %v1559_v42 = vmul.f32 %v1555_v61, %v6132_v45  ;;  %v1479_v61 = vadd.f32 %v1474_v15, %v1460_v7  ;;  %v6159_v15 = vld [vmem:[#allocation54_spill] sm:$0xff] }
0x1037   : > { %v3256_v7 = vunpack.i.h.bf16 %v4903_v58 }
0x1038   : > { %1565 = vrot.lane.b32.xlu1 %v1558_v17, %s3630_s21  ;;  %1563 = vrot.lane.b32.xlu0 %v1557_v55, %s3630_s21  ;;  %v1521_v55 = vsel %vm459_vm9, %v1516_v51, %v1518_v35  ;;  %v1522_v17 = vsel %vm459_vm9, %v1518_v35, %v1520_v9 }
0x1039   : > { %v1528_v0 = vadd.f32 %v1522_v17, %v1504_v3  ;;  %v1375_v17 = vsel %vm360_vm2, %v3255_v14, %v3256_v7  ;;  %v3688_v14 = vmov 62  }
0x103b   : > { %v1552_v35 = vadd.f32 %v1546_v31, %v1528_v0 }
0x103c   : > { %1578 = vperm.xlu1 %3266, %v4582_v50   ;;  %1567 = vrot.lane.b32.xlu0 %v1559_v42, %s3630_s21  ;;  %v1502_v42 = vadd.f32 %v4955_v44, %v1478_v41 }
0x103e   : > { %v1526_v29 = vadd.f32 %v1516_v51, %v1502_v42  ;;  %v6157_v51 = vld [vmem:[#allocation40_spill] sm:$0xff] }
0x1040   : > { %3273 = vset.pattern.permute.xlu1 %v3664_v38  ;;  %v1503_v38 = vadd.f32 %v1497_v48, %v1479_v61  ;;  %v1550_v36 = vadd.f32 %v1540_v49, %v1526_v29  ;;  %v1376_v61 = vsel %vm360_vm2, %v3256_v7, %v4894_v63  ;;  %v5042_v63 = vld [vmem:[%s3923_s30 + $0x10] sm:$0xff]  ;;  %v3667_v29 = vmov 57  }
0x1041   : > { %v3687_v7 = vmov 87  }
0x1042   : > { %v1527_v32 = vadd.f32 %v1521_v55, %v1503_v38 }
0x1044   : > { %v1551_v33 = vadd.f32 %v1545_v57, %v1527_v32  ;;  %v3668_v32 = vmov 50  }
0x10aa   : > { %v1564_v24 = vpop.permute.xlu0 %1563  ;;  %v1566_v13 = vpop.permute.xlu1 %1565 }
0x10ab   : > { %v1569_v12 = vsel %vm495_vm11, %v1564_v24, %v1566_v13  ;;  %v1574_v9 = vadd.f32 %v1564_v24, %v1550_v36  ;;  %v3666_v24 = vmov 49  }
0x10ac   : > { %v1575_v44 = vadd.f32 %v1569_v12, %v1551_v33 }
0x10ae   : > { %v1568_v30 = vpop.permute.xlu0 %1567 }
0x10af   : > { %v1570_v16 = vsel %vm495_vm11, %v1566_v13, %v1568_v30  ;;  %v5036_v30 = vld [vmem:[%s3923_s30 + $0x8] sm:$0xff] }
0x10b0   : > { %v1576_v54 = vadd.f32 %v1570_v16, %v1552_v35  ;;  %v3669_v35 = vmov 66  }
0x10bb   : > { %v1579_v22 = vpop.permute.xlu1 %1578 }
0x10bc   : > { %v1581_v34 = vadd.f32 %v1579_v22, %v1574_v9  ;;  %v1582_v27 = vadd.f32 %v1579_v22, %v1575_v44  ;;  %v1583_v6 = vadd.f32 %v1579_v22, %v1576_v54  ;;  %v5059_v9 = vld [vmem:[#allocation8] sm:$0xff]  ;;  %v3670_v44 = vmov 58  }
0x10bd   : > { %v3671_v54 = vmov 60   ;;  %v3672_v22 = vmov 59  }
0x10be   : > { %v1584_v59 = vmax.f32 %v1581_v34, 0.0  ;;  %v1585_v1 = vmax.f32 %v1582_v27, 0.0  ;;  %v1586_v23 = vmax.f32 %v1583_v6, 0.0  ;;  %v3673_v34 = vmov 52  }
0x10bf   : > { %v3675_v27 = vmov 77   ;;  %v3676_v6 = vmov 51  }
0x10c0   : > { %v1590_v43 = vmul.f32 %v6157_v51, %v1584_v59  ;;  %v1591_v60 = vmul.f32 %v6158_v53, %v1585_v1  ;;  %v1592_v2 = vmul.f32 %v6159_v15, %v1586_v23  ;;  %v3677_v59 = vmov 69   ;;  %v5076_v15 = vld [vmem:[#allocation8] sm:$0xff] }
0x10c1   : > { %v3678_v1 = vmov 67   ;;  %v3679_v23 = vmov 54   ;;  %v3680_v51 = vmov 76   ;;  %v3682_v53 = vmov 61  }
0x10c2   : > { %1600 = vrot.lane.b32.xlu1 %v1592_v2, %s3608_s29  ;;  %v3267_v49 = vpack.i.bf16 %v1591_v60, %v1590_v43  ;;  %v3681_v43 = vmov 79   ;;  %v3683_v60 = vmov 64   ;;  %v3684_v2 = vmov 68  }
0x10c4   : > { %3268 = vrot.lane.b32.xlu0 %v3267_v49, %s3608_s29  ;;  %v3685_v49 = vmov 86  }
0x10c6   : > { %1618 = vperm.xlu1 %3273, %v4582_v50  }
0x10c8   : > { %1611 = vperm.xlu0 %3272, %v4582_v50  }
0x10ca   : > { %3275 = vset.pattern.permute.xlu1 %v3668_v32 }
0x10cc   : > { %3274 = vset.pattern.permute.xlu0 %v3666_v24  ;;  %v3686_v24 = vmov 53  }
0x1134   : > { %v1601_v41 = vpop.permute.xlu1 %1600 }
0x1136   : > { %v3269_v48 = vpop.permute.xlu0 %3268 }
0x1137   : > { %v3271_v47 = vunpack.i.h.bf16 %v3269_v48  ;;  %v3270_v5 = vunpack.i.l.bf16 %v3269_v48  ;;  %v3689_v48 = vmov 88  }
0x1139   : > { %v1603_v55 = vsel %vm360_vm2, %v3271_v47, %v1601_v41  ;;  %v1602_v42 = vsel %vm360_vm2, %v3270_v5, %v3271_v47  ;;  %v3690_v47 = vmov 78   ;;  %v3691_v5 = vmov 91  }
0x113a   : > { %v2992_v38 = vpack.c.bf16 %v1603_v55, %v1376_v61  ;;  %v2994_v3 = vpack.c.bf16 %v1602_v42, %v1375_v17  ;;  %v3692_v41 = vmov 84   ;;  %v3693_v61 = vmov 74  }
0x113b   : > { %v3694_v55 = vmov 63   ;;  %v3695_v17 = vmov 70   ;;  %v3696_v42 = vmov 85  }
0x113c   : > { %2993 = vmatprep.subr.bf16.mxu0 %v2992_v38  ;;  %v3697_v38 = vmov 55  }
0x113d   : > { %2995 = vmatpush1.bf16.msra.mxu0 %v2994_v3  ;;  %v3698_v3 = vmov 71  }
0x1145   : > { %v1619_v13 = vpop.permute.xlu1 %1618 }
0x1146   : > { %v1621_v58 = vmul.f32 %v6141_v25, %v1619_v13  ;;  %v1622_v57 = vmul.f32 %v5036_v30, %v1619_v13  ;;  %v1623_v31 = vmul.f32 %v5042_v63, %v1619_v13  ;;  %v3699_v13 = vmov 96  }
0x1147   : > { %v5047_v25 = vpop.permute.xlu0 %1611 }
0x1148   : > { %1629 = vrot.lane.b32.xlu0 %v1622_v57, %s3605_s23  ;;  %1627 = vrot.lane.b32.xlu1 %v1621_v58, %s3605_s23  ;;  %v3700_v58 = vmov 80   ;;  %v6017_v57 = vmov 72  }
0x114c   : > { %1642 = vperm.xlu0 %3274, %v4582_v50   ;;  %1631 = vrot.lane.b32.xlu1 %v1623_v31, %s3605_s23  ;;  %v3702_v31 = vmov 81  }
0x1150   : > { %3276 = vset.pattern.permute.xlu0 %v3667_v29  ;;  %v3703_v29 = vmov 73  }
0x11ba   : > { %v5049_v0 = vpop.permute.xlu0 %1629  ;;  %v5098_v32 = vpop.permute.xlu1 %1627 }
0x11cb   : > { %v1643_v12 = vpop.permute.xlu0 %1642 }
0x11cc   : > { %v1645_v16 = vmul.f32 %v1643_v12, %v6144_v11  ;;  %v1647_v36 = vmul.f32 %v1643_v12, %v6145_v20  ;;  %v1646_v33 = vmul.f32 %v1643_v12, %v6146_v19  ;;  %v3704_v12 = vmov 82  }
0x11ce   : > { %1655 = vrot.lane.b32.xlu0 %v1647_v36, %s3626_s8  ;;  %1651 = vrot.lane.b32.xlu1 %v1645_v16, %s3626_s8  ;;  %v5101_v16 = vpop.permute.xlu1 %1631  ;;  %v3705_v36 = vmov 89  }
0x11d2   : > { %1845 = vperm.xlu0 %3276, %v4582_v50   ;;  %1653 = vrot.lane.b32.xlu1 %v1646_v33, %s3626_s8 }
0x11d6   : > { %3279 = vset.pattern.permute.xlu0 %v3669_v35  ;;  %1666 = vperm.xlu1 %3275, %v4582_v50   ;;  %v3674_v50 = vmov 75  }
0x11d7   : > { %2072 = vperm.xlu0 %3279, %v5059_v9  }
0x11da   : > { %3277 = vset.pattern.permute.xlu1 %v3670_v44  ;;  %v3706_v44 = vmov 90  }
0x11db   : > { %3282 = vset.pattern.permute.xlu0 %v3671_v54  ;;  %1869 = vperm.xlu1 %3277, %v5059_v9  }
0x11dc   : > { %1917 = vperm.xlu0 %3282, %v5059_v9  }
0x11df   : > { %3278 = vset.pattern.permute.xlu1 %v3672_v22 }
0x11e0   : > { %3285 = vset.pattern.permute.xlu0 %v3673_v34  ;;  %1893 = vperm.xlu1 %3278, %v5059_v9   ;;  %v3707_v34 = vmov 56  }
0x11e1   : > { %1709 = vperm.xlu0 %3285, %v5059_v9  }
0x11e4   : > { %3280 = vset.pattern.permute.xlu1 %v3674_v50  ;;  %v5112_v50 = vld [vmem:[%s3923_s30] sm:$0xff] }
0x11e5   : > { %3288 = vset.pattern.permute.xlu0 %v3675_v27  ;;  %2299 = vperm.xlu1 %3280, %v5059_v9  }
0x11e6   : > { %2347 = vperm.xlu0 %3288, %v5059_v9  }
0x11e9   : > { %3281 = vset.pattern.permute.xlu1 %v3676_v6 }
0x11ea   : > { %3291 = vset.pattern.permute.xlu0 %v3677_v59  ;;  %1690 = vperm.xlu1 %3281, %v5059_v9   ;;  %v3708_v59 = vmov 65  }
0x11eb   : > { %2144 = vperm.xlu0 %3291, %v5059_v9  }
0x11ee   : > { %3283 = vset.pattern.permute.xlu1 %v3678_v1 }
0x11ef   : > { %3294 = vset.pattern.permute.xlu0 %v3679_v23  ;;  %2096 = vperm.xlu1 %3283, %v5059_v9  }
0x11f0   : > { %1757 = vperm.xlu0 %3294, %v5059_v9  }
0x11f3   : > { %3284 = vset.pattern.permute.xlu1 %v3680_v51 }
0x11f4   : > { %3297 = vset.pattern.permute.xlu0 %v3681_v43  ;;  %2323 = vperm.xlu1 %3284, %v5059_v9   ;;  %v3709_v43 = vmov 83  }
0x11f5   : > { %2390 = vperm.xlu0 %3297, %v5059_v9  }
0x11f8   : > { %3286 = vset.pattern.permute.xlu1 %v3682_v53 }
0x11f9   : > { %3300 = vset.pattern.permute.xlu0 %v3683_v60  ;;  %1936 = vperm.xlu1 %3286, %v5059_v9  }
0x11fa   : > { %2008 = vperm.xlu0 %3300, %v5059_v9  }
0x11fd   : > { %3287 = vset.pattern.permute.xlu1 %v3684_v2 }
0x11fe   : > { %3303 = vset.pattern.permute.xlu0 %v3685_v49  ;;  %2120 = vperm.xlu1 %3287, %v5059_v9  }
0x11ff   : > { %2574 = vperm.xlu0 %3303, %v5076_v15  }
0x1202   : > { %3289 = vset.pattern.permute.xlu1 %v3686_v24 }
0x1203   : > { %3306 = vset.pattern.permute.xlu0 %v3687_v7  ;;  %1733 = vperm.xlu1 %3289, %v5059_v9  }
0x1204   : > { %2598 = vperm.xlu0 %3306, %v5076_v15  }
0x1207   : > { %3290 = vset.pattern.permute.xlu1 %v3688_v14 }
0x1208   : > { %3309 = vset.pattern.permute.xlu0 %v3689_v48  ;;  %1960 = vperm.xlu1 %3290, %v5059_v9  }
0x1209   : > { %2617 = vperm.xlu0 %3309, %v5076_v15  }
0x120c   : > { %3292 = vset.pattern.permute.xlu1 %v3690_v47 }
0x120d   : > { %3312 = vset.pattern.permute.xlu0 %v3691_v5  ;;  %2371 = vperm.xlu1 %3292, %v5059_v9  }
0x120e   : > { %2689 = vperm.xlu0 %3312, %v5076_v15  }
0x1211   : > { %3293 = vset.pattern.permute.xlu1 %v3692_v41 }
0x1212   : > { %3315 = vset.pattern.permute.xlu0 %v3693_v61  ;;  %2526 = vperm.xlu1 %3293, %v5076_v15   ;;  %v3710_v61 = vmov 97  }
0x1213   : > { %2292 = vperm.xlu0 %3315, %v5059_v9  }
0x1216   : > { %3295 = vset.pattern.permute.xlu1 %v3694_v55 }
0x1217   : > { %1984 = vperm.xlu1 %3295, %v5059_v9   ;;  %3317 = vset.pattern.permute.xlu0 %v3699_v13 }
0x121b   : > { %3296 = vset.pattern.permute.xlu1 %v3695_v17 }
0x121c   : > { %2163 = vperm.xlu1 %3296, %v5059_v9  }
0x1220   : > { %3298 = vset.pattern.permute.xlu1 %v3696_v42 }
0x1221   : > { %2550 = vperm.xlu1 %3298, %v5076_v15  }
0x1225   : > { %3299 = vset.pattern.permute.xlu1 %v3697_v38 }
0x1226   : > { %1781 = vperm.xlu1 %3299, %v5059_v9  }
0x122a   : > { %3301 = vset.pattern.permute.xlu1 %v3698_v3 }
0x122b   : > { %2187 = vperm.xlu1 %3301, %v5059_v9  }
0x122f   : > { %3302 = vset.pattern.permute.xlu1 %v3700_v58 }
0x1230   : > { %2414 = vperm.xlu1 %3302, %v5059_v9  }
0x1234   : > { %3304 = vset.pattern.permute.xlu1 %v6017_v57 }
0x1235   : > { %2211 = vperm.xlu1 %3304, %v5059_v9  }
0x1239   : > { %3305 = vset.pattern.permute.xlu1 %v3702_v31 }
0x123a   : > { %2438 = vperm.xlu1 %3305, %v5059_v9  }
0x123e   : > { %3307 = vset.pattern.permute.xlu1 %v3703_v29 }
0x123f   : > { %2235 = vperm.xlu1 %3307, %v5059_v9  }
0x1240   : > { %v5104_v33 = vpop.permute.xlu1 %1651  ;;  %v5106_v35 = vpop.permute.xlu0 %1655 }
0x1243   : > { %3308 = vset.pattern.permute.xlu1 %v3704_v12 }
0x1244   : > { %2462 = vperm.xlu1 %3308, %v5059_v9   ;;  %v5109_v54 = vpop.permute.xlu1 %1653 }
0x1248   : > { %3310 = vset.pattern.permute.xlu1 %v3705_v36 }
0x1249   : > { %2641 = vperm.xlu1 %3310, %v5076_v15  }
0x124d   : > { %3311 = vset.pattern.permute.xlu1 %v3706_v44 }
0x124e   : > { %2665 = vperm.xlu1 %3311, %v5076_v15  }
0x1251   : > { %v1846_v22 = vpop.permute.xlu0 %1845 }
0x1252   : > { %3313 = vset.pattern.permute.xlu1 %v3707_v34  ;;  %v1848_v27 = vmul.f32 %v5112_v50, %v1846_v22  ;;  %v1849_v1 = vmul.f32 %v5036_v30, %v1846_v22  ;;  %v1850_v53 = vmul.f32 %v5042_v63, %v1846_v22 }
0x1253   : > { %1838 = vperm.xlu1 %3313, %v5059_v9  }
0x1254   : > { %1854 = vrot.lane.b32.xlu0 %v1848_v27, %s3605_s23 }
0x1255   : > { %v1667_v6 = vpop.permute.xlu1 %1666 }
0x1256   : > { %v1671_v24 = vmul.f32 %v1667_v6, %v6149_v56  ;;  %v2073_v48 = vpop.permute.xlu0 %2072  ;;  %v1670_v41 = vmul.f32 %v1667_v6, %v6148_v26  ;;  %v1669_v12 = vmul.f32 %v1667_v6, %v6147_v46 }
0x1257   : > { %3314 = vset.pattern.permute.xlu1 %v3708_v59  ;;  %v2077_v47 = vmul.f32 %v5042_v63, %v2073_v48  ;;  %v2076_v38 = vmul.f32 %v5036_v30, %v2073_v48  ;;  %v2075_v27 = vmul.f32 %v5112_v50, %v2073_v48 }
0x1258   : > { %2065 = vperm.xlu1 %3314, %v5059_v9  }
0x125a   : > { %v1870_v23 = vpop.permute.xlu1 %1869 }
0x125b   : > { %v1874_v51 = vmul.f32 %v1870_v23, %v6145_v20  ;;  %v1872_v60 = vmul.f32 %v1870_v23, %v6144_v11  ;;  %v1873_v49 = vmul.f32 %v1870_v23, %v6146_v19  ;;  %v1918_v44 = vpop.permute.xlu0 %1917 }
0x125c   : > { %1856 = vrot.lane.b32.xlu1 %v1849_v1, %s3605_s23  ;;  %v1921_v22 = vmul.f32 %v5042_v63, %v1918_v44  ;;  %v1920_v23 = vmul.f32 %v5036_v30, %v1918_v44 }
0x125d   : > { %1882 = vrot.lane.b32.xlu0 %v1874_v51, %s3626_s8  ;;  %3316 = vset.pattern.permute.xlu1 %v3709_v43 }
0x125f   : > { %v1894_v2 = vpop.permute.xlu1 %1893 }
0x1260   : > { %1858 = vrot.lane.b32.xlu1 %v1850_v53, %s3605_s23  ;;  %v1898_v14 = vmul.f32 %v1894_v2, %v6149_v56  ;;  %v1897_v55 = vmul.f32 %v1894_v2, %v6148_v26  ;;  %v1896_v3 = vmul.f32 %v1894_v2, %v6147_v46  ;;  %v1710_v2 = vpop.permute.xlu0 %1709 }
0x1261   : > { %1878 = vrot.lane.b32.xlu0 %v1872_v60, %s3626_s8 }
0x1264   : > { %1880 = vrot.lane.b32.xlu1 %v1873_v49, %s3626_s8  ;;  %v2300_v7 = vpop.permute.xlu1 %2299 }
0x1265   : > { %1679 = vrot.lane.b32.xlu0 %v1671_v24, %s3627_s28  ;;  %v2304_v42 = vmul.f32 %v5042_v63, %v2300_v7  ;;  %v2303_v58 = vmul.f32 %v5036_v30, %v2300_v7  ;;  %v2302_v31 = vmul.f32 %v5112_v50, %v2300_v7  ;;  %v1713_v7 = vmul.f32 %v1710_v2, %v6152_v18 }
0x1268   : > { %2519 = vperm.xlu1 %3316, %v5076_v15  }
0x1269   : > { %1906 = vrot.lane.b32.xlu0 %v1898_v14, %s3627_s28  ;;  %v1691_v5 = vpop.permute.xlu1 %1690 }
0x126a   : > { %v1694_v36 = vmul.f32 %v5042_v63, %v1691_v5  ;;  %v1693_v59 = vmul.f32 %v5036_v30, %v1691_v5 }
0x126c   : > { %1677 = vrot.lane.b32.xlu1 %v1670_v41, %s3627_s28  ;;  %v1712_v41 = vmul.f32 %v1710_v2, %v6150_v37 }
0x126d   : > { %2085 = vrot.lane.b32.xlu0 %v2077_v47, %s3605_s23  ;;  %3318 = vset.pattern.permute.xlu1 %v3710_v61  ;;  %v2348_v47 = vpop.permute.xlu0 %2347 }
0x126e   : > { %v2097_v17 = vpop.permute.xlu1 %2096  ;;  %v2350_v44 = vmul.f32 %v2348_v47, %v6147_v46 }
0x126f   : > { %v2101_v6 = vmul.f32 %v2097_v17, %v6145_v20  ;;  %v2100_v53 = vmul.f32 %v2097_v17, %v6146_v19  ;;  %v2099_v48 = vmul.f32 %v2097_v17, %v6144_v11  ;;  %v1714_v17 = vmul.f32 %v1710_v2, %v6151_v28 }
0x1270   : > { %1904 = vrot.lane.b32.xlu1 %v1897_v55, %s3627_s28 }
0x1271   : > { %2312 = vrot.lane.b32.xlu0 %v2304_v42, %s3605_s23  ;;  %v2145_v55 = vpop.permute.xlu0 %2144 }
0x1273   : > { %v2324_v13 = vpop.permute.xlu1 %2323 }
0x1274   : > { %2083 = vrot.lane.b32.xlu1 %v2076_v38, %s3605_s23  ;;  %v2328_v51 = vmul.f32 %v2324_v13, %v6145_v20  ;;  %v2326_v60 = vmul.f32 %v2324_v13, %v6144_v11  ;;  %v2327_v24 = vmul.f32 %v2324_v13, %v6146_v19 }
0x1275   : > { %1902 = vrot.lane.b32.xlu0 %v1896_v3, %s3627_s28  ;;  %v5196_v13 = vpop.permute.xlu0 %1757 }
0x1278   : > { %2310 = vrot.lane.b32.xlu1 %v2303_v58, %s3605_s23  ;;  %v1937_v29 = vpop.permute.xlu1 %1936 }
0x1279   : > { %2308 = vrot.lane.b32.xlu0 %v2302_v31, %s3605_s23  ;;  %v1939_v5 = vmul.f32 %v1937_v29, %v6150_v37  ;;  %v1941_v42 = vmul.f32 %v1937_v29, %v6151_v28  ;;  %v1940_v58 = vmul.f32 %v1937_v29, %v6152_v18  ;;  %v2352_v31 = vmul.f32 %v2348_v47, %v6149_v56 }
0x127a   : > { %v2351_v29 = vmul.f32 %v2348_v47, %v6148_v26 }
0x127c   : > { %1675 = vrot.lane.b32.xlu1 %v1669_v12, %s3627_s28 }
0x127d   : > { %1699 = vrot.lane.b32.xlu0 %v1694_v36, %s3604_s27  ;;  %v2121_v34 = vpop.permute.xlu1 %2120 }
0x127e   : > { %v2125_v38 = vmul.f32 %v2121_v34, %v6149_v56  ;;  %v2124_v36 = vmul.f32 %v2121_v34, %v6148_v26 }
0x1280   : > { %2081 = vrot.lane.b32.xlu1 %v2075_v27, %s3605_s23 }
0x1281   : > { %1926 = vrot.lane.b32.xlu0 %v1921_v22, %s3604_s27  ;;  %v5207_v22 = vpop.permute.xlu0 %2390 }
0x1282   : > { %v5158_v1 = vpop.permute.xlu1 %1733 }
0x1284   : > { %1697 = vrot.lane.b32.xlu1 %v1693_v59, %s3604_s27  ;;  %v1737_v59 = vmul.f32 %v5158_v1, %v6154_v10 }
0x1285   : > { %2109 = vrot.lane.b32.xlu0 %v2101_v6, %s3626_s8  ;;  %v5217_v6 = vpop.permute.xlu0 %2008 }
0x1287   : > { %v5165_v43 = vpop.permute.xlu1 %1960 }
0x1288   : > { %1924 = vrot.lane.b32.xlu1 %v1920_v23, %s3604_s27  ;;  %v2123_v23 = vmul.f32 %v2121_v34, %v6147_v46  ;;  %v1965_v2 = vmul.f32 %v5165_v43, %v6155_v8  ;;  %v2147_v34 = vmul.f32 %v5036_v30, %v2145_v55 }
0x1289   : > { %2336 = vrot.lane.b32.xlu0 %v2328_v51, %s3626_s8 }
0x128c   : > { %2107 = vrot.lane.b32.xlu1 %v2100_v53, %s3626_s8  ;;  %v5172_v49 = vpop.permute.xlu1 %2371  ;;  %v1736_v53 = vmul.f32 %v5158_v1, %v6153_v62 }
0x128d   : > { %2332 = vrot.lane.b32.xlu0 %v2326_v60, %s3626_s8  ;;  %v5227_v60 = vpop.permute.xlu0 %2574 }
0x1290   : > { %2334 = vrot.lane.b32.xlu1 %v2327_v24, %s3626_s8 }
0x1291   : > { %1720 = vrot.lane.b32.xlu0 %v1713_v7, %s3628_s9  ;;  %v5179_v14 = vpop.permute.xlu1 %2526  ;;  %v1738_v7 = vmul.f32 %v5158_v1, %v6155_v8 }
0x1294   : > { %2105 = vrot.lane.b32.xlu1 %v2099_v48, %s3626_s8  ;;  %v5239_v48 = vpop.permute.xlu0 %2598 }
0x1295   : > { %1945 = vrot.lane.b32.xlu0 %v1939_v5, %s3628_s9  ;;  %v1963_v5 = vmul.f32 %v5165_v43, %v6153_v62 }
0x1296   : > { %v5186_v61 = vpop.permute.xlu1 %1984 }
0x1298   : > { %1718 = vrot.lane.b32.xlu1 %v1712_v41, %s3628_s9  ;;  %v2374_v41 = vmul.f32 %v5036_v30, %v5172_v49 }
0x1299   : > { %1949 = vrot.lane.b32.xlu0 %v1941_v42, %s3628_s9  ;;  %v5250_v42 = vpop.permute.xlu0 %2617 }
0x129b   : > { %v5193_v3 = vpop.permute.xlu1 %2163 }
0x129c   : > { %1722 = vrot.lane.b32.xlu1 %v1714_v17, %s3628_s9  ;;  %v1964_v17 = vmul.f32 %v5165_v43, %v6154_v10  ;;  %v2148_v43 = vmul.f32 %v5042_v63, %v2145_v55 }
0x129d   : > { %2133 = vrot.lane.b32.xlu0 %v2125_v38, %s3627_s28  ;;  %v2530_v38 = vmul.f32 %v5036_v30, %v5179_v14 }
0x12a0   : > { %1947 = vrot.lane.b32.xlu1 %v1940_v58, %s3628_s9  ;;  %v5202_v12 = vpop.permute.xlu1 %2550 }
0x12a1   : > { %2360 = vrot.lane.b32.xlu0 %v2352_v31, %s3627_s28  ;;  %v5263_v31 = vpop.permute.xlu0 %2689 }
0x12a4   : > { %2131 = vrot.lane.b32.xlu1 %v2124_v36, %s3627_s28  ;;  %v2529_v36 = vmul.f32 %v5112_v50, %v5179_v14  ;;  %v2375_v50 = vmul.f32 %v5042_v63, %v5172_v49 }
0x12a5   : > { %2356 = vrot.lane.b32.xlu0 %v2350_v44, %s3627_s28  ;;  %v5211_v27 = vpop.permute.xlu1 %1781  ;;  %v1761_v44 = vmul.f32 %v5042_v63, %v5196_v13 }
0x12a8   : > { %2358 = vrot.lane.b32.xlu1 %v2351_v29, %s3627_s28 }
0x12a9   : > { %1744 = vrot.lane.b32.xlu0 %v1737_v59, %s3629_s24  ;;  %v5275_v59 = vpop.permute.xlu0 %2292 }
0x12aa   : > { %v5221_v51 = vpop.permute.xlu1 %2187 }
0x12ac   : > { %2129 = vrot.lane.b32.xlu1 %v2123_v23, %s3627_s28  ;;  %v3711_v23 = vmov 98  }
0x12ad   : > { %1805 = vperm.xlu0 %3317, %v5059_v9  }
0x12af   : > { %v5231_v24 = vpop.permute.xlu1 %2414 }
0x12b0   : > { %1742 = vrot.lane.b32.xlu1 %v1736_v53, %s3629_s24  ;;  %v1987_v53 = vmul.f32 %v5036_v30, %v5186_v61 }
0x12b1   : > { %1973 = vrot.lane.b32.xlu0 %v1965_v2, %s3629_s24 }
0x12b2   : > { %3353 = vset.pattern.permute.xlu0 %v6017_v57  ;;  %v2553_v57 = vmul.f32 %v5202_v12, %v6144_v11 }
0x12b4   : > { %1746 = vrot.lane.b32.xlu1 %v1738_v7, %s3629_s24  ;;  %v5242_v47 = vpop.permute.xlu1 %2211  ;;  %v5291_v7 = vld [vmem:[%s3923_s30 + $0x18] sm:$0xff]  ;;  %s2979_s30 = sshll.u32 %s3919_s13, 4 }
0x12b5   : > { %2151 = vrot.lane.b32.xlu0 %v2147_v34, %s3604_s27  ;;  %v2531_v34 = vmul.f32 %v5042_v63, %v5179_v14  ;;  %v1762_v14 = vmul.f32 %v5291_v7, %v5196_v13 }
0x12b8   : > { %1969 = vrot.lane.b32.xlu1 %v1963_v5, %s3629_s24  ;;  %v1989_v5 = vmul.f32 %v5291_v7, %v5186_v61 }
0x12b9   : > { %2378 = vrot.lane.b32.xlu0 %v2374_v41, %s3604_s27  ;;  %v5253_v1 = vpop.permute.xlu1 %2438  ;;  %v1760_v41 = vmul.f32 %v5036_v30, %v5196_v13 }
0x12bc   : > { %1971 = vrot.lane.b32.xlu1 %v1964_v17, %s3629_s24  ;;  %v2167_v17 = vmul.f32 %v5193_v3, %v6152_v18 }
0x12bd   : > { %2537 = vrot.lane.b32.xlu0 %v2530_v38, %s3605_s23 }
0x12be   : > { %v5261_v58 = vpop.permute.xlu1 %2235 }
0x12c0   : > { %2032 = vperm.xlu1 %3318, %v5059_v9  }
0x12c1   : > { %2535 = vrot.lane.b32.xlu0 %v2529_v36, %s3605_s23 }
0x12c3   : > { %v5272_v29 = vpop.permute.xlu1 %2462 }
0x12c4   : > { %2153 = vrot.lane.b32.xlu1 %v2148_v43, %s3604_s27  ;;  %v2393_v43 = vmul.f32 %v5207_v22, %v6150_v37 }
0x12c5   : > { %1768 = vrot.lane.b32.xlu0 %v1761_v44, %s3609_s12  ;;  %3319 = vset.pattern.permute.xlu1 %v3711_v23  ;;  %v1988_v23 = vmul.f32 %v5042_v63, %v5186_v61 }
0x12c6   : > { %v5286_v2 = vpop.permute.xlu0 %1854 }
0x12c7   : > { %6160 = vst [vmem:[#allocation28_spill] sm:$0xff] %v5286_v2 }
0x12c8   : > { %2380 = vrot.lane.b32.xlu1 %v2375_v50, %s3604_s27  ;;  %v5283_v55 = vpop.permute.xlu1 %2641  ;;  %v2395_v50 = vmul.f32 %v5207_v22, %v6151_v28 }
0x12c9   : > { %1993 = vrot.lane.b32.xlu0 %v1987_v53, %s3609_s12 }
0x12cc   : > { %2539 = vrot.lane.b32.xlu1 %v2531_v34, %s3605_s23  ;;  %v2166_v34 = vmul.f32 %v5193_v3, %v6150_v37 }
0x12cd   : > { %1997 = vrot.lane.b32.xlu0 %v1989_v5, %s3609_s12  ;;  %v5297_v49 = vpop.permute.xlu1 %2665  ;;  %v2555_v5 = vmul.f32 %v5202_v12, %v6145_v20  ;;  %v2394_v20 = vmul.f32 %v5207_v22, %v6152_v18 }
0x12cf   : > { %v5303_v38 = vpop.permute.xlu0 %1882 }
0x12d0   : > { %6161 = vst [vmem:[#allocation29_spill] sm:$0xff] %v5303_v38  ;;  %1766 = vrot.lane.b32.xlu1 %v1760_v41, %s3609_s12 }
0x12d1   : > { %2174 = vrot.lane.b32.xlu0 %v2167_v17, %s3628_s9  ;;  %v2168_v17 = vmul.f32 %v5193_v3, %v6151_v28 }
0x12d2   : > { %v5309_v36 = vpop.permute.xlu1 %1838 }
0x12d3   : > { %6162 = vst [vmem:[#allocation60_spill] sm:$0xff] %v5309_v36  ;;  %v5313_v44 = vpop.permute.xlu0 %1878 }
0x12d4   : > { %6163 = vst [vmem:[#allocation62_spill] sm:$0xff] %v5313_v44  ;;  %1770 = vrot.lane.b32.xlu1 %v1762_v14, %s3609_s12  ;;  %v1784_v14 = vmul.f32 %v5211_v27, %v6125_v4 }
0x12d5   : > { %2399 = vrot.lane.b32.xlu0 %v2393_v43, %s3628_s9 }
0x12d7   : > { %v5321_v53 = vpop.permute.xlu0 %1679  ;;  %v5323_v13 = vpop.permute.xlu1 %2065 }
0x12d8   : > { %6164 = vst [vmem:[#allocation66_spill] sm:$0xff] %v5321_v53  ;;  %1995 = vrot.lane.b32.xlu1 %v1988_v23, %s3609_s12 }
0x12d9   : > { %2403 = vrot.lane.b32.xlu0 %v2395_v50, %s3628_s9  ;;  %v1786_v50 = vmul.f32 %v5211_v27, %v6132_v45 }
0x12db   : > { %v5331_v41 = vpop.permute.xlu0 %1906  ;;  %v5333_v61 = vpop.permute.xlu1 %1856 }
0x12dc   : > { %6165 = vst [vmem:[#allocation68_spill] sm:$0xff] %v5331_v41  ;;  %2172 = vrot.lane.b32.xlu1 %v2166_v34, %s3628_s9  ;;  %v1785_v41 = vmul.f32 %v5211_v27, %v6126_v21 }
0x12dd   : > { %2563 = vrot.lane.b32.xlu0 %v2555_v5, %s3626_s8  ;;  %v2554_v5 = vmul.f32 %v5202_v12, %v6146_v19  ;;  %v2011_v12 = vmul.f32 %v5217_v6, %v6125_v4 }
0x12df   : > { %v5341_v43 = vpop.permute.xlu0 %2085  ;;  %v5343_v23 = vpop.permute.xlu1 %1858 }
0x12e0   : > { %6166 = vst [vmem:[#allocation63_spill] sm:$0xff] %v5343_v23  ;;  %2176 = vrot.lane.b32.xlu1 %v2168_v17, %s3628_s9  ;;  %v2012_v17 = vmul.f32 %v5217_v6, %v6126_v21 }
0x12e1   : > { %1790 = vrot.lane.b32.xlu0 %v1784_v14, %s3630_s21 }
0x12e3   : > { %v5351_v34 = vpop.permute.xlu0 %2312  ;;  %v5353_v3 = vpop.permute.xlu1 %1880 }
0x12e4   : > { %6167 = vst [vmem:[#allocation72_spill] sm:$0xff] %v5353_v3  ;;  %2401 = vrot.lane.b32.xlu1 %v2394_v20, %s3628_s9  ;;  %v2190_v20 = vmul.f32 %v5221_v51, %v6153_v62 }
0x12e5   : > { %1794 = vrot.lane.b32.xlu0 %v1786_v50, %s3630_s21 }
0x12e7   : > { %v5361_v14 = vpop.permute.xlu0 %1902  ;;  %v5363_v22 = vpop.permute.xlu1 %2519 }
0x12e8   : > { %6168 = vst [vmem:[#allocation61_spill] sm:$0xff] %v5361_v14  ;;  %2561 = vrot.lane.b32.xlu1 %v2554_v5, %s3626_s8  ;;  %v2192_v5 = vmul.f32 %v5221_v51, %v6155_v8 }
0x12e9   : > { %2019 = vrot.lane.b32.xlu0 %v2012_v17, %s3630_s21 }
0x12eb   : > { %v5371_v50 = vpop.permute.xlu0 %2308  ;;  %v5373_v19 = vpop.permute.xlu1 %1677 }
0x12ec   : > { %2559 = vrot.lane.b32.xlu1 %v2553_v57, %s3626_s8  ;;  %v2417_v57 = vmul.f32 %v5231_v24, %v6153_v62 }
0x12ed   : > { %2196 = vrot.lane.b32.xlu0 %v2190_v20, %s3629_s24 }
0x12ef   : > { %v5381_v17 = vpop.permute.xlu0 %1699  ;;  %v5383_v11 = vpop.permute.xlu1 %1904 }
0x12f0   : > { %6169 = vst [vmem:[#allocation69_spill] sm:$0xff] %v5381_v17  ;;  %6170 = vst [vmem:[#allocation73_spill] sm:$0xff] %v5383_v11  ;;  %1792 = vrot.lane.b32.xlu1 %v1785_v41, %s3630_s21  ;;  %v2013_v17 = vmul.f32 %v5217_v6, %v6132_v45  ;;  %v2419_v41 = vmul.f32 %v5231_v24, %v6155_v8  ;;  %v2577_v11 = vmul.f32 %v5227_v60, %v6147_v46  ;;  %v3712_v46 = vmov 99  }
0x12f1   : > { %2200 = vrot.lane.b32.xlu0 %v2192_v5, %s3629_s24 }
0x12f3   : > { %v5391_v20 = vpop.permute.xlu0 %1926  ;;  %v5393_v27 = vpop.permute.xlu1 %2083 }
0x12f4   : > { %6171 = vst [vmem:[#allocation74_spill] sm:$0xff] %v5391_v20  ;;  %2017 = vrot.lane.b32.xlu1 %v2011_v12, %s3630_s21  ;;  %v2191_v20 = vmul.f32 %v5221_v51, %v6154_v10  ;;  %v2578_v12 = vmul.f32 %v5227_v60, %v6148_v26  ;;  %v2418_v26 = vmul.f32 %v5231_v24, %v6154_v10 }
0x12f5   : > { %2423 = vrot.lane.b32.xlu0 %v2417_v57, %s3629_s24  ;;  %v2215_v51 = vmul.f32 %v5042_v63, %v5242_v47  ;;  %v2579_v24 = vmul.f32 %v5227_v60, %v6149_v56  ;;  %v2602_v56 = vmul.f32 %v5042_v63, %v5239_v48 }
0x12f7   : > { %v5401_v5 = vpop.permute.xlu0 %2109  ;;  %v5403_v14 = vpop.permute.xlu1 %2310 }
0x12f8   : > { %2021 = vrot.lane.b32.xlu1 %v2013_v17, %s3630_s21 }
0x12f9   : > { %2427 = vrot.lane.b32.xlu0 %v2419_v41, %s3629_s24 }
0x12fb   : > { %v5411_v57 = vpop.permute.xlu0 %2336  ;;  %v5413_v6 = vpop.permute.xlu1 %1675 }
0x12fc   : > { %2198 = vrot.lane.b32.xlu1 %v2191_v20, %s3629_s24 }
0x12fd   : > { %2585 = vrot.lane.b32.xlu0 %v2578_v12, %s3627_s28  ;;  %v2441_v12 = vmul.f32 %v5036_v30, %v5253_v1 }
0x12ff   : > { %v5419_v17 = vpop.permute.xlu0 %2332  ;;  %v5421_v41 = vpop.permute.xlu1 %2081 }
0x1300   : > { %2259 = vperm.xlu1 %3319, %v5059_v9  }
0x1301   : > { %2583 = vrot.lane.b32.xlu0 %v2577_v11, %s3627_s28 }
0x1303   : > { %v1721_v20 = vpop.permute.xlu0 %1720  ;;  %v5429_v53 = vpop.permute.xlu1 %1697 }
0x1304   : > { %2425 = vrot.lane.b32.xlu1 %v2418_v26, %s3629_s24  ;;  %v2443_v26 = vmul.f32 %v5291_v7, %v5253_v1 }
0x1305   : > { %2222 = vrot.lane.b32.xlu0 %v2215_v51, %s3609_s12  ;;  %3320 = vset.pattern.permute.xlu1 %v3712_v46  ;;  %v3713_v46 = vmov 100  }
0x1307   : > { %v5435_v38 = vpop.permute.xlu0 %1945  ;;  %v5437_v11 = vpop.permute.xlu1 %1924 }
0x1308   : > { %6172 = vst [vmem:[#allocation70_spill] sm:$0xff] %v5435_v38  ;;  %6173 = vst [vmem:[#allocation36_spill] sm:$0xff] %v5437_v11  ;;  %2486 = vperm.xlu1 %3320, %v5059_v9   ;;  %v2214_v9 = vmul.f32 %v5036_v30, %v5242_v47 }
0x1309   : > { %2447 = vrot.lane.b32.xlu0 %v2441_v12, %s3609_s12  ;;  %v2297_v12 = vmul.f32 %v5275_v59, %v6109_v52 }
0x130b   : > { %v1950_v51 = vpop.permute.xlu0 %1949  ;;  %v5445_v44 = vpop.permute.xlu1 %2107  ;;  %v2321_v3 = vadd.f32 %v5351_v34, %v2297_v12 }
0x130c   : > { %2587 = vrot.lane.b32.xlu1 %v2579_v24, %s3627_s28  ;;  %v2216_v24 = vmul.f32 %v5291_v7, %v5242_v47  ;;  %v2465_v47 = vmul.f32 %v5272_v29, %v6125_v4  ;;  %s3514_s28 = sshll.u32 %s3715_s18, 4  ;;  %s3515_s28 = int_to_ptr.vmem [resolvable:$false] %s3514_s28 }
0x130d   : > { %2451 = vrot.lane.b32.xlu0 %v2443_v26, %s3609_s12  ;;  %3321 = vset.pattern.permute.xlu1 %v3713_v46  ;;  %v2345_v26 = vadd.f32 %v5411_v57, %v2321_v3  ;;  %v2239_v46 = vmul.f32 %v5261_v58, %v6126_v21 }
0x130f   : > { %v5455_v60 = vpop.permute.xlu0 %2133  ;;  %v2335_v11 = vpop.permute.xlu1 %2334 }
0x1310   : > { %2220 = vrot.lane.b32.xlu1 %v2214_v9, %s3609_s12  ;;  %v2442_v9 = vmul.f32 %v5042_v63, %v5253_v1 }
0x1311   : > { %2607 = vrot.lane.b32.xlu0 %v2602_v56, %s3604_s27  ;;  %v2601_v56 = vmul.f32 %v5036_v30, %v5239_v48 }
0x1313   : > { %v2361_v23 = vpop.permute.xlu0 %2360  ;;  %v5465_v36 = vpop.permute.xlu1 %2105 }
0x1314   : > { %v5467_v2 = vadd.f32 %v2361_v23, %v2345_v26  ;;  %2224 = vrot.lane.b32.xlu1 %v2216_v24, %s3609_s12  ;;  %v2467_v24 = vmul.f32 %v5272_v29, %v6132_v45 }
0x1315   : > { %2246 = vrot.lane.b32.xlu0 %v2239_v46, %s3630_s21  ;;  %v2238_v46 = vmul.f32 %v5261_v58, %v6125_v4 }
0x1317   : > { %v5475_v12 = vpop.permute.xlu1 %1718 }
0x1318   : > { %v5479_v3 = vsel %vm441_vm8, %v5475_v12, %v1721_v20  ;;  %2449 = vrot.lane.b32.xlu1 %v2442_v9, %s3609_s12  ;;  %v2621_v9 = vmul.f32 %v5250_v42, %v6152_v18  ;;  %v2315_v18 = vsel %vm321_vm0, %v5403_v14, %v5351_v34  ;;  %v2338_v34 = vsel %vm394_vm6, %v5419_v17, %v2335_v11 }
0x1319   : > { %6174 = vst [vmem:[#allocation32_spill] sm:$0xff] %v5479_v3  ;;  %2471 = vrot.lane.b32.xlu0 %v2465_v47, %s3630_s21  ;;  %v2466_v17 = vmul.f32 %v5272_v29, %v6126_v21 }
0x131b   : > { %v1723_v1 = vpop.permute.xlu1 %1722 }
0x131c   : > { %v5488_v26 = vsel %vm441_vm8, %v1721_v20, %v1723_v1  ;;  %2605 = vrot.lane.b32.xlu1 %v2601_v56, %s3604_s27  ;;  %v2240_v20 = vmul.f32 %v5261_v58, %v6132_v45  ;;  %v2314_v56 = vsel %vm321_vm0, %v5371_v50, %v5403_v14  ;;  %v2295_v1 = vmul.f32 %v5275_v59, %v4145_v39  ;;  %s264_s27 = scalar_lea.vmem [#allocation9], %s2979_s30 }
0x131d   : > { %6175 = vst [vmem:[#allocation37_spill] sm:$0xff] %v5488_v26  ;;  %2475 = vrot.lane.b32.xlu0 %v2467_v24, %s3630_s21  ;;  %v2357_v24 = vpop.permute.xlu0 %2356  ;;  %v2644_v58 = vmul.f32 %v5283_v55, %v6153_v62  ;;  %v1614_v50 = vmul.f32 %v5047_v25, %v4145_v39  ;;  %v2339_v14 = vsel %vm394_vm6, %v2335_v11, %v5411_v57  ;;  %s2861_s23 = sshll.u32 %s264_s27, 4  ;;  %s5898_s23 = int_to_ptr.vmem [resolvable:$true] %s2861_s23 }
0x131e   : > { %v1657_v62 = vsel %vm394_vm6, %v5104_v33, %v5109_v54  ;;  %v2646_v57 = vmul.f32 %v5283_v55, %v6155_v8  ;;  %v1681_v11 = vsel %vm412_vm7, %v5413_v6, %v5373_v19  ;;  %v2620_v8 = vmul.f32 %v5250_v42, %v6150_v37  ;;  %s3510_s8 = scalar_lea.vmem %s5898_s23, 256  ;;  %p3517_p6 = scmp.lt.s32.totalorder %s5898_s23, %s3515_s28 }
0x131f   : > { %v1948_v47 = vpop.permute.xlu1 %1947  ;;  %v2068_v37 = vmul.f32 %v5323_v13, %v4145_v39  ;;  %p3511_p1 = scmp.ne.s32.totalorder %s5898_s23, %s3510_s8 }
0x1320   : > { %v5498_v48 = vsel %vm441_vm8, %v5435_v38, %v1948_v47  ;;  %v5501_v3 = vsel %vm441_vm8, %v1948_v47, %v1950_v51  ;;  %2244 = vrot.lane.b32.xlu1 %v2238_v46, %s3630_s21  ;;  %v1633_v51 = vsel %vm321_vm0, %v5098_v32, %v5049_v0  ;;  %v2296_v46 = vmul.f32 %v5275_v59, %v4148_v40 }
0x1321   : > { %6176 = vst [vmem:[#allocation33_spill] sm:$0xff] %v5498_v48  ;;  %6177 = vst [vmem:[#allocation22_spill] sm:$0xff] %v5501_v3  ;;  %2628 = vrot.lane.b32.xlu0 %v2621_v9, %s3628_s9  ;;  %v2319_v59 = vadd.f32 %v2314_v56, %v2295_v1  ;;  %v1638_v3 = vadd.f32 %v1633_v51, %v1614_v50  ;;  %v5544_v33 = vpop.permute.xlu0 %1744  ;;  %p3512_p4 = pnand %p3511_p1, %p3867_p8 }
0x1322   : > { %v2320_v47 = vadd.f32 %v2315_v18, %v2296_v46  ;;  %v2670_v46 = vmul.f32 %v5291_v7, %v5297_v49 }
0x1323   : > { %v2132_v9 = vpop.permute.xlu1 %2131  ;;  %v1662_v26 = vadd.f32 %v1657_v62, %v1638_v3  ;;  %v2668_v3 = vmul.f32 %v5036_v30, %v5297_v49  ;;  %v2622_v30 = vmul.f32 %v5250_v42, %v6151_v28  ;;  %v2645_v42 = vmul.f32 %v5283_v55, %v6154_v10  ;;  %p3513_p2 = pneg %p3512_p4 }
0x1324   : > { %v5530_v32 = vsel %vm412_vm7, %v2132_v9, %v5455_v60  ;;  %2248 = vrot.lane.b32.xlu1 %v2240_v20, %s3630_s21  ;;  %v2343_v20 = vadd.f32 %v2338_v34, %v2319_v59  ;;  %v2344_v48 = vadd.f32 %v2339_v14, %v2320_v47  ;;  %v2669_v10 = vmul.f32 %v5042_v63, %v5297_v49 }
0x1325   : > { %2650 = vrot.lane.b32.xlu0 %v2644_v58, %s3629_s24  ;;  %v1686_v6 = vadd.f32 %v1681_v11, %v1662_v26  ;;  %v2692_v63 = vmul.f32 %v5263_v31, %v6125_v4  ;;  %v2694_v4 = vmul.f32 %v5263_v31, %v6132_v45 }
0x1327   : > { %v2359_v38 = vpop.permute.xlu1 %2358 }
0x1328   : > { %v2362_v56 = vsel %vm412_vm7, %v2357_v24, %v2359_v38  ;;  %v2363_v18 = vsel %vm412_vm7, %v2359_v38, %v2361_v23  ;;  %2473 = vrot.lane.b32.xlu1 %v2466_v17, %s3630_s21  ;;  %v2087_v24 = vsel %vm321_vm0, %v5421_v41, %v5393_v27  ;;  %v1705_v38 = vadd.f32 %v5429_v53, %v1686_v6 }
0x1329   : > { %v2367_v29 = vadd.f32 %v2362_v56, %v2343_v20  ;;  %v5549_v51 = vadd.f32 %v2363_v18, %v2344_v48  ;;  %2654 = vrot.lane.b32.xlu0 %v2646_v57, %s3629_s24  ;;  %v2111_v41 = vsel %vm394_vm6, %v5465_v36, %v5445_v44  ;;  %v2092_v58 = vadd.f32 %v2087_v24, %v2068_v37 }
0x132a   : > { %v1729_v26 = vadd.f32 %v5475_v12, %v1705_v38  ;;  %v2693_v36 = vmul.f32 %v5263_v31, %v6126_v21  ;;  %v2070_v21 = vmul.f32 %v5323_v13, %v6109_v52  ;;  %v2088_v57 = vsel %vm321_vm0, %v5393_v27, %v5341_v43 }
0x132b   : > { %v2130_v1 = vpop.permute.xlu1 %2129  ;;  %v2116_v28 = vadd.f32 %v2111_v41, %v2092_v58  ;;  %v2069_v20 = vmul.f32 %v5323_v13, %v4148_v40  ;;  %v2112_v56 = vsel %vm394_vm6, %v5445_v44, %v5401_v5 }
0x132c   : > { %v2135_v23 = vsel %vm412_vm7, %v2130_v1, %v2132_v9  ;;  %v5561_v48 = vpop.permute.xlu0 %1805  ;;  %2626 = vrot.lane.b32.xlu1 %v2620_v8, %s3628_s9  ;;  %v2094_v49 = vadd.f32 %v5341_v43, %v2070_v21 }
0x132d   : > { %2674 = vrot.lane.b32.xlu0 %v2668_v3, %s3609_s12  ;;  %v2140_v7 = vadd.f32 %v2135_v23, %v2116_v28  ;;  %v2093_v18 = vadd.f32 %v2088_v57, %v2069_v20  ;;  %v1634_v57 = vsel %vm321_vm0, %v5049_v0, %v5101_v16  ;;  %v1615_v20 = vmul.f32 %v5047_v25, %v4148_v40 }
0x132e   : > { %v2118_v27 = vadd.f32 %v5401_v5, %v2094_v49 }
0x132f   : > { %v5575_v9 = vpop.permute.xlu1 %1742  ;;  %v2117_v13 = vadd.f32 %v2112_v56, %v2093_v18  ;;  %v1639_v56 = vadd.f32 %v1634_v57, %v1615_v20  ;;  %v6186_v20 = vld [vmem:[#allocation73_spill] sm:$0xff] }
0x1330   : > { %v5578_v50 = vadd.f32 %v5575_v9, %v1729_v26  ;;  %v5580_v34 = vpop.permute.xlu0 %1973  ;;  %2630 = vrot.lane.b32.xlu1 %v2622_v30, %s3628_s9  ;;  %v2142_v43 = vadd.f32 %v5455_v60, %v2118_v27  ;;  %s3516_s9 = scalar_lea.vmem %s3515_s28, 512 }
0x1331   : > { %2678 = vrot.lane.b32.xlu0 %v2670_v46, %s3609_s12  ;;  %v2141_v3 = vadd.f32 %v5530_v32, %v2117_v13  ;;  %p3518_p12 = scmp.lt.s32.totalorder %s3516_s9, %s3510_s8 }
0x1333   : > { %v5588_v12 = vpop.permute.xlu1 %1746  ;;  %p3519_p0 = por %p3518_p12, %p3517_p6 }
0x1334   : > { %v2152_v14 = vpop.permute.xlu0 %2151  ;;  %2652 = vrot.lane.b32.xlu1 %v2645_v42, %s3629_s24 }
0x1335   : > { %v2159_v62 = vadd.f32 %v2152_v14, %v2140_v7  ;;  %2700 = vrot.lane.b32.xlu0 %v2693_v36, %s3630_s21  ;;  %p3520_p5 = pnand %p3519_p0, %p3513_p2 }
0x1337   : > { %v5592_v59 = vpop.permute.xlu1 %1969 }
0x1338   : > { %v2379_v47 = vpop.permute.xlu0 %2378  ;;  %2713 = vperm.xlu1 %3321, %v5076_v15   ;;  %v6178_v15 = vmov 72  }
0x1339   : > { %v2386_v17 = vadd.f32 %v2379_v47, %v2367_v29 }
0x133b   : > { %v5597_v55 = vpop.permute.xlu1 %1971 }
0x133c   : > { %v2538_v11 = vpop.permute.xlu0 %2537  ;;  %2676 = vrot.lane.b32.xlu1 %v2669_v10, %s3609_s12  ;;  %s2845_s12 = scalar_lea.sflag [#allocation5], %s3919_s13 }
0x133d   : > { %3352 = vset.pattern.permute.xlu1 %v6178_v15  ;;  %v1616_v15 = vmul.f32 %v5047_v25, %v6109_v52  ;;  %v6180_v25 = vld [vmem:[#allocation60_spill] sm:$0xff] }
0x133f   : > { %v5614_v29 = vpop.permute.xlu1 %2032  ;;  %v1640_v0 = vadd.f32 %v5101_v16, %v1616_v15  ;;  %v1841_v16 = vmul.f32 %v6180_v25, %v4145_v39  ;;  %v6187_v15 = vld [vmem:[#allocation61_spill] sm:$0xff] }
0x1340   : > { %v2536_v8 = vpop.permute.xlu0 %2535  ;;  %2698 = vrot.lane.b32.xlu1 %v2692_v63, %s3630_s21 }
0x1341   : > { %v5619_v6 = vsel %vm321_vm0, %v2536_v8, %v2538_v11  ;;  %v6179_v8 = vld [vmem:[#allocation28_spill] sm:$0xff] }
0x1342   : > { %v1860_v13 = vsel %vm321_vm0, %v6179_v8, %v5333_v61 }
0x1343   : > { %v2154_v44 = vpop.permute.xlu1 %2153 }
0x1344   : > { %v2155_v1 = vsel %vm288_vm5, %v2152_v14, %v2154_v44  ;;  %v2161_v24 = vadd.f32 %v2154_v44, %v2142_v43  ;;  %v5626_v38 = vpop.permute.xlu0 %1768  ;;  %2702 = vrot.lane.b32.xlu1 %v2694_v4, %s3630_s21  ;;  %v1843_v4 = vmul.f32 %v6180_v25, %v6109_v52  ;;  %v1842_v44 = vmul.f32 %v6180_v25, %v4148_v40 }
0x1345   : > { %v2160_v5 = vadd.f32 %v2155_v1, %v2141_v3  ;;  %v6181_v1 = vld [vmem:[#allocation63_spill] sm:$0xff] }
0x1347   : > { %v2381_v23 = vpop.permute.xlu1 %2380 }
0x1348   : > { %v2382_v37 = vsel %vm288_vm5, %v2379_v47, %v2381_v23  ;;  %v5631_v30 = vadd.f32 %v2381_v23, %v5467_v2  ;;  %v5633_v45 = vpop.permute.xlu0 %1993  ;;  %v1867_v23 = vadd.f32 %v6181_v1, %v1843_v4 }
0x1349   : > { %v2387_v31 = vadd.f32 %v2382_v37, %v5549_v51  ;;  %v2524_v51 = vmul.f32 %v5363_v22, %v6109_v52  ;;  %v6182_v52 = vld [vmem:[#allocation72_spill] sm:$0xff] }
0x134b   : > { %v2540_v60 = vpop.permute.xlu1 %2539 }
0x134c   : > { %v2542_v32 = vsel %vm321_vm0, %v2538_v11, %v2540_v60  ;;  %v5637_v41 = vpop.permute.xlu0 %1997  ;;  %v2548_v7 = vadd.f32 %v2540_v60, %v2524_v51  ;;  %v6184_v51 = vld [vmem:[#allocation29_spill] sm:$0xff] }
0x134f   : > { %v5639_v26 = vpop.permute.xlu1 %1766 }
0x1350   : > { %v2175_v46 = vpop.permute.xlu0 %2174  ;;  %v1777_v63 = vadd.f32 %v5639_v26, %v5578_v50  ;;  %v1664_v50 = vadd.f32 %v5106_v35, %v1640_v0 }
0x1353   : > { %v5641_v58 = vpop.permute.xlu1 %1770 }
0x1354   : > { %v2400_v28 = vpop.permute.xlu0 %2399 }
0x1355   : > { %v5643_v42 = vadd.f32 %v2400_v28, %v2386_v17 }
0x1357   : > { %v5645_v36 = vpop.permute.xlu1 %1995 }
0x1358   : > { %v5647_v2 = vpop.permute.xlu0 %2403 }
0x135b   : > { %v2173_v14 = vpop.permute.xlu1 %2172 }
0x135c   : > { %v2178_v47 = vsel %vm441_vm8, %v2173_v14, %v2175_v46  ;;  %v5652_v10 = vadd.f32 %v2173_v14, %v2159_v62  ;;  %v2564_v21 = vpop.permute.xlu0 %2563  ;;  %v1658_v62 = vsel %vm394_vm6, %v5109_v54, %v5106_v35  ;;  %v6185_v14 = vld [vmem:[#allocation66_spill] sm:$0xff] }
0x135d   : > { %v5657_v17 = vadd.f32 %v2178_v47, %v2160_v5  ;;  %v5659_v11 = vadd.f32 %v2564_v21, %v2548_v7  ;;  %v1663_v3 = vadd.f32 %v1658_v62, %v1639_v56  ;;  %v1861_v5 = vsel %vm321_vm0, %v5333_v61, %v6181_v1 }
0x135e   : > { %v1885_v7 = vsel %vm394_vm6, %v6182_v52, %v6184_v51  ;;  %v1682_v47 = vsel %vm412_vm7, %v5373_v19, %v6185_v14  ;;  %v1908_v62 = vsel %vm412_vm7, %v6187_v15, %v6186_v20  ;;  %v1688_v0 = vadd.f32 %v6185_v14, %v1664_v50  ;;  %v6193_v14 = vld [vmem:[#allocation32_spill] sm:$0xff] }
0x135f   : > { %v2177_v49 = vpop.permute.xlu1 %2176  ;;  %v1687_v25 = vadd.f32 %v1682_v47, %v1663_v3  ;;  %v2522_v3 = vmul.f32 %v5363_v22, %v4145_v39  ;;  %v6194_v39 = vld [vmem:[#allocation37_spill] sm:$0xff]  ;;  %v1772_v15 = vsel %vm477_vm10, %v5639_v26, %v5626_v38 }
0x1360   : > { %v2179_v18 = vsel %vm441_vm8, %v2175_v46, %v2177_v49  ;;  %v5672_v27 = vpop.permute.xlu0 %1790  ;;  %v1865_v46 = vadd.f32 %v1860_v13, %v1841_v16  ;;  %v6188_v13 = vld [vmem:[#allocation69_spill] sm:$0xff] }
0x1361   : > { %v5679_v43 = vadd.f32 %v2179_v18, %v2161_v24  ;;  %v1801_v54 = vadd.f32 %v5672_v27, %v1777_v63  ;;  %v6183_v24 = vld [vmem:[#allocation62_spill] sm:$0xff]  ;;  %v2523_v63 = vmul.f32 %v5363_v22, %v4148_v40  ;;  %v1866_v18 = vadd.f32 %v1861_v5, %v1842_v44 }
0x1362   : > { %v1884_v37 = vsel %vm394_vm6, %v6183_v24, %v6182_v52  ;;  %v1701_v19 = vsel %vm288_vm5, %v5429_v53, %v6188_v13  ;;  %v6190_v52 = vld [vmem:[#allocation68_spill] sm:$0xff]  ;;  %v1707_v24 = vadd.f32 %v6188_v13, %v1688_v0  ;;  %v6196_v13 = vld [vmem:[#allocation33_spill] sm:$0xff] }
0x1363   : > { %v1808_v60 = vadd.f32 %v5561_v48, %v1801_v54  ;;  %v5695_v35 = vpop.permute.xlu1 %2401  ;;  %v1889_v8 = vadd.f32 %v1884_v37, %v1865_v46  ;;  %v2547_v4 = vadd.f32 %v2542_v32, %v2523_v63  ;;  %v6189_v54 = vld [vmem:[#allocation42_spill] sm:$0xff]  ;;  %v1890_v40 = vadd.f32 %v1885_v7, %v1866_v18  ;;  %v6192_v37 = vld [vmem:[#allocation36_spill] sm:$0xff] }
0x1364   : > { %v2405_v61 = vsel %vm441_vm8, %v2400_v28, %v5695_v35  ;;  %v1795_v57 = vpop.permute.xlu0 %1794  ;;  %v1891_v28 = vadd.f32 %v6184_v51, %v1867_v23  ;;  %v1706_v53 = vadd.f32 %v1701_v19, %v1687_v25  ;;  %v6191_v23 = vld [vmem:[#allocation74_spill] sm:$0xff]  ;;  %v1748_v51 = vsel %vm459_vm9, %v5575_v9, %v5544_v33 }
0x1365   : > { %v1811_v49 = vmax.f32 %v1808_v60, 0.0  ;;  %v5710_v56 = vadd.f32 %v2405_v61, %v2387_v31  ;;  %v1909_v31 = vsel %vm412_vm7, %v6186_v20, %v6190_v52  ;;  %v1913_v50 = vadd.f32 %v1908_v62, %v1889_v8  ;;  %v6195_v18 = vld [vmem:[#allocation70_spill] sm:$0xff] }
0x1366   : > { %v1928_v60 = vsel %vm288_vm5, %v6192_v37, %v6191_v23  ;;  %v1914_v7 = vadd.f32 %v1909_v31, %v1890_v40  ;;  %v1730_v47 = vadd.f32 %v6193_v14, %v1706_v53  ;;  %v1731_v22 = vadd.f32 %v6194_v39, %v1707_v24  ;;  %v6197_v53 = vld [vmem:[#allocation22_spill] sm:$0xff]  ;;  %v6198_v39 = vld [vmem:[#allocation43_spill] sm:$0xff] }
0x1367   : > { %v5718_v16 = vmul.f32 %v6189_v54, %v1811_v49  ;;  %v2562_v1 = vpop.permute.xlu1 %2561  ;;  %v1932_v46 = vadd.f32 %v6192_v37, %v1913_v50  ;;  %v2546_v61 = vadd.f32 %v5619_v6, %v2522_v3  ;;  %v1773_v9 = vsel %vm477_vm10, %v5626_v38, %v5641_v58 }
0x1368   : > { %v2566_v44 = vsel %vm394_vm6, %v2562_v1, %v2564_v21  ;;  %v2020_v5 = vpop.permute.xlu0 %2019  ;;  %v1749_v21 = vsel %vm459_vm9, %v5544_v33, %v5588_v12  ;;  %v1933_v33 = vadd.f32 %v1928_v60, %v1914_v7  ;;  %v1754_v12 = vadd.f32 %v1748_v51, %v1730_v47 }
0x1369   : > { %v5727_v32 = vadd.f32 %v2566_v44, %v2547_v4  ;;  %v1755_v49 = vadd.f32 %v1749_v21, %v1731_v22  ;;  %v1956_v6 = vadd.f32 %v6195_v18, %v1932_v46  ;;  %v1975_v8 = vsel %vm459_vm9, %v5592_v59, %v5597_v55 }
0x136a   : > { %v1915_v26 = vadd.f32 %v6190_v52, %v1891_v28  ;;  %v1957_v19 = vadd.f32 %v6196_v13, %v1933_v33  ;;  %v1778_v38 = vadd.f32 %v1772_v15, %v1754_v12  ;;  %v1999_v54 = vsel %vm477_vm10, %v5633_v45, %v5645_v36 }
0x136b   : > { %v2560_v20 = vpop.permute.xlu1 %2559  ;;  %v1779_v58 = vadd.f32 %v1773_v9, %v1755_v49  ;;  %v1980_v4 = vadd.f32 %v5592_v59, %v1956_v6  ;;  %v1976_v59 = vsel %vm459_vm9, %v5597_v55, %v5580_v34  ;;  %v6200_v49 = vld [vmem:[#allocation44_spill] sm:$0xff]  ;;  %v6201_v6 = vld [vmem:[#allocation45_spill] sm:$0xff] }
0x136c   : > { %v2565_v62 = vsel %vm394_vm6, %v2560_v20, %v2562_v1  ;;  %v5749_v63 = vpop.permute.xlu0 %2196  ;;  %v1934_v28 = vadd.f32 %v6191_v23, %v1915_v26  ;;  %v1981_v52 = vadd.f32 %v1975_v8, %v1957_v19  ;;  %v2000_v23 = vsel %vm477_vm10, %v5645_v36, %v5637_v41 }
0x136d   : > { %v5751_v0 = vadd.f32 %v2565_v62, %v2546_v61  ;;  %v2004_v24 = vadd.f32 %v5633_v45, %v1980_v4 }
0x136e   : > { %v1958_v3 = vadd.f32 %v6197_v53, %v1934_v28  ;;  %v2005_v37 = vadd.f32 %v1999_v54, %v1981_v52 }
0x136f   : > { %v1793_v25 = vpop.permute.xlu1 %1792 }
0x1370   : > { %v1796_v1 = vsel %vm495_vm11, %v5672_v27, %v1793_v25  ;;  %v1797_v40 = vsel %vm495_vm11, %v1793_v25, %v1795_v57  ;;  %v5766_v31 = vpop.permute.xlu0 %2200  ;;  %v1982_v34 = vadd.f32 %v1976_v59, %v1958_v3  ;;  %v6202_v25 = vld [vmem:[#allocation56_spill] sm:$0xff] }
0x1371   : > { %v1802_v50 = vadd.f32 %v1796_v1, %v1778_v38  ;;  %v1803_v44 = vadd.f32 %v1797_v40, %v1779_v58 }
0x1372   : > { %v2006_v47 = vadd.f32 %v2000_v23, %v1982_v34  ;;  %v2207_v34 = vadd.f32 %v5749_v63, %v5652_v10 }
0x1373   : > { %v1809_v27 = vadd.f32 %v5561_v48, %v1802_v50  ;;  %v1810_v57 = vadd.f32 %v5561_v48, %v1803_v44  ;;  %v2018_v60 = vpop.permute.xlu1 %2017  ;;  %v6199_v48 = vld [vmem:[#allocation55_spill] sm:$0xff] }
0x1374   : > { %v2023_v46 = vsel %vm495_vm11, %v2018_v60, %v2020_v5  ;;  %v2028_v51 = vadd.f32 %v2018_v60, %v2004_v24  ;;  %v5780_v21 = vpop.permute.xlu0 %2423 }
0x1375   : > { %v1812_v55 = vmax.f32 %v1809_v27, 0.0  ;;  %v1813_v45 = vmax.f32 %v1810_v57, 0.0  ;;  %v2029_v7 = vadd.f32 %v2023_v46, %v2005_v37  ;;  %v2434_v3 = vadd.f32 %v5780_v21, %v5643_v42 }
0x1376   : > { %v2035_v14 = vadd.f32 %v5614_v29, %v2028_v51 }
0x1377   : > { %v1818_v22 = vmul.f32 %v6198_v39, %v1812_v55  ;;  %v1819_v61 = vmul.f32 %v6199_v48, %v1813_v45  ;;  %v2036_v20 = vadd.f32 %v5614_v29, %v2029_v7  ;;  %v2022_v15 = vpop.permute.xlu1 %2021 }
0x1378   : > { %v2038_v41 = vmax.f32 %v2035_v14, 0.0  ;;  %v2024_v36 = vsel %vm495_vm11, %v2020_v5, %v2022_v15  ;;  %v2428_v9 = vpop.permute.xlu0 %2427 }
0x1379   : > { %v2039_v62 = vmax.f32 %v2036_v20, 0.0  ;;  %v2030_v33 = vadd.f32 %v2024_v36, %v2006_v47  ;;  %v3322_v12 = vpack.i.bf16 %v1819_v61, %v1818_v22  ;;  %v6203_v22 = vld [vmem:[#allocation46_spill] sm:$0xff]  ;;  %v2406_v20 = vsel %vm441_vm8, %v5695_v35, %v5647_v2 }
0x137a   : > { %v2044_v18 = vmul.f32 %v6200_v49, %v2038_v41 }
0x137b   : > { %v2045_v8 = vmul.f32 %v6201_v6, %v2039_v62  ;;  %v2037_v26 = vadd.f32 %v5614_v29, %v2030_v33  ;;  %3323 = vrot.lane.b32.xlu0 %v3322_v12, %s3608_s29  ;;  %v2199_v13 = vpop.permute.xlu1 %2198  ;;  %v2412_v12 = vadd.f32 %v2406_v20, %v5631_v30  ;;  %v6205_v30 = vld [vmem:[#allocation48_spill] sm:$0xff] }
0x137c   : > { %v5791_v19 = vpop.permute.xlu0 %2585  ;;  %v3332_v38 = vpack.i.bf16 %v2044_v18, %v5718_v16  ;;  %v2202_v23 = vsel %vm459_vm9, %v5749_v63, %v2199_v13  ;;  %v2203_v14 = vsel %vm459_vm9, %v2199_v13, %v5766_v31 }
0x137d   : > { %v2040_v58 = vmax.f32 %v2037_v26, 0.0  ;;  %v2208_v7 = vadd.f32 %v2202_v23, %v5657_v17  ;;  %v2209_v17 = vadd.f32 %v2203_v14, %v5679_v43  ;;  %v6208_v14 = vld [vmem:[#allocation58_spill] sm:$0xff] }
0x137f   : > { %v2046_v5 = vmul.f32 %v6202_v25, %v2040_v58  ;;  %3333 = vrot.lane.b32.xlu0 %v3332_v38, %s3608_s29  ;;  %v2260_v4 = vpop.permute.xlu1 %2259  ;;  %v6204_v58 = vld [vmem:[#allocation47_spill] sm:$0xff] }
0x1380   : > { %v5796_v54 = vpop.permute.xlu0 %2583 }
0x1381   : > { %v3327_v1 = vpack.i.bf16 %v2046_v5, %v2045_v8 }
0x1383   : > { %3328 = vrot.lane.b32.xlu1 %v3327_v1, %s3608_s29  ;;  %v2426_v40 = vpop.permute.xlu1 %2425 }
0x1384   : > { %v2223_v29 = vpop.permute.xlu0 %2222  ;;  %v2429_v31 = vsel %vm459_vm9, %v5780_v21, %v2426_v40  ;;  %v2430_v62 = vsel %vm459_vm9, %v2426_v40, %v2428_v9 }
0x1385   : > { %v2435_v26 = vadd.f32 %v2429_v31, %v5710_v56  ;;  %v2436_v13 = vadd.f32 %v2430_v62, %v2412_v12 }
0x1387   : > { %v5799_v28 = vpop.permute.xlu1 %2486 }
0x1388   : > { %v2448_v52 = vpop.permute.xlu0 %2447 }
0x1389   : > { %v2458_v37 = vadd.f32 %v2448_v52, %v2434_v3 }
0x138b   : > { %v5801_v50 = vpop.permute.xlu1 %2587 }
0x138c   : > { %v2452_v44 = vpop.permute.xlu0 %2451 }
0x138f   : > { %v2221_v16 = vpop.permute.xlu1 %2220 }
0x1390   : > { %v5803_v59 = vpop.permute.xlu0 %2607  ;;  %v2226_v55 = vsel %vm477_vm10, %v2221_v16, %v2223_v29  ;;  %v2231_v47 = vadd.f32 %v2221_v16, %v2207_v34 }
0x1391   : > { %v2232_v39 = vadd.f32 %v2226_v55, %v2208_v7 }
0x1393   : > { %v2225_v24 = vpop.permute.xlu1 %2224 }
0x1394   : > { %v2247_v53 = vpop.permute.xlu0 %2246  ;;  %v2227_v10 = vsel %vm477_vm10, %v2223_v29, %v2225_v24 }
0x1395   : > { %v2233_v49 = vadd.f32 %v2227_v10, %v2209_v17 }
0x1397   : > { %v2450_v27 = vpop.permute.xlu1 %2449 }
0x1398   : > { %v2472_v57 = vpop.permute.xlu0 %2471  ;;  %v2453_v18 = vsel %vm477_vm10, %v2448_v52, %v2450_v27  ;;  %v2454_v6 = vsel %vm477_vm10, %v2450_v27, %v2452_v44 }
0x1399   : > { %v2482_v60 = vadd.f32 %v2472_v57, %v2458_v37  ;;  %v2459_v25 = vadd.f32 %v2453_v18, %v2435_v26  ;;  %v2460_v5 = vadd.f32 %v2454_v6, %v2436_v13  ;;  %v6206_v37 = vld [vmem:[#allocation57_spill] sm:$0xff] }
0x139b   : > { %v2489_v46 = vadd.f32 %v5799_v28, %v2482_v60  ;;  %v5810_v51 = vpop.permute.xlu1 %2605 }
0x139c   : > { %v2476_v45 = vpop.permute.xlu0 %2475  ;;  %v2609_v10 = vsel %vm288_vm5, %v5810_v51, %v5803_v59 }
0x139d   : > { %v2492_v42 = vmax.f32 %v2489_v46, 0.0 }
0x139f   : > { %v2498_v48 = vmul.f32 %v6203_v22, %v2492_v42  ;;  %v2245_v61 = vpop.permute.xlu1 %2244 }
0x13a0   : > { %v2250_v63 = vsel %vm495_vm11, %v2245_v61, %v2247_v53  ;;  %v2255_v15 = vadd.f32 %v2245_v61, %v2231_v47  ;;  %v5825_v36 = vpop.permute.xlu0 %2628 }
0x13a1   : > { %v2256_v41 = vadd.f32 %v2250_v63, %v2232_v39 }
0x13a2   : > { %v2262_v33 = vadd.f32 %v2260_v4, %v2255_v15 }
0x13a3   : > { %v2263_v2 = vadd.f32 %v2260_v4, %v2256_v41  ;;  %v2249_v35 = vpop.permute.xlu1 %2248 }
0x13a4   : > { %v2265_v8 = vmax.f32 %v2262_v33, 0.0  ;;  %v2251_v43 = vsel %vm495_vm11, %v2247_v53, %v2249_v35  ;;  %v2651_v29 = vpop.permute.xlu0 %2650 }
0x13a5   : > { %v2266_v38 = vmax.f32 %v2263_v2, 0.0  ;;  %v2257_v21 = vadd.f32 %v2251_v43, %v2233_v49 }
0x13a6   : > { %v2271_v9 = vmul.f32 %v6204_v58, %v2265_v8 }
0x13a7   : > { %v2272_v1 = vmul.f32 %v6205_v30, %v2266_v38  ;;  %v2264_v40 = vadd.f32 %v2260_v4, %v2257_v21  ;;  %v2474_v16 = vpop.permute.xlu1 %2473 }
0x13a8   : > { %v2477_v52 = vsel %vm495_vm11, %v2472_v57, %v2474_v16  ;;  %v2478_v44 = vsel %vm495_vm11, %v2474_v16, %v2476_v45  ;;  %v3347_v24 = vpack.i.bf16 %v2498_v48, %v2271_v9  ;;  %v2655_v4 = vpop.permute.xlu0 %2654  ;;  %v2589_v57 = vsel %vm412_vm7, %v5796_v54, %v5791_v19  ;;  %v6207_v45 = vld [vmem:[#allocation49_spill] sm:$0xff]  ;;  %v6209_v16 = vld [vmem:[#allocation50_spill] sm:$0xff] }
0x13a9   : > { %v2267_v53 = vmax.f32 %v2264_v40, 0.0  ;;  %v2483_v3 = vadd.f32 %v2477_v52, %v2459_v25  ;;  %v2484_v56 = vadd.f32 %v2478_v44, %v2460_v5  ;;  %v2594_v48 = vadd.f32 %v2589_v57, %v5751_v0  ;;  %v6210_v44 = vld [vmem:[#allocation51_spill] sm:$0xff] }
0x13aa   : > { %v2590_v54 = vsel %vm412_vm7, %v5791_v19, %v5801_v50  ;;  %v2596_v19 = vadd.f32 %v5801_v50, %v5659_v11 }
0x13ab   : > { %v2273_v27 = vmul.f32 %v6206_v37, %v2267_v53  ;;  %v2490_v60 = vadd.f32 %v5799_v28, %v2483_v3  ;;  %v2491_v23 = vadd.f32 %v5799_v28, %v2484_v56  ;;  %v2627_v46 = vpop.permute.xlu1 %2626  ;;  %v2613_v20 = vadd.f32 %v5810_v51, %v2594_v48  ;;  %v6211_v56 = vld [vmem:[#allocation59_spill] sm:$0xff] }
0x13ac   : > { %v2675_v28 = vpop.permute.xlu0 %2674  ;;  %v2595_v15 = vadd.f32 %v2590_v54, %v5727_v32  ;;  %v2632_v17 = vsel %vm441_vm8, %v2627_v46, %v5825_v36  ;;  %v2615_v32 = vadd.f32 %v5803_v59, %v2596_v19  ;;  %v3714_v59 = vmov 0.0  }
0x13ad   : > { %v2493_v34 = vmax.f32 %v2490_v60, 0.0  ;;  %v2494_v55 = vmax.f32 %v2491_v23, 0.0  ;;  %v3337_v7 = vpack.i.bf16 %v2273_v27, %v2272_v1  ;;  %v2637_v63 = vadd.f32 %v2627_v46, %v2613_v20  ;;  %2833 = vmatprep.mubr.f32.mxu0 %v3714_v59  ;;  %v267_v27 = vld [vmem:[%s5948_s3] sm:$0xff] }
0x13ae   : > { %v2614_v41 = vadd.f32 %v2609_v10, %v2595_v15 }
0x13af   : > { %v2499_v42 = vmul.f32 %v6207_v45, %v2493_v34  ;;  %v2500_v47 = vmul.f32 %v6208_v14, %v2494_v55  ;;  %3338 = vrot.lane.b32.xlu1 %v3337_v7, %s3608_s29  ;;  %v2631_v39 = vpop.permute.xlu1 %2630  ;;  %v2661_v62 = vadd.f32 %v2651_v29, %v2637_v63 }
0x13b0   : > { %v2679_v31 = vpop.permute.xlu0 %2678  ;;  %v2638_v12 = vadd.f32 %v2632_v17, %v2614_v41  ;;  %v2633_v51 = vsel %vm441_vm8, %v5825_v36, %v2631_v39 }
0x13b1   : > { %v3342_v22 = vpack.i.bf16 %v2500_v47, %v2499_v42  ;;  %v2685_v18 = vadd.f32 %v2675_v28, %v2661_v62  ;;  %v2639_v8 = vadd.f32 %v2633_v51, %v2615_v32 }
0x13b3   : > { %3348 = vrot.lane.b32.xlu1 %v3347_v24, %s3608_s29  ;;  %3343 = vrot.lane.b32.xlu0 %v3342_v22, %s3608_s29  ;;  %v2653_v61 = vpop.permute.xlu1 %2652 }
0x13b4   : > { %v2656_v33 = vsel %vm459_vm9, %v2651_v29, %v2653_v61  ;;  %v2657_v6 = vsel %vm459_vm9, %v2653_v61, %v2655_v4  ;;  %v2701_v43 = vpop.permute.xlu0 %2700 }
0x13b5   : > { %v2662_v35 = vadd.f32 %v2656_v33, %v2638_v12  ;;  %v2663_v21 = vadd.f32 %v2657_v6, %v2639_v8 }
0x13b7   : > { %v2714_v0 = vpop.permute.xlu1 %2713 }
0x13bb   : > { %v2677_v49 = vpop.permute.xlu1 %2676 }
0x13bc   : > { %v2680_v2 = vsel %vm477_vm10, %v2675_v28, %v2677_v49  ;;  %v2681_v38 = vsel %vm477_vm10, %v2677_v49, %v2679_v31 }
0x13bd   : > { %v2686_v26 = vadd.f32 %v2680_v2, %v2662_v35  ;;  %v2687_v9 = vadd.f32 %v2681_v38, %v2663_v21 }
0x13bf   : > { %v2699_v13 = vpop.permute.xlu1 %2698 }
0x13c0   : > { %v2704_v11 = vsel %vm495_vm11, %v2699_v13, %v2701_v43  ;;  %v2709_v50 = vadd.f32 %v2699_v13, %v2685_v18 }
0x13c1   : > { %v2710_v58 = vadd.f32 %v2704_v11, %v2686_v26 }
0x13c2   : > { %v2716_v36 = vadd.f32 %v2714_v0, %v2709_v50 }
0x13c3   : > { %v2717_v25 = vadd.f32 %v2714_v0, %v2710_v58  ;;  %v2703_v5 = vpop.permute.xlu1 %2702 }
0x13c4   : > { %v2719_v30 = vmax.f32 %v2716_v36, 0.0  ;;  %v2705_v1 = vsel %vm495_vm11, %v2701_v43, %v2703_v5 }
0x13c5   : > { %v2720_v40 = vmax.f32 %v2717_v25, 0.0  ;;  %v2711_v29 = vadd.f32 %v2705_v1, %v2687_v9 }
0x13c6   : > { %v2725_v52 = vmul.f32 %v6209_v16, %v2719_v30 }
0x13c7   : > { %v2726_v24 = vmul.f32 %v6210_v44, %v2720_v40  ;;  %v2718_v53 = vadd.f32 %v2714_v0, %v2711_v29 }
0x13c9   : > { %v2721_v3 = vmax.f32 %v2718_v53, 0.0  ;;  %2733 = vrot.lane.b32.xlu0 %v2726_v24, %s3608_s29 }
0x13cb   : > { %v2727_v37 = vmul.f32 %v6211_v56, %v2721_v3 }
0x13cd   : > { %2731 = vrot.lane.b32.xlu0 %v2725_v52, %s3608_s29  ;;  %2735 = vrot.lane.b32.xlu1 %v2727_v37, %s3608_s29  ;;  %s5896_s29 = scalar_lea.hbm %s5949_s4, %s2987_s25 }
0x13d1   : > { %2763 = vperm.xlu1 %3352, %v267_v27  }
0x13ed   : > { %v3324_v60 = vpop.permute.xlu0 %3323 }
0x13ee   : > { %v3326_v46 = vunpack.i.h.bf16 %v3324_v60  ;;  %v3325_v34 = vunpack.i.l.bf16 %v3324_v60 }
0x13f0   : > { %v1830_v42 = vsel %vm360_vm2, %v3325_v34, %v3326_v46 }
0x13f1   : > { %v3334_v23 = vpop.permute.xlu0 %3333 }
0x13f2   : > { %v3335_v55 = vunpack.i.l.bf16 %v3334_v23  ;;  %v3336_v7 = vunpack.i.h.bf16 %v3334_v23 }
0x13f4   : > { %v1829_v47 = vsel %vm360_vm2, %v3335_v55, %v3325_v34 }
0x13f5   : > { %v3329_v4 = vpop.permute.xlu1 %3328 }
0x13f6   : > { %v3331_v57 = vunpack.i.h.bf16 %v3329_v4  ;;  %v3330_v45 = vunpack.i.l.bf16 %v3329_v4 }
0x13f8   : > { %v2057_v14 = vsel %vm360_vm2, %v3330_v45, %v3331_v57  ;;  %v2056_v39 = vsel %vm360_vm2, %v3336_v7, %v3330_v45 }
0x13f9   : > { %v2996_v22 = vpack.c.bf16 %v2057_v14, %v1830_v42  ;;  %v2998_v48 = vpack.c.bf16 %v2056_v39, %v1829_v47 }
0x13fb   : > { %2997 = vmatprep.subr.bf16.mxu0 %v2996_v22 }
0x13fc   : > { %2999 = vmatpush1.bf16.msra.mxu0 %v2998_v48 }
0x1421   : > { %v3339_v28 = vpop.permute.xlu1 %3338 }
0x1422   : > { %v3341_v61 = vunpack.i.h.bf16 %v3339_v28  ;;  %v3340_v54 = vunpack.i.l.bf16 %v3339_v28 }
0x1424   : > { %v2284_v41 = vsel %vm360_vm2, %v3340_v54, %v3341_v61 }
0x1425   : > { %v3344_v20 = vpop.permute.xlu0 %3343  ;;  %v3349_v10 = vpop.permute.xlu1 %3348 }
0x1426   : > { %v3346_v63 = vunpack.i.h.bf16 %v3344_v20  ;;  %v3345_v15 = vunpack.i.l.bf16 %v3344_v20  ;;  %v3351_v0 = vunpack.i.h.bf16 %v3349_v10  ;;  %v3350_v17 = vunpack.i.l.bf16 %v3349_v10 }
0x1428   : > { %v2511_v31 = vsel %vm360_vm2, %v3345_v15, %v3346_v63  ;;  %v2283_v62 = vsel %vm360_vm2, %v3350_v17, %v3340_v54  ;;  %v2510_v33 = vsel %vm360_vm2, %v3351_v0, %v3345_v15 }
0x1429   : > { %v3000_v19 = vpack.c.bf16 %v2511_v31, %v2284_v41  ;;  %v3002_v12 = vpack.c.bf16 %v2510_v33, %v2283_v62 }
0x142b   : > { %3001 = vmatprep.subr.bf16.mxu0 %v3000_v19 }
0x142c   : > { %3003 = vmatpush1.bf16.msra.mxu0 %v3002_v12 }
0x143b   : > { %v2734_v49 = vpop.permute.xlu0 %2733 }
0x143f   : > { %v2732_v51 = vpop.permute.xlu0 %2731  ;;  %v2736_v2 = vpop.permute.xlu1 %2735 }
0x1440   : > { %v2738_v32 = vsel %vm360_vm2, %v2734_v49, %v2736_v2  ;;  %v2737_v35 = vsel %vm360_vm2, %v2732_v51, %v2734_v49 }
0x1441   : > { %2785 = vmatprep.subr.mxu0 %v2738_v32 }
0x1442   : > { %2786 = vmatpush1.msra.mxu0 %v2737_v35 }
0x1443   : > { %2980 = vmatmul.mubr.msk.f32.vlgmr.msra.gmra.mrb[0].mxu0 %vm2766_vm12, %v267_v27 }
0x1450   : > { %v2764_v18 = vpop.permute.xlu1 %2763 }
0x1516   : > { %v2835_v6 = vpop.f32.mrb[0].mxu0 }
0x1517   : > { %v2836_v8 = vadd.f32 %v2835_v6, %v2764_v18  ;;  %v2837_v43 = vpop.f32.mrb[1].mxu0 }
0x1518   : > { %v2838_v26 = vadd.f32 %v2837_v43, %v2764_v18 }
0x1519   : > { %v2840_v13 = vmax.f32 %v2836_v8, 0.0 }
0x151a   : > { %v2841_v38 = vmax.f32 %v2838_v26, 0.0 }
0x151b   : > { %2842 = vst [vmem:[%s264_s27] sm:$0xff] %v2840_v13 }
0x151c   : > { %2843 = vst [vmem:[%s264_s27 + $0x8] sm:$0xff] %v2841_v38 }
0x151d   : > { %3523 = shalt.err (!%p3520_p5)
}
0x151e   : > { %s3524_s13 = scalar_lea.hbm %s5896_s29, 256  ;;  %s3528_s22 = scalar_lea.hbm %s5949_s4, 512 }
0x151f   : > { %p3525_p10 = scmp.ne.s32.totalorder %s5896_s29, %s3524_s13  ;;  %p3529_p7 = scmp.lt.u32.totalorder %s5896_s29, %s5949_s4 }
0x1520   : > { %p3530_p3 = scmp.lt.u32.totalorder %s3528_s22, %s3524_s13  ;;  %p3532_p1 = scmp.lt.u32.totalorder %s3524_s13, %s5896_s29 }
0x1521   : > { %p3526_p13 = pnand %p3525_p10, %p3867_p8 }
0x1522   : > { %p3531_p11 = por %p3530_p3, %p3529_p7 }
0x1523   : > { %p3527_p9 = pneg %p3526_p13 }
0x1524   : > { %p3533_p4 = por %p3532_p1, %p3531_p11 }
0x1526   : > { %p3534_p2 = pnand %p3533_p4, %p3527_p9 }
0x1528   : > { %3537 = shalt.err (!%p3534_p2)
}
0x1529   : > { %3014 = dma.vmem_to_hbm [thread:$0]  (%p3867_p8), %s5898_s23, 256, %s5896_s29, %s2845_s12  }
0x152a PF: > { %s2873_s25 = sand.u32 1, %s3576_s15   ;;  %p6212_p6 = scmp.ne.s32.totalorder %s6032_s26, 0 }
0x152b   : > { %p6213_p12 = scmp.ge.s32.totalorder %s3596_s20, 2  ;;  %s2874_s27 = scalar_lea.sflag [#allocation5], %s2873_s25 }
0x152d   : > { %p3028_p0 = pnand %p6213_p12, %p6212_p6 }
0x152f   : > { %3571 = dma.done.wait (!%p3028_p0), %s2874_s27, 256  }
0x1530   : > { %3573 = vsyncadd (!%p3028_p0), %s2874_s27, 4294967040  ;;  %s21_s20 = sadd.s32 1, %s3596_s20   ;;  %s6214_s15 = smov %s3580_s16 }
0x1531   : > { %p18_p5 = scmp.ge.s32.totalorder %s21_s20, 4   ;;  %s6215_s16 = smov %s3584_s17 }
0x1532   : > { %s6216_s17 = smov %s3876_s7  ;;  %s6217_s18 = smov %s3592_s19 }
0x1533   : > { %s6218_s19 = smov %s6220_s14  ;;  %20 = sbr.rel (!%p18_p5) target bundleno = 7 (0x7), region = 91 }
0x153a   :  { %2879 = vsyncpa [#allocation4], 1 }
0x153b   :  { %2881 = vsyncpa [#allocation4 + $0x1], 1 }
0x153c   :  { %2882 = vsyncpa [#allocation7], 1 }
0x153d   :  { %2883 = vsyncpa [#allocation5], 1 }
0x153e   :  { %2885 = vsyncpa [#allocation5 + $0x1], 1 }

</bundles_post_ra>
